<compile_context>
chip_gen: v6e
topology: v6e:2x2x1
jax: 0.10.0
libtpu: 0.0.40
codegen_flags: <defaults>
</compile_context>

<pallas_src>
import functools

import jax
import jax.numpy as jnp
from jax.experimental import pallas as pl
from jax.experimental.pallas import tpu as pltpu


def _attention_kernel(x_ref, o_ref, acc_ref, *, num_heads, scale):
    """x_ref: (Bb, N, 3C) packed q|k|v.  o_ref: (Bb, N, C).  acc_ref: (N, C) f32."""
    Bb = o_ref.shape[0]
    C = o_ref.shape[-1]
    Dh = C // num_heads

    for b in range(Bb):                 # static; Bb is a Python int
        for h in range(num_heads):      # static unroll; head temporaries die at
            lo = h * Dh                 # the scratch write -> bounded live ranges
            # scale in f32, then single-pass bf16 MXU operands (f32 accumulate)
            q = (x_ref[b, :, lo:lo + Dh] * scale).astype(jnp.bfloat16)
            k = x_ref[b, :, C + lo:C + lo + Dh].astype(jnp.bfloat16)
            v = x_ref[b, :, 2 * C + lo:2 * C + lo + Dh].astype(jnp.bfloat16)

            # scores: (N, Dh) x (N, Dh) contracted over Dh -> (N, N)   (MXU)
            s = jnp.einsum("qd,kd->qk", q, k,
                           preferred_element_type=jnp.float32)
            # numerically-stable softmax over keys (XLU reduce + EUP exp), f32
            m = jnp.max(s, axis=-1, keepdims=True)
            p = jnp.exp(s - m)
            l = jnp.sum(p, axis=-1, keepdims=True)
            # (N, N) @ (N, Dh) -> (N, Dh); normalize after PV with EUP recip
            o = jnp.dot(p.astype(jnp.bfloat16), v,
                        preferred_element_type=jnp.float32)
            acc_ref[:, lo:lo + Dh] = o * pl.reciprocal(l, approx=True)

        # One dense (N, C) store into the pipelined output buffer per row.
        o_ref[b, :, :] = acc_ref[...].astype(o_ref.dtype)


def attention_pure(x, num_heads=8, qk_scale=None, batch_block=1):
    """Pallas forward of Attention_pure.  x: (B, N, 3*C) -> (B, N, C)."""
    B, N, C3 = x.shape
    assert C3 % 3 == 0, "channel dim must pack q|k|v"
    C = C3 // 3
    assert C % num_heads == 0, "C must be divisible by num_heads"
    assert B % batch_block == 0, "B must be divisible by batch_block"
    head_dim = C // num_heads
    scale = float(qk_scale) if qk_scale is not None else head_dim ** -0.5

    kernel = functools.partial(_attention_kernel,
                               num_heads=num_heads, scale=scale)
    cost = pl.CostEstimate(
        flops=4 * B * num_heads * N * N * head_dim,       # QK^T + PV matmuls
        transcendentals=B * num_heads * N * N,            # exp in softmax
        bytes_accessed=B * N * (C3 + C) * x.dtype.itemsize,
    )
    return pl.pallas_call(
        kernel,
        out_shape=jax.ShapeDtypeStruct((B, N, C), x.dtype),
        grid=(B // batch_block,),
        in_specs=[pl.BlockSpec((batch_block, N, C3), lambda b: (b, 0, 0))],
        out_specs=pl.BlockSpec((batch_block, N, C), lambda b: (b, 0, 0)),
        scratch_shapes=[pltpu.VMEM((N, C), jnp.float32)],
        compiler_params=pltpu.CompilerParams(
            dimension_semantics=("parallel",)),
        cost_estimate=cost,
    )(x)


def _attention_reference(x, num_heads=8, qk_scale=None):
    """Pure-JAX f32 port of the PyTorch module (self-check only)."""
    B, N, C3 = x.shape
    C = C3 // 3
    Dh = C // num_heads
    scale = qk_scale if qk_scale is not None else Dh ** -0.5
    qkv = x.reshape(B, N, 3, num_heads, Dh).transpose(2, 0, 3, 1, 4)
    q, k, v = qkv[0], qkv[1], qkv[2]
    attn = jnp.einsum("bhqd,bhkd->bhqk", q, k,
                      precision=jax.lax.Precision.HIGHEST) * scale
    attn = jax.nn.softmax(attn, axis=-1)
    out = jnp.einsum("bhqk,bhkd->bhqd", attn, v,
                     precision=jax.lax.Precision.HIGHEST)
    return out.transpose(0, 2, 1, 3).reshape(B, N, C)


if __name__ == "__main__":
    # dim = 3*C = 384, C = 128, num_heads = 8 -> head_dim = 16, seq N = 128
    B, N, num_heads, C = 2, 128, 8, 128
    key = jax.random.PRNGKey(0)
    x = jax.random.normal(key, (B, N, 3 * C), jnp.float32)

    fwd = jax.jit(functools.partial(attention_pure, num_heads=num_heads))
    out = fwd(x)
    jax.block_until_ready(out)

    assert out.shape == (B, N, C) and out.dtype == jnp.float32
    ref = _attention_reference(x, num_heads=num_heads)
    err = float(jnp.max(jnp.abs(out - ref)))
    # bf16 MXU operands with f32 accumulation -> expect ~1e-2 max abs error
    assert jnp.allclose(out, ref, atol=3e-2, rtol=3e-2), f"max |err| = {err}"
    print("KERNEL_OK")
</pallas_src>

<mosaic_0001>
module attributes {stable_mosaic.version = 11 : i64} {
  func.func @_attention_kernel(%arg0: i32, %arg1: memref<1x128x384xf32, #tpu.memory_space<vmem>>, %arg2: memref<1x128x128xf32, #tpu.memory_space<vmem>>, %arg3: memref<128x128xf32, #tpu.memory_space<vmem>>) attributes {dimension_semantics = [#tpu.dimension_semantics<parallel>], iteration_bounds = array<i64: 2>, scalar_prefetch = 0 : i64, scratch_operands = 1 : i64, tpu.core_type = #tpu.core_type<tc>, window_params = [{transform_indices = @transform_0, window_bounds = array<i64: 1, 128, 384>}, {transform_indices = @transform_1, window_bounds = array<i64: 1, 128, 128>}]} {
    %c0 = arith.constant 0 : index
    %c0_0 = arith.constant 0 : index
    %c0_1 = arith.constant 0 : index
    %0 = vector.load %arg1[%c0, %c0_0, %c0_1] : memref<1x128x384xf32, #tpu.memory_space<vmem>>, vector<1x128x16xf32>
    %1 = vector.shape_cast %0 : vector<1x128x16xf32> to vector<128x16xf32>
    %cst = arith.constant 2.500000e-01 : f32
    %2 = vector.broadcast %cst : f32 to vector<128x16xf32>
    %3 = arith.mulf %1, %2 : vector<128x16xf32>
    %4 = arith.truncf %3 : vector<128x16xf32> to vector<128x16xbf16>
    %c0_2 = arith.constant 0 : index
    %c0_3 = arith.constant 0 : index
    %c128 = arith.constant 128 : index
    %5 = vector.load %arg1[%c0_2, %c0_3, %c128] : memref<1x128x384xf32, #tpu.memory_space<vmem>>, vector<1x128x16xf32>
    %6 = vector.shape_cast %5 : vector<1x128x16xf32> to vector<128x16xf32>
    %7 = arith.truncf %6 : vector<128x16xf32> to vector<128x16xbf16>
    %c0_4 = arith.constant 0 : index
    %c0_5 = arith.constant 0 : index
    %c256 = arith.constant 256 : index
    %8 = vector.load %arg1[%c0_4, %c0_5, %c256] : memref<1x128x384xf32, #tpu.memory_space<vmem>>, vector<1x128x16xf32>
    %9 = vector.shape_cast %8 : vector<1x128x16xf32> to vector<128x16xf32>
    %10 = arith.truncf %9 : vector<128x16xf32> to vector<128x16xbf16>
    "tpu.trace_start"() <{level = 10 : i32, message = "qd,kd->qk"}> : () -> ()
    %cst_6 = arith.constant dense<0.000000e+00> : vector<128x128xf32>
    %11 = tpu.matmul %4, %7, %cst_6 {dimension_numbers = #tpu.dot_dimension_numbers<[1], [1], [0], [0], [0, 0, 1, 0], [], []>} : vector<128x16xbf16>, vector<128x16xbf16>, vector<128x128xf32> -> vector<128x128xf32>
    "tpu.trace_stop"() : () -> ()
    %cst_7 = arith.constant dense<0xFF800000> : vector<128xf32>
    %12 = vector.multi_reduction <maximumf>, %11, %cst_7 [1] : vector<128x128xf32> to vector<128xf32>
    %13 = vector.shape_cast %12 : vector<128xf32> to vector<128x1xf32>
    %14 = vector.broadcast %13 : vector<128x1xf32> to vector<128x128xf32>
    %15 = arith.subf %11, %14 : vector<128x128xf32>
    %16 = math.exp %15 : vector<128x128xf32>
    %cst_8 = arith.constant dense<0.000000e+00> : vector<128xf32>
    %17 = vector.multi_reduction <add>, %16, %cst_8 [1] : vector<128x128xf32> to vector<128xf32>
    %18 = vector.shape_cast %17 : vector<128xf32> to vector<128x1xf32>
    %19 = arith.truncf %16 : vector<128x128xf32> to vector<128x128xbf16>
    %cst_9 = arith.constant dense<0.000000e+00> : vector<128x16xf32>
    %20 = tpu.matmul %19, %10, %cst_9 {dimension_numbers = #tpu.dot_dimension_numbers<[1], [0], [0], [1], [0, 0, 1, 1], [], []>} : vector<128x128xbf16>, vector<128x16xbf16>, vector<128x16xf32> -> vector<128x16xf32>
    %21 = tpu.reciprocal %18 {approx = true} : vector<128x1xf32> -> vector<128x1xf32>
    %22 = vector.broadcast %21 : vector<128x1xf32> to vector<128x16xf32>
    %23 = arith.mulf %20, %22 : vector<128x16xf32>
    %c0_10 = arith.constant 0 : index
    %c0_11 = arith.constant 0 : index
    %24 = vector.load %arg3[%c0_10, %c0_11] : memref<128x128xf32, #tpu.memory_space<vmem>>, vector<128x16xf32>
    tpu.vector_store %arg3[%c0_10, %c0_11], %23 {strides = array<i32>} : memref<128x128xf32, #tpu.memory_space<vmem>>, vector<128x16xf32>,
    %c0_12 = arith.constant 0 : index
    %c0_13 = arith.constant 0 : index
    %c16 = arith.constant 16 : index
    %25 = vector.load %arg1[%c0_12, %c0_13, %c16] : memref<1x128x384xf32, #tpu.memory_space<vmem>>, vector<1x128x16xf32>
    %26 = vector.shape_cast %25 : vector<1x128x16xf32> to vector<128x16xf32>
    %cst_14 = arith.constant 2.500000e-01 : f32
    %27 = vector.broadcast %cst_14 : f32 to vector<128x16xf32>
    %28 = arith.mulf %26, %27 : vector<128x16xf32>
    %29 = arith.truncf %28 : vector<128x16xf32> to vector<128x16xbf16>
    %c0_15 = arith.constant 0 : index
    %c0_16 = arith.constant 0 : index
    %c144 = arith.constant 144 : index
    %30 = vector.load %arg1[%c0_15, %c0_16, %c144] : memref<1x128x384xf32, #tpu.memory_space<vmem>>, vector<1x128x16xf32>
    %31 = vector.shape_cast %30 : vector<1x128x16xf32> to vector<128x16xf32>
    %32 = arith.truncf %31 : vector<128x16xf32> to vector<128x16xbf16>
    %c0_17 = arith.constant 0 : index
    %c0_18 = arith.constant 0 : index
    %c272 = arith.constant 272 : index
    %33 = vector.load %arg1[%c0_17, %c0_18, %c272] : memref<1x128x384xf32, #tpu.memory_space<vmem>>, vector<1x128x16xf32>
    %34 = vector.shape_cast %33 : vector<1x128x16xf32> to vector<128x16xf32>
    %35 = arith.truncf %34 : vector<128x16xf32> to vector<128x16xbf16>
    "tpu.trace_start"() <{level = 10 : i32, message = "qd,kd->qk"}> : () -> ()
    %cst_19 = arith.constant dense<0.000000e+00> : vector<128x128xf32>
    %36 = tpu.matmul %29, %32, %cst_19 {dimension_numbers = #tpu.dot_dimension_numbers<[1], [1], [0], [0], [0, 0, 1, 0], [], []>} : vector<128x16xbf16>, vector<128x16xbf16>, vector<128x128xf32> -> vector<128x128xf32>
    "tpu.trace_stop"() : () -> ()
    %cst_20 = arith.constant dense<0xFF800000> : vector<128xf32>
    %37 = vector.multi_reduction <maximumf>, %36, %cst_20 [1] : vector<128x128xf32> to vector<128xf32>
    %38 = vector.shape_cast %37 : vector<128xf32> to vector<128x1xf32>
    %39 = vector.broadcast %38 : vector<128x1xf32> to vector<128x128xf32>
    %40 = arith.subf %36, %39 : vector<128x128xf32>
    %41 = math.exp %40 : vector<128x128xf32>
    %cst_21 = arith.constant dense<0.000000e+00> : vector<128xf32>
    %42 = vector.multi_reduction <add>, %41, %cst_21 [1] : vector<128x128xf32> to vector<128xf32>
    %43 = vector.shape_cast %42 : vector<128xf32> to vector<128x1xf32>
    %44 = arith.truncf %41 : vector<128x128xf32> to vector<128x128xbf16>
    %cst_22 = arith.constant dense<0.000000e+00> : vector<128x16xf32>
    %45 = tpu.matmul %44, %35, %cst_22 {dimension_numbers = #tpu.dot_dimension_numbers<[1], [0], [0], [1], [0, 0, 1, 1], [], []>} : vector<128x128xbf16>, vector<128x16xbf16>, vector<128x16xf32> -> vector<128x16xf32>
    %46 = tpu.reciprocal %43 {approx = true} : vector<128x1xf32> -> vector<128x1xf32>
    %47 = vector.broadcast %46 : vector<128x1xf32> to vector<128x16xf32>
    %48 = arith.mulf %45, %47 : vector<128x16xf32>
    %c0_23 = arith.constant 0 : index
    %c16_24 = arith.constant 16 : index
    %49 = vector.load %arg3[%c0_23, %c16_24] : memref<128x128xf32, #tpu.memory_space<vmem>>, vector<128x16xf32>
    tpu.vector_store %arg3[%c0_23, %c16_24], %48 {strides = array<i32>} : memref<128x128xf32, #tpu.memory_space<vmem>>, vector<128x16xf32>,
    %c0_25 = arith.constant 0 : index
    %c0_26 = arith.constant 0 : index
    %c32 = arith.constant 32 : index
    %50 = vector.load %arg1[%c0_25, %c0_26, %c32] : memref<1x128x384xf32, #tpu.memory_space<vmem>>, vector<1x128x16xf32>
    %51 = vector.shape_cast %50 : vector<1x128x16xf32> to vector<128x16xf32>
    %cst_27 = arith.constant 2.500000e-01 : f32
    %52 = vector.broadcast %cst_27 : f32 to vector<128x16xf32>
    %53 = arith.mulf %51, %52 : vector<128x16xf32>
    %54 = arith.truncf %53 : vector<128x16xf32> to vector<128x16xbf16>
    %c0_28 = arith.constant 0 : index
    %c0_29 = arith.constant 0 : index
    %c160 = arith.constant 160 : index
    %55 = vector.load %arg1[%c0_28, %c0_29, %c160] : memref<1x128x384xf32, #tpu.memory_space<vmem>>, vector<1x128x16xf32>
    %56 = vector.shape_cast %55 : vector<1x128x16xf32> to vector<128x16xf32>
    %57 = arith.truncf %56 : vector<128x16xf32> to vector<128x16xbf16>
    %c0_30 = arith.constant 0 : index
    %c0_31 = arith.constant 0 : index
    %c288 = arith.constant 288 : index
    %58 = vector.load %arg1[%c0_30, %c0_31, %c288] : memref<1x128x384xf32, #tpu.memory_space<vmem>>, vector<1x128x16xf32>
    %59 = vector.shape_cast %58 : vector<1x128x16xf32> to vector<128x16xf32>
    %60 = arith.truncf %59 : vector<128x16xf32> to vector<128x16xbf16>
    "tpu.trace_start"() <{level = 10 : i32, message = "qd,kd->qk"}> : () -> ()
    %cst_32 = arith.constant dense<0.000000e+00> : vector<128x128xf32>
    %61 = tpu.matmul %54, %57, %cst_32 {dimension_numbers = #tpu.dot_dimension_numbers<[1], [1], [0], [0], [0, 0, 1, 0], [], []>} : vector<128x16xbf16>, vector<128x16xbf16>, vector<128x128xf32> -> vector<128x128xf32>
    "tpu.trace_stop"() : () -> ()
    %cst_33 = arith.constant dense<0xFF800000> : vector<128xf32>
    %62 = vector.multi_reduction <maximumf>, %61, %cst_33 [1] : vector<128x128xf32> to vector<128xf32>
    %63 = vector.shape_cast %62 : vector<128xf32> to vector<128x1xf32>
    %64 = vector.broadcast %63 : vector<128x1xf32> to vector<128x128xf32>
    %65 = arith.subf %61, %64 : vector<128x128xf32>
    %66 = math.exp %65 : vector<128x128xf32>
    %cst_34 = arith.constant dense<0.000000e+00> : vector<128xf32>
    %67 = vector.multi_reduction <add>, %66, %cst_34 [1] : vector<128x128xf32> to vector<128xf32>
    %68 = vector.shape_cast %67 : vector<128xf32> to vector<128x1xf32>
    %69 = arith.truncf %66 : vector<128x128xf32> to vector<128x128xbf16>
    %cst_35 = arith.constant dense<0.000000e+00> : vector<128x16xf32>
    %70 = tpu.matmul %69, %60, %cst_35 {dimension_numbers = #tpu.dot_dimension_numbers<[1], [0], [0], [1], [0, 0, 1, 1], [], []>} : vector<128x128xbf16>, vector<128x16xbf16>, vector<128x16xf32> -> vector<128x16xf32>
    %71 = tpu.reciprocal %68 {approx = true} : vector<128x1xf32> -> vector<128x1xf32>
    %72 = vector.broadcast %71 : vector<128x1xf32> to vector<128x16xf32>
    %73 = arith.mulf %70, %72 : vector<128x16xf32>
    %c0_36 = arith.constant 0 : index
    %c32_37 = arith.constant 32 : index
    %74 = vector.load %arg3[%c0_36, %c32_37] : memref<128x128xf32, #tpu.memory_space<vmem>>, vector<128x16xf32>
    tpu.vector_store %arg3[%c0_36, %c32_37], %73 {strides = array<i32>} : memref<128x128xf32, #tpu.memory_space<vmem>>, vector<128x16xf32>,
    %c0_38 = arith.constant 0 : index
    %c0_39 = arith.constant 0 : index
    %c48 = arith.constant 48 : index
    %75 = vector.load %arg1[%c0_38, %c0_39, %c48] : memref<1x128x384xf32, #tpu.memory_space<vmem>>, vector<1x128x16xf32>
    %76 = vector.shape_cast %75 : vector<1x128x16xf32> to vector<128x16xf32>
    %cst_40 = arith.constant 2.500000e-01 : f32
    %77 = vector.broadcast %cst_40 : f32 to vector<128x16xf32>
    %78 = arith.mulf %76, %77 : vector<128x16xf32>
    %79 = arith.truncf %78 : vector<128x16xf32> to vector<128x16xbf16>
    %c0_41 = arith.constant 0 : index
    %c0_42 = arith.constant 0 : index
    %c176 = arith.constant 176 : index
    %80 = vector.load %arg1[%c0_41, %c0_42, %c176] : memref<1x128x384xf32, #tpu.memory_space<vmem>>, vector<1x128x16xf32>
    %81 = vector.shape_cast %80 : vector<1x128x16xf32> to vector<128x16xf32>
    %82 = arith.truncf %81 : vector<128x16xf32> to vector<128x16xbf16>
    %c0_43 = arith.constant 0 : index
    %c0_44 = arith.constant 0 : index
    %c304 = arith.constant 304 : index
    %83 = vector.load %arg1[%c0_43, %c0_44, %c304] : memref<1x128x384xf32, #tpu.memory_space<vmem>>, vector<1x128x16xf32>
    %84 = vector.shape_cast %83 : vector<1x128x16xf32> to vector<128x16xf32>
    %85 = arith.truncf %84 : vector<128x16xf32> to vector<128x16xbf16>
    "tpu.trace_start"() <{level = 10 : i32, message = "qd,kd->qk"}> : () -> ()
    %cst_45 = arith.constant dense<0.000000e+00> : vector<128x128xf32>
    %86 = tpu.matmul %79, %82, %cst_45 {dimension_numbers = #tpu.dot_dimension_numbers<[1], [1], [0], [0], [0, 0, 1, 0], [], []>} : vector<128x16xbf16>, vector<128x16xbf16>, vector<128x128xf32> -> vector<128x128xf32>
    "tpu.trace_stop"() : () -> ()
    %cst_46 = arith.constant dense<0xFF800000> : vector<128xf32>
    %87 = vector.multi_reduction <maximumf>, %86, %cst_46 [1] : vector<128x128xf32> to vector<128xf32>
    %88 = vector.shape_cast %87 : vector<128xf32> to vector<128x1xf32>
    %89 = vector.broadcast %88 : vector<128x1xf32> to vector<128x128xf32>
    %90 = arith.subf %86, %89 : vector<128x128xf32>
    %91 = math.exp %90 : vector<128x128xf32>
    %cst_47 = arith.constant dense<0.000000e+00> : vector<128xf32>
    %92 = vector.multi_reduction <add>, %91, %cst_47 [1] : vector<128x128xf32> to vector<128xf32>
    %93 = vector.shape_cast %92 : vector<128xf32> to vector<128x1xf32>
    %94 = arith.truncf %91 : vector<128x128xf32> to vector<128x128xbf16>
    %cst_48 = arith.constant dense<0.000000e+00> : vector<128x16xf32>
    %95 = tpu.matmul %94, %85, %cst_48 {dimension_numbers = #tpu.dot_dimension_numbers<[1], [0], [0], [1], [0, 0, 1, 1], [], []>} : vector<128x128xbf16>, vector<128x16xbf16>, vector<128x16xf32> -> vector<128x16xf32>
    %96 = tpu.reciprocal %93 {approx = true} : vector<128x1xf32> -> vector<128x1xf32>
    %97 = vector.broadcast %96 : vector<128x1xf32> to vector<128x16xf32>
    %98 = arith.mulf %95, %97 : vector<128x16xf32>
    %c0_49 = arith.constant 0 : index
    %c48_50 = arith.constant 48 : index
    %99 = vector.load %arg3[%c0_49, %c48_50] : memref<128x128xf32, #tpu.memory_space<vmem>>, vector<128x16xf32>
    tpu.vector_store %arg3[%c0_49, %c48_50], %98 {strides = array<i32>} : memref<128x128xf32, #tpu.memory_space<vmem>>, vector<128x16xf32>,
    %c0_51 = arith.constant 0 : index
    %c0_52 = arith.constant 0 : index
    %c64 = arith.constant 64 : index
    %100 = vector.load %arg1[%c0_51, %c0_52, %c64] : memref<1x128x384xf32, #tpu.memory_space<vmem>>, vector<1x128x16xf32>
    %101 = vector.shape_cast %100 : vector<1x128x16xf32> to vector<128x16xf32>
    %cst_53 = arith.constant 2.500000e-01 : f32
    %102 = vector.broadcast %cst_53 : f32 to vector<128x16xf32>
    %103 = arith.mulf %101, %102 : vector<128x16xf32>
    %104 = arith.truncf %103 : vector<128x16xf32> to vector<128x16xbf16>
    %c0_54 = arith.constant 0 : index
    %c0_55 = arith.constant 0 : index
    %c192 = arith.constant 192 : index
    %105 = vector.load %arg1[%c0_54, %c0_55, %c192] : memref<1x128x384xf32, #tpu.memory_space<vmem>>, vector<1x128x16xf32>
    %106 = vector.shape_cast %105 : vector<1x128x16xf32> to vector<128x16xf32>
    %107 = arith.truncf %106 : vector<128x16xf32> to vector<128x16xbf16>
    %c0_56 = arith.constant 0 : index
    %c0_57 = arith.constant 0 : index
    %c320 = arith.constant 320 : index
    %108 = vector.load %arg1[%c0_56, %c0_57, %c320] : memref<1x128x384xf32, #tpu.memory_space<vmem>>, vector<1x128x16xf32>
    %109 = vector.shape_cast %108 : vector<1x128x16xf32> to vector<128x16xf32>
    %110 = arith.truncf %109 : vector<128x16xf32> to vector<128x16xbf16>
    "tpu.trace_start"() <{level = 10 : i32, message = "qd,kd->qk"}> : () -> ()
    %cst_58 = arith.constant dense<0.000000e+00> : vector<128x128xf32>
    %111 = tpu.matmul %104, %107, %cst_58 {dimension_numbers = #tpu.dot_dimension_numbers<[1], [1], [0], [0], [0, 0, 1, 0], [], []>} : vector<128x16xbf16>, vector<128x16xbf16>, vector<128x128xf32> -> vector<128x128xf32>
    "tpu.trace_stop"() : () -> ()
    %cst_59 = arith.constant dense<0xFF800000> : vector<128xf32>
    %112 = vector.multi_reduction <maximumf>, %111, %cst_59 [1] : vector<128x128xf32> to vector<128xf32>
    %113 = vector.shape_cast %112 : vector<128xf32> to vector<128x1xf32>
    %114 = vector.broadcast %113 : vector<128x1xf32> to vector<128x128xf32>
    %115 = arith.subf %111, %114 : vector<128x128xf32>
    %116 = math.exp %115 : vector<128x128xf32>
    %cst_60 = arith.constant dense<0.000000e+00> : vector<128xf32>
    %117 = vector.multi_reduction <add>, %116, %cst_60 [1] : vector<128x128xf32> to vector<128xf32>
    %118 = vector.shape_cast %117 : vector<128xf32> to vector<128x1xf32>
    %119 = arith.truncf %116 : vector<128x128xf32> to vector<128x128xbf16>
    %cst_61 = arith.constant dense<0.000000e+00> : vector<128x16xf32>
    %120 = tpu.matmul %119, %110, %cst_61 {dimension_numbers = #tpu.dot_dimension_numbers<[1], [0], [0], [1], [0, 0, 1, 1], [], []>} : vector<128x128xbf16>, vector<128x16xbf16>, vector<128x16xf32> -> vector<128x16xf32>
    %121 = tpu.reciprocal %118 {approx = true} : vector<128x1xf32> -> vector<128x1xf32>
    %122 = vector.broadcast %121 : vector<128x1xf32> to vector<128x16xf32>
    %123 = arith.mulf %120, %122 : vector<128x16xf32>
    %c0_62 = arith.constant 0 : index
    %c64_63 = arith.constant 64 : index
    %124 = vector.load %arg3[%c0_62, %c64_63] : memref<128x128xf32, #tpu.memory_space<vmem>>, vector<128x16xf32>
    tpu.vector_store %arg3[%c0_62, %c64_63], %123 {strides = array<i32>} : memref<128x128xf32, #tpu.memory_space<vmem>>, vector<128x16xf32>,
    %c0_64 = arith.constant 0 : index
    %c0_65 = arith.constant 0 : index
    %c80 = arith.constant 80 : index
    %125 = vector.load %arg1[%c0_64, %c0_65, %c80] : memref<1x128x384xf32, #tpu.memory_space<vmem>>, vector<1x128x16xf32>
    %126 = vector.shape_cast %125 : vector<1x128x16xf32> to vector<128x16xf32>
    %cst_66 = arith.constant 2.500000e-01 : f32
    %127 = vector.broadcast %cst_66 : f32 to vector<128x16xf32>
    %128 = arith.mulf %126, %127 : vector<128x16xf32>
    %129 = arith.truncf %128 : vector<128x16xf32> to vector<128x16xbf16>
    %c0_67 = arith.constant 0 : index
    %c0_68 = arith.constant 0 : index
    %c208 = arith.constant 208 : index
    %130 = vector.load %arg1[%c0_67, %c0_68, %c208] : memref<1x128x384xf32, #tpu.memory_space<vmem>>, vector<1x128x16xf32>
    %131 = vector.shape_cast %130 : vector<1x128x16xf32> to vector<128x16xf32>
    %132 = arith.truncf %131 : vector<128x16xf32> to vector<128x16xbf16>
    %c0_69 = arith.constant 0 : index
    %c0_70 = arith.constant 0 : index
    %c336 = arith.constant 336 : index
    %133 = vector.load %arg1[%c0_69, %c0_70, %c336] : memref<1x128x384xf32, #tpu.memory_space<vmem>>, vector<1x128x16xf32>
    %134 = vector.shape_cast %133 : vector<1x128x16xf32> to vector<128x16xf32>
    %135 = arith.truncf %134 : vector<128x16xf32> to vector<128x16xbf16>
    "tpu.trace_start"() <{level = 10 : i32, message = "qd,kd->qk"}> : () -> ()
    %cst_71 = arith.constant dense<0.000000e+00> : vector<128x128xf32>
    %136 = tpu.matmul %129, %132, %cst_71 {dimension_numbers = #tpu.dot_dimension_numbers<[1], [1], [0], [0], [0, 0, 1, 0], [], []>} : vector<128x16xbf16>, vector<128x16xbf16>, vector<128x128xf32> -> vector<128x128xf32>
    "tpu.trace_stop"() : () -> ()
    %cst_72 = arith.constant dense<0xFF800000> : vector<128xf32>
    %137 = vector.multi_reduction <maximumf>, %136, %cst_72 [1] : vector<128x128xf32> to vector<128xf32>
    %138 = vector.shape_cast %137 : vector<128xf32> to vector<128x1xf32>
    %139 = vector.broadcast %138 : vector<128x1xf32> to vector<128x128xf32>
    %140 = arith.subf %136, %139 : vector<128x128xf32>
    %141 = math.exp %140 : vector<128x128xf32>
    %cst_73 = arith.constant dense<0.000000e+00> : vector<128xf32>
    %142 = vector.multi_reduction <add>, %141, %cst_73 [1] : vector<128x128xf32> to vector<128xf32>
    %143 = vector.shape_cast %142 : vector<128xf32> to vector<128x1xf32>
    %144 = arith.truncf %141 : vector<128x128xf32> to vector<128x128xbf16>
    %cst_74 = arith.constant dense<0.000000e+00> : vector<128x16xf32>
    %145 = tpu.matmul %144, %135, %cst_74 {dimension_numbers = #tpu.dot_dimension_numbers<[1], [0], [0], [1], [0, 0, 1, 1], [], []>} : vector<128x128xbf16>, vector<128x16xbf16>, vector<128x16xf32> -> vector<128x16xf32>
    %146 = tpu.reciprocal %143 {approx = true} : vector<128x1xf32> -> vector<128x1xf32>
    %147 = vector.broadcast %146 : vector<128x1xf32> to vector<128x16xf32>
    %148 = arith.mulf %145, %147 : vector<128x16xf32>
    %c0_75 = arith.constant 0 : index
    %c80_76 = arith.constant 80 : index
    %149 = vector.load %arg3[%c0_75, %c80_76] : memref<128x128xf32, #tpu.memory_space<vmem>>, vector<128x16xf32>
    tpu.vector_store %arg3[%c0_75, %c80_76], %148 {strides = array<i32>} : memref<128x128xf32, #tpu.memory_space<vmem>>, vector<128x16xf32>,
    %c0_77 = arith.constant 0 : index
    %c0_78 = arith.constant 0 : index
    %c96 = arith.constant 96 : index
    %150 = vector.load %arg1[%c0_77, %c0_78, %c96] : memref<1x128x384xf32, #tpu.memory_space<vmem>>, vector<1x128x16xf32>
    %151 = vector.shape_cast %150 : vector<1x128x16xf32> to vector<128x16xf32>
    %cst_79 = arith.constant 2.500000e-01 : f32
    %152 = vector.broadcast %cst_79 : f32 to vector<128x16xf32>
    %153 = arith.mulf %151, %152 : vector<128x16xf32>
    %154 = arith.truncf %153 : vector<128x16xf32> to vector<128x16xbf16>
    %c0_80 = arith.constant 0 : index
    %c0_81 = arith.constant 0 : index
    %c224 = arith.constant 224 : index
    %155 = vector.load %arg1[%c0_80, %c0_81, %c224] : memref<1x128x384xf32, #tpu.memory_space<vmem>>, vector<1x128x16xf32>
    %156 = vector.shape_cast %155 : vector<1x128x16xf32> to vector<128x16xf32>
    %157 = arith.truncf %156 : vector<128x16xf32> to vector<128x16xbf16>
    %c0_82 = arith.constant 0 : index
    %c0_83 = arith.constant 0 : index
    %c352 = arith.constant 352 : index
    %158 = vector.load %arg1[%c0_82, %c0_83, %c352] : memref<1x128x384xf32, #tpu.memory_space<vmem>>, vector<1x128x16xf32>
    %159 = vector.shape_cast %158 : vector<1x128x16xf32> to vector<128x16xf32>
    %160 = arith.truncf %159 : vector<128x16xf32> to vector<128x16xbf16>
    "tpu.trace_start"() <{level = 10 : i32, message = "qd,kd->qk"}> : () -> ()
    %cst_84 = arith.constant dense<0.000000e+00> : vector<128x128xf32>
    %161 = tpu.matmul %154, %157, %cst_84 {dimension_numbers = #tpu.dot_dimension_numbers<[1], [1], [0], [0], [0, 0, 1, 0], [], []>} : vector<128x16xbf16>, vector<128x16xbf16>, vector<128x128xf32> -> vector<128x128xf32>
    "tpu.trace_stop"() : () -> ()
    %cst_85 = arith.constant dense<0xFF800000> : vector<128xf32>
    %162 = vector.multi_reduction <maximumf>, %161, %cst_85 [1] : vector<128x128xf32> to vector<128xf32>
    %163 = vector.shape_cast %162 : vector<128xf32> to vector<128x1xf32>
    %164 = vector.broadcast %163 : vector<128x1xf32> to vector<128x128xf32>
    %165 = arith.subf %161, %164 : vector<128x128xf32>
    %166 = math.exp %165 : vector<128x128xf32>
    %cst_86 = arith.constant dense<0.000000e+00> : vector<128xf32>
    %167 = vector.multi_reduction <add>, %166, %cst_86 [1] : vector<128x128xf32> to vector<128xf32>
    %168 = vector.shape_cast %167 : vector<128xf32> to vector<128x1xf32>
    %169 = arith.truncf %166 : vector<128x128xf32> to vector<128x128xbf16>
    %cst_87 = arith.constant dense<0.000000e+00> : vector<128x16xf32>
    %170 = tpu.matmul %169, %160, %cst_87 {dimension_numbers = #tpu.dot_dimension_numbers<[1], [0], [0], [1], [0, 0, 1, 1], [], []>} : vector<128x128xbf16>, vector<128x16xbf16>, vector<128x16xf32> -> vector<128x16xf32>
    %171 = tpu.reciprocal %168 {approx = true} : vector<128x1xf32> -> vector<128x1xf32>
    %172 = vector.broadcast %171 : vector<128x1xf32> to vector<128x16xf32>
    %173 = arith.mulf %170, %172 : vector<128x16xf32>
    %c0_88 = arith.constant 0 : index
    %c96_89 = arith.constant 96 : index
    %174 = vector.load %arg3[%c0_88, %c96_89] : memref<128x128xf32, #tpu.memory_space<vmem>>, vector<128x16xf32>
    tpu.vector_store %arg3[%c0_88, %c96_89], %173 {strides = array<i32>} : memref<128x128xf32, #tpu.memory_space<vmem>>, vector<128x16xf32>,
    %c0_90 = arith.constant 0 : index
    %c0_91 = arith.constant 0 : index
    %c112 = arith.constant 112 : index
    %175 = vector.load %arg1[%c0_90, %c0_91, %c112] : memref<1x128x384xf32, #tpu.memory_space<vmem>>, vector<1x128x16xf32>
    %176 = vector.shape_cast %175 : vector<1x128x16xf32> to vector<128x16xf32>
    %cst_92 = arith.constant 2.500000e-01 : f32
    %177 = vector.broadcast %cst_92 : f32 to vector<128x16xf32>
    %178 = arith.mulf %176, %177 : vector<128x16xf32>
    %179 = arith.truncf %178 : vector<128x16xf32> to vector<128x16xbf16>
    %c0_93 = arith.constant 0 : index
    %c0_94 = arith.constant 0 : index
    %c240 = arith.constant 240 : index
    %180 = vector.load %arg1[%c0_93, %c0_94, %c240] : memref<1x128x384xf32, #tpu.memory_space<vmem>>, vector<1x128x16xf32>
    %181 = vector.shape_cast %180 : vector<1x128x16xf32> to vector<128x16xf32>
    %182 = arith.truncf %181 : vector<128x16xf32> to vector<128x16xbf16>
    %c0_95 = arith.constant 0 : index
    %c0_96 = arith.constant 0 : index
    %c368 = arith.constant 368 : index
    %183 = vector.load %arg1[%c0_95, %c0_96, %c368] : memref<1x128x384xf32, #tpu.memory_space<vmem>>, vector<1x128x16xf32>
    %184 = vector.shape_cast %183 : vector<1x128x16xf32> to vector<128x16xf32>
    %185 = arith.truncf %184 : vector<128x16xf32> to vector<128x16xbf16>
    "tpu.trace_start"() <{level = 10 : i32, message = "qd,kd->qk"}> : () -> ()
    %cst_97 = arith.constant dense<0.000000e+00> : vector<128x128xf32>
    %186 = tpu.matmul %179, %182, %cst_97 {dimension_numbers = #tpu.dot_dimension_numbers<[1], [1], [0], [0], [0, 0, 1, 0], [], []>} : vector<128x16xbf16>, vector<128x16xbf16>, vector<128x128xf32> -> vector<128x128xf32>
    "tpu.trace_stop"() : () -> ()
    %cst_98 = arith.constant dense<0xFF800000> : vector<128xf32>
    %187 = vector.multi_reduction <maximumf>, %186, %cst_98 [1] : vector<128x128xf32> to vector<128xf32>
    %188 = vector.shape_cast %187 : vector<128xf32> to vector<128x1xf32>
    %189 = vector.broadcast %188 : vector<128x1xf32> to vector<128x128xf32>
    %190 = arith.subf %186, %189 : vector<128x128xf32>
    %191 = math.exp %190 : vector<128x128xf32>
    %cst_99 = arith.constant dense<0.000000e+00> : vector<128xf32>
    %192 = vector.multi_reduction <add>, %191, %cst_99 [1] : vector<128x128xf32> to vector<128xf32>
    %193 = vector.shape_cast %192 : vector<128xf32> to vector<128x1xf32>
    %194 = arith.truncf %191 : vector<128x128xf32> to vector<128x128xbf16>
    %cst_100 = arith.constant dense<0.000000e+00> : vector<128x16xf32>
    %195 = tpu.matmul %194, %185, %cst_100 {dimension_numbers = #tpu.dot_dimension_numbers<[1], [0], [0], [1], [0, 0, 1, 1], [], []>} : vector<128x128xbf16>, vector<128x16xbf16>, vector<128x16xf32> -> vector<128x16xf32>
    %196 = tpu.reciprocal %193 {approx = true} : vector<128x1xf32> -> vector<128x1xf32>
    %197 = vector.broadcast %196 : vector<128x1xf32> to vector<128x16xf32>
    %198 = arith.mulf %195, %197 : vector<128x16xf32>
    %c0_101 = arith.constant 0 : index
    %c112_102 = arith.constant 112 : index
    %199 = vector.load %arg3[%c0_101, %c112_102] : memref<128x128xf32, #tpu.memory_space<vmem>>, vector<128x16xf32>
    tpu.vector_store %arg3[%c0_101, %c112_102], %198 {strides = array<i32>} : memref<128x128xf32, #tpu.memory_space<vmem>>, vector<128x16xf32>,
    %c0_103 = arith.constant 0 : index
    %c0_104 = arith.constant 0 : index
    %200 = vector.load %arg3[%c0_103, %c0_104] : memref<128x128xf32, #tpu.memory_space<vmem>>, vector<128x128xf32>
    %c0_105 = arith.constant 0 : index
    %c0_106 = arith.constant 0 : index
    %c0_107 = arith.constant 0 : index
    %201 = vector.load %arg2[%c0_105, %c0_106, %c0_107] : memref<1x128x128xf32, #tpu.memory_space<vmem>>, vector<1x128x128xf32>
    %202 = vector.shape_cast %201 : vector<1x128x128xf32> to vector<128x128xf32>
    %203 = vector.shape_cast %200 : vector<128x128xf32> to vector<1x128x128xf32>
    tpu.vector_store %arg2[%c0_105, %c0_106, %c0_107], %203 {strides = array<i32>} : memref<1x128x128xf32, #tpu.memory_space<vmem>>, vector<1x128x128xf32>,
    return
  }
  func.func @transform_0(%arg0: i32) -> (i32, i32, i32) {
    %c0_i32 = arith.constant 0 : i32
    %c0_i32_0 = arith.constant 0 : i32
    %c0_i32_1 = arith.constant 0 : i32
    return %arg0, %c0_i32, %c0_i32_0 : i32, i32, i32
  }
  func.func @transform_1(%arg0: i32) -> (i32, i32, i32) {
    %c0_i32 = arith.constant 0 : i32
    %c0_i32_0 = arith.constant 0 : i32
    %c0_i32_1 = arith.constant 0 : i32
    return %arg0, %c0_i32, %c0_i32_0 : i32, i32, i32
  }
}

</mosaic_0001>

<bundles_post_ra>
// kernel: attention_pure.1
= control target key start
LH: loop header
LB: loop body
LE: loop exit
PB: predicated region body
PF: predicated region fallthrough
CT: control target
= control target key end

     0   :  { %6 = vsyncpa [#allocation4], 0  ;;  %s9892_s0 = inlined_call_operand.hbm [shape: f32[2,128,384], index: 0, kind: input, shape index: {}]   ;;  %s9893_s1 = inlined_call_operand.hbm [shape: f32[2,128,128], index: 1, kind: output, shape index: {}]  }
   0x1   :  { %8 = vsyncpa [#allocation4 + $0x1], 0 }
   0x2   :  { %9 = vsyncpa [#allocation5], 0 }
   0x3   :  { %11 = vsyncpa [#allocation5 + $0x1], 0  ;;  %s6852_s6 = smov 0   ;;  %s6854_s7 = smov 0  }
   0x4   :  { %s6856_s8 = smov 0   ;;  %s6858_s9 = smov 0  }
   0x5 LB: > { %s6873_s10 = sadd.s32 4294967295, %s6827_s9   ;;  %s5255_s11 = sadd.s32 4294967294, %s6827_s9   ;;  %s6827_s9 = sphi %s6858_s9, %s10368_s9   ;;  %s6823_s8 = sphi %s6856_s8, %s10367_s8   ;;  %s6819_s7 = sphi %s6854_s7, %s10366_s7   ;;  %s6815_s6 = sphi %s6852_s6, %s10365_s6  }
   0x6   : > { %s6877_s12 = sadd.s32 1, %s6827_s9   ;;  %s24_s13 = sadd.s32 1, %s6823_s8 }
   0x7   : > { %s21_s14 = ssub.s32 %s6827_s9, %s6877_s12  ;;  %p31_p0 = scmp.ne.s32.totalorder %s6823_s8, %s6819_s7 }
   0x8   : > { %p22_p1 = scmp.eq.s32.totalorder %s21_s14, 0  ;;  %p32_p2 = scmp.eq.s32.totalorder %s6827_s9, 0 }
   0x9   : > { %p37_p3 = scmp.ne.s32.totalorder %s6819_s7, %s6815_s6  ;;  %p38_p4 = scmp.eq.s32.totalorder %s6873_s10, 0 }
   0xa   : > { %s6889_s15 = scalar_select %p22_p1, %s6823_s8, %s24_s13  }
   0xb   : > { %p33_p5 = por %p32_p2, %p31_p0  ;;  %p6891_p6 = por %p38_p4, %p37_p3 }
   0xc   : > { %p61_p7 = scmp.eq.s32.totalorder %s6873_s10, 1  ;;  %p67_p8 = scmp.eq.s32.totalorder %s5255_s11, 1 }
   0xd   : > { %s9961_s16 = scalar_select %p6891_p6, 1, 0 }
   0xe   : > { %p6178_p10 = scmp.lt.s32.totalorder %s6827_s9, 2  ;;  %p6898_p11 = por %p61_p7, %p31_p0 }
   0xf   : > { %p6902_p12 = por %p67_p8, %p37_p3  ;;  %s87_s19 = sand.u32 1, %s6823_s8  }
  0x10   : > { %s9962_s17 = scalar_select %p6898_p11, 1, 0 }
  0x11   : > { %s9963_s18 = scalar_select %p6902_p12, 1, 0 }
  0x12   : > { %s6164_s20 = smul.u32 6144, %s6827_s9  ;;  %p6913_p13 = pnand %p6178_p10, %p33_p5 }
  0x13   : > { %s6163_s21 = smul.u32 384, %s87_s19  ;;  %s6919_s28 = scalar_lea.sflag [#allocation4], %s87_s19 }
  0x14   : > { %s6911_s24 = scalar_lea.hbm %s9892_s0, %s6164_s20  ;;  %p6737_p1 = pneg %p6913_p13 }
  0x15   : > { %s91_s26 = scalar_lea.vmem [#allocation3], %s6163_s21  ;;  %s6735_s29 = scalar_lea.hbm %s6911_s24, 6144 }
  0x16   : > { %s98_s27 = sshll.u32 %s91_s26, 4  ;;  %p6736_p0 = scmp.ne.s32.totalorder %s6911_s24, %s6735_s29  ;;  %s6917_s27 = int_to_ptr.vmem [resolvable:$true] %s98_s27 }
  0x17   : > { %s6740_s3 = scalar_lea.hbm %s9892_s0, 12288  ;;  %p6741_p4 = scmp.lt.s32.totalorder %s6911_s24, %s9892_s0 }
  0x18   : > { %p6738_p2 = pnand %p6737_p1, %p6736_p0  ;;  %p6742_p5 = scmp.lt.s32.totalorder %s6740_s3, %s6735_s29 }
  0x1a   : > { %p6739_p3 = pneg %p6738_p2  ;;  %p6743_p7 = por %p6742_p5, %p6741_p4 }
  0x1c   : > { %p6744_p8 = pnand %p6743_p7, %p6739_p3 }
  0x1e   : > { %6747 = shalt.err (!%p6744_p8)
}
  0x1f   : > { %s6748_s11 = scalar_lea.vmem %s6917_s27, 6144  ;;  %s6829_s13 = smov [#allocation3]  }
  0x20   : > { %p6749_p10 = scmp.ne.s32.totalorder %s6917_s27, %s6748_s11  ;;  %s6753_s14 = sshll.u32 %s6829_s13, 4  ;;  %s6754_s14 = int_to_ptr.vmem [resolvable:$false] %s6753_s14 }
  0x21   : > { %s6755_s19 = scalar_lea.vmem %s6754_s14, 12288  ;;  %p6756_p2 = scmp.lt.s32.totalorder %s6917_s27, %s6754_s14 }
  0x22   : > { %p6751_p9 = pnand %p6749_p10, %p6737_p1  ;;  %p6757_p12 = scmp.lt.s32.totalorder %s6755_s19, %s6748_s11 }
  0x24   : > { %p6752_p0 = pneg %p6751_p9  ;;  %p6758_p11 = por %p6757_p12, %p6756_p2 }
  0x26   : > { %p6759_p6 = pnand %p6758_p11, %p6752_p0 }
  0x28   : > { %6762 = shalt.err (!%p6759_p6)
}
  0x29   : > { %s6830_s20 = smov 384   ;;  %s6831_s21 = smov 24  }
  0x2a   : > { %6173 = dma.hbm_to_vmem [thread:$0]  (!%p6913_p13), %s6911_s24, 6144, %s6917_s27, %s6919_s28, %s6830_s20, %s6830_s20, %s6831_s21  }
  0x2b   : > { %p5259_p9 = scmp.ge.s32.totalorder %s6827_s9, 1  ;;  %p106_p1 = scmp.lt.s32.totalorder %s6827_s9, 3 }
  0x2d   : > { %p107_p3 = pnand %p5259_p9, %p106_p1 }
  0x2f   : > { %110 = sbr.rel (%p107_p3) target bundleno = 3983 (0xf8f), region = 24 }
  0x34   : > { %s6943_s22 = sand.u32 1, %s6819_s7   ;;  %p9965_p6 = scmp.ne.s32.totalorder %s9961_s16, 0 }
  0x35   : > { %s6165_s23 = smul.u32 384, %s6943_s22  ;;  %s113_s26 = scalar_lea.sflag [#allocation4], %s6943_s22 }
  0x37   : > { %s6947_s29 = scalar_lea.vmem [#allocation3], %s6165_s23 }
  0x38   : > { %6806 = dma.done.wait (%p9965_p6), %s113_s26, 6144  }
  0x39   : > { %6808 = vsyncadd (%p9965_p6), %s113_s26, 4294961152  ;;  %v190_v0 = vld [vmem:[%s6947_s29 + $0x158] sm:$0xff]  ;;  %v191_v1 = vld [vmem:[%s6947_s29 + $0x170] sm:$0xff]  ;;  %vm224_vm0 = vcmask 130048   ;;  %s6832_s16 = smov 112   ;;  %s6833_s24 = smov 96  }
  0x3a   : > { %v188_v2 = vld [vmem:[%s6947_s29 + $0x128] sm:$0xff]  ;;  %v6956_v3 = vpack.c.bf16 %v191_v1, %v190_v0  ;;  %v189_v4 = vld [vmem:[%s6947_s29 + $0x140] sm:$0xff]  ;;  %v186_v6 = vld [vmem:[%s6947_s29 + $0xf8] sm:$0xff]  ;;  %s6834_s25 = smov 80   ;;  %s6835_s27 = smov 64   ;;  %vm1261_vm1 = vcmask 261248  }
  0x3b   : > { %v6959_v5 = vpack.c.bf16 %v189_v4, %v188_v2  ;;  %v187_v7 = vld [vmem:[%s6947_s29 + $0x110] sm:$0xff]  ;;  %v136_v10 = vld [vmem:[%s6947_s29] sm:$0xff]  ;;  %v137_v11 = vld [vmem:[%s6947_s29 + $0x18] sm:$0xff]  ;;  %s6836_s28 = smov 48   ;;  %s6837_s30 = smov 32   ;;  %vm1904_vm2 = vcmask 392448  }
  0x3c   : > { %6099 = vmatprep.subr.msk.bf16.mxu0 %vm224_vm0, %v6956_v3  ;;  %v271_v8 = vsel %vm224_vm0, %v6956_v3, 0  ;;  %769 = vrot.lane.b32.xlu0 %v6956_v3, %s6832_s16  ;;  %v6973_v9 = vpack.c.bf16 %v187_v7, %v186_v6  ;;  %v152_v12 = vmul.f32 0.25, %v136_v10  ;;  %v153_v13 = vmul.f32 0.25, %v137_v11  ;;  %v184_v16 = vld [vmem:[%s6947_s29 + $0xc8] sm:$0xff]  ;;  %v185_v17 = vld [vmem:[%s6947_s29 + $0xe0] sm:$0xff]  ;;  %v182_v20 = vld [vmem:[%s6947_s29 + $0x98] sm:$0xff] }
  0x3d   : > { %5588 = vmatpush3.bf16.xpose.msra.mxu0 %v271_v8  ;;  %767 = vrot.lane.b32.xlu1 %v6959_v5, %s6832_s16  ;;  %v268_v14 = vsel %vm224_vm0, %v6959_v5, 0  ;;  %v6991_v19 = vpack.c.bf16 %v185_v17, %v184_v16  ;;  %v183_v21 = vld [vmem:[%s6947_s29 + $0xb0] sm:$0xff]  ;;  %v180_v24 = vld [vmem:[%s6947_s29 + $0x68] sm:$0xff]  ;;  %v181_v25 = vld [vmem:[%s6947_s29 + $0x80] sm:$0xff]  ;;  %s6838_s2 = smov 16   ;;  %vm2547_vm3 = vcmask 523648  }
  0x3e   : > { %6100 = vmatprep.subr.msk.bf16.mxu0 %vm224_vm0, %v6959_v5  ;;  %v6981_v15 = vpack.c.bf16 %v153_v13, %v152_v12  ;;  %v265_v18 = vsel %vm224_vm0, %v6973_v9, 0  ;;  %v6999_v23 = vpack.c.bf16 %v183_v21, %v182_v20  ;;  %v7007_v27 = vpack.c.bf16 %v181_v25, %v180_v24  ;;  %v178_v28 = vld [vmem:[%s6947_s29 + $0x38] sm:$0xff]  ;;  %v179_v29 = vld [vmem:[%s6947_s29 + $0x50] sm:$0xff]  ;;  %v176_v32 = vld [vmem:[%s6947_s29 + $0x8] sm:$0xff]  ;;  %s5260_s3 = sshll.u32 %s6943_s22, 7  ;;  %s5330_s5 = sshll.u32 %s6873_s10, 11 }
  0x3f   : > { %v262_v22 = vsel %vm224_vm0, %v6991_v19, 0  ;;  %v7015_v31 = vpack.c.bf16 %v179_v29, %v178_v28  ;;  %v177_v33 = vld [vmem:[%s6947_s29 + $0x20] sm:$0xff]  ;;  %v138_v36 = vld [vmem:[%s6947_s29 + $0x30] sm:$0xff]  ;;  %v139_v37 = vld [vmem:[%s6947_s29 + $0x48] sm:$0xff]  ;;  %vm3190_vm4 = vcmask 654848   ;;  %vm3833_vm5 = vcmask 786048   ;;  %s9846_s19 = scalar_lea.hbm %s9893_s1, %s5330_s5 }
  0x40   : > { %765 = vrot.lane.b32.xlu0 %v6973_v9, %s6832_s16  ;;  %5603 = vmatprep.mubr.msk.bf16.mxu0 %vm224_vm0, %v6981_v15  ;;  %v259_v26 = vsel %vm224_vm0, %v6999_v23, 0  ;;  %v256_v30 = vsel %vm224_vm0, %v7007_v27, 0  ;;  %v7023_v35 = vpack.c.bf16 %v177_v33, %v176_v32  ;;  %v140_v39 = vld [vmem:[%s6947_s29 + $0x60] sm:$0xff]  ;;  %v141_v40 = vld [vmem:[%s6947_s29 + $0x78] sm:$0xff]  ;;  %v154_v41 = vmul.f32 0.25, %v138_v36  ;;  %v142_v47 = vld [vmem:[%s6947_s29 + $0x90] sm:$0xff] }
  0x41   : > { %v253_v34 = vsel %vm224_vm0, %v7015_v31, 0  ;;  %v155_v42 = vmul.f32 0.25, %v139_v37  ;;  %v156_v43 = vmul.f32 0.25, %v140_v39  ;;  %v157_v44 = vmul.f32 0.25, %v141_v40  ;;  %v143_v48 = vld [vmem:[%s6947_s29 + $0xa8] sm:$0xff]  ;;  %v144_v49 = vld [vmem:[%s6947_s29 + $0xc0] sm:$0xff] }
  0x42   : > { %v250_v38 = vsel %vm224_vm0, %v7023_v35, 0  ;;  %v145_v50 = vld [vmem:[%s6947_s29 + $0xd8] sm:$0xff]  ;;  %v158_v51 = vmul.f32 0.25, %v142_v47  ;;  %v159_v52 = vmul.f32 0.25, %v143_v48  ;;  %v160_v53 = vmul.f32 0.25, %v144_v49  ;;  %v146_v57 = vld [vmem:[%s6947_s29 + $0xf0] sm:$0xff] }
  0x43   : > { %v7033_v45 = vpack.c.bf16 %v155_v42, %v154_v41  ;;  %v7035_v46 = vpack.c.bf16 %v157_v44, %v156_v43  ;;  %v161_v54 = vmul.f32 0.25, %v145_v50  ;;  %v147_v58 = vld [vmem:[%s6947_s29 + $0x108] sm:$0xff]  ;;  %v148_v59 = vld [vmem:[%s6947_s29 + $0x120] sm:$0xff]  ;;  %v149_v60 = vld [vmem:[%s6947_s29 + $0x138] sm:$0xff]  ;;  %v162_v61 = vmul.f32 0.25, %v146_v57  ;;  %s9811_s4 = scalar_lea.vmem [#allocation6], %s5260_s3 }
  0x44   : > { %v7045_v55 = vpack.c.bf16 %v159_v52, %v158_v51  ;;  %v163_v62 = vmul.f32 0.25, %v147_v58  ;;  %v164_v63 = vmul.f32 0.25, %v148_v59  ;;  %v165_v0 = vmul.f32 0.25, %v149_v60  ;;  %v150_v4 = vld [vmem:[%s6947_s29 + $0x150] sm:$0xff]  ;;  %v151_v6 = vld [vmem:[%s6947_s29 + $0x168] sm:$0xff]  ;;  %v214_v11 = vld [vmem:[%s6947_s29 + $0x160] sm:$0xff] }
  0x45   : > { %5590 = vmatpush3.bf16.xpose.msra.mxu0 %v268_v14  ;;  %v7047_v56 = vpack.c.bf16 %v161_v54, %v160_v53  ;;  %v166_v7 = vmul.f32 0.25, %v150_v4  ;;  %v167_v8 = vmul.f32 0.25, %v151_v6  ;;  %v215_v12 = vld [vmem:[%s6947_s29 + $0x178] sm:$0xff]  ;;  %v212_v13 = vld [vmem:[%s6947_s29 + $0x130] sm:$0xff]  ;;  %v213_v16 = vld [vmem:[%s6947_s29 + $0x148] sm:$0xff]  ;;  %vm4476_vm6 = vcmask 917248  }
  0x46   : > { %6101 = vmatprep.subr.msk.bf16.mxu0 %vm224_vm0, %v6973_v9  ;;  %v7057_v1 = vpack.c.bf16 %v163_v62, %v162_v61  ;;  %v7059_v2 = vpack.c.bf16 %v165_v0, %v164_v63  ;;  %v7074_v14 = vpack.c.bf16 %v215_v12, %v214_v11  ;;  %v7077_v17 = vpack.c.bf16 %v213_v16, %v212_v13  ;;  %v211_v20 = vld [vmem:[%s6947_s29 + $0x118] sm:$0xff]  ;;  %v209_v24 = vld [vmem:[%s6947_s29 + $0xe8] sm:$0xff]  ;;  %v202_v33 = vld [vmem:[%s6947_s29 + $0x40] sm:$0xff]  ;;  %s5182_s11 = sshll.u32 %s9811_s4, 4  ;;  %s5169_s20 = scalar_lea.sflag [#allocation5], %s6943_s22  ;;  %s9848_s11 = int_to_ptr.vmem [resolvable:$true] %s5182_s11 }
  0x47   : > { %v7067_v10 = vpack.c.bf16 %v167_v8, %v166_v7  ;;  %v207_v28 = vld [vmem:[%s6947_s29 + $0xb8] sm:$0xff]  ;;  %v205_v32 = vld [vmem:[%s6947_s29 + $0x88] sm:$0xff]  ;;  %vm5119_vm7 = vcmask 1048448   ;;  %s6763_s21 = scalar_lea.vmem %s9848_s11, 2048  ;;  %p10362_p12 = scmp.ne.s32.totalorder %s9962_s17, 0 }
  0x48   : > { %5619 = vmatprep.subr.bf16.mxu1 %v7074_v14  ;;  %v203_v36 = vld [vmem:[%s6947_s29 + $0x58] sm:$0xff]  ;;  %v201_v39 = vld [vmem:[%s6947_s29 + $0x28] sm:$0xff]  ;;  %p6764_p11 = scmp.ne.s32.totalorder %s9848_s11, %s6763_s21  ;;  %s6839_s10 = smov [#allocation6]  }
  0x49   : > { %5620 = vmatpush3.bf16.msra.mxu1 %v7074_v14  ;;  %v7105_v37 = vpack.c.bf16 %v203_v36, %v202_v33  ;;  %s6767_s23 = sshll.u32 %s6839_s10, 4  ;;  %s6768_s23 = int_to_ptr.vmem [resolvable:$false] %s6767_s23 }
  0x4a   : > { %5621 = vmatprep.subr.bf16.mxu1 %v7077_v17  ;;  %p6765_p13 = pnand %p6764_p11, %p10362_p12  ;;  %s6769_s26 = scalar_lea.vmem %s6768_s23, 4096 }
  0x4b   : > { %p6770_p5 = scmp.lt.s32.totalorder %s9848_s11, %s6768_s23  ;;  %p6771_p7 = scmp.lt.s32.totalorder %s6769_s26, %s6763_s21 }
  0x4c   : > { %p6766_p4 = pneg %p6765_p13 }
  0x4d   : > { %5592 = vmatpush3.bf16.xpose.msra.mxu0 %v265_v18  ;;  %5622 = vmatpush3.bf16.msra.mxu1 %v7077_v17  ;;  %v210_v18 = vld [vmem:[%s6947_s29 + $0x100] sm:$0xff]  ;;  %p6772_p8 = por %p6771_p7, %p6770_p5 }
  0x4e   : > { %6102 = vmatprep.subr.msk.bf16.mxu0 %vm224_vm0, %v6991_v19  ;;  %v7085_v21 = vpack.c.bf16 %v211_v20, %v210_v18 }
  0x4f   : > { %p6773_p10 = pnand %p6772_p8, %p6766_p4 }
  0x50   : > { %5623 = vmatprep.subr.bf16.mxu1 %v7085_v21 }
  0x51   : > { %5624 = vmatpush3.bf16.msra.mxu1 %v7085_v21 }
  0x55   : > { %5594 = vmatpush3.bf16.xpose.msra.mxu0 %v262_v22  ;;  %v208_v22 = vld [vmem:[%s6947_s29 + $0xd0] sm:$0xff] }
  0x56   : > { %6103 = vmatprep.subr.msk.bf16.mxu0 %vm224_vm0, %v6999_v23  ;;  %v7091_v25 = vpack.c.bf16 %v209_v24, %v208_v22 }
  0x58   : > { %5625 = vmatprep.subr.bf16.mxu1 %v7091_v25 }
  0x59   : > { %5626 = vmatpush3.bf16.msra.mxu1 %v7091_v25 }
  0x5d   : > { %5596 = vmatpush3.bf16.xpose.msra.mxu0 %v259_v26  ;;  %v206_v26 = vld [vmem:[%s6947_s29 + $0xa0] sm:$0xff] }
  0x5e   : > { %6104 = vmatprep.subr.msk.bf16.mxu0 %vm224_vm0, %v7007_v27  ;;  %v7097_v29 = vpack.c.bf16 %v207_v28, %v206_v26 }
  0x60   : > { %5627 = vmatprep.subr.bf16.mxu1 %v7097_v29 }
  0x61   : > { %5628 = vmatpush3.bf16.msra.mxu1 %v7097_v29 }
  0x65   : > { %5598 = vmatpush3.bf16.xpose.msra.mxu0 %v256_v30  ;;  %v204_v30 = vld [vmem:[%s6947_s29 + $0x70] sm:$0xff] }
  0x66   : > { %6105 = vmatprep.subr.msk.bf16.mxu0 %vm224_vm0, %v7015_v31 }
  0x6d   : > { %5600 = vmatpush3.bf16.xpose.msra.mxu0 %v253_v34  ;;  %v218_v34 = vpack.c.bf16 %v205_v32, %v204_v30 }
  0x6e   : > { %6106 = vmatprep.subr.msk.bf16.mxu0 %vm224_vm0, %v7023_v35 }
  0x6f   : > { %5629 = vmatprep.subr.bf16.mxu1 %v218_v34 }
  0x70   : > { %5630 = vmatpush3.bf16.msra.mxu1 %v218_v34 }
  0x71   : > { %5631 = vmatprep.subr.bf16.mxu1 %v7105_v37 }
  0x74   : > { %5632 = vmatpush3.bf16.msra.mxu1 %v7105_v37 }
  0x75   : > { %5602 = vmatpush3.bf16.xpose.msra.mxu0 %v250_v38  ;;  %v200_v38 = vld [vmem:[%s6947_s29 + $0x10] sm:$0xff] }
  0x76   : > { %v216_v40 = vpack.c.bf16 %v201_v39, %v200_v38 }
  0x78   : > { %5633 = vmatprep.subr.bf16.mxu1 %v216_v40 }
  0x79   : > { %5634 = vmatpush3.bf16.msra.mxu1 %v216_v40 }
  0x7c   : > { %5604 = vmatmul.mubr.msk.bf16.vlgmr.msra.gmra.mxu0 %vm224_vm0, %v7033_v45 }
  0x7d   : > { %5607 = vmatprep.mubr.msk.bf16.mxu0 %vm224_vm0, %v7035_v46 }
  0x84   : > { %5608 = vmatmul.mubr.msk.bf16.gmra.mxu0 %vm224_vm0, %v7045_v55 }
  0x85   : > { %5611 = vmatprep.mubr.msk.bf16.mxu0 %vm224_vm0, %v7047_v56 }
  0x8c   : > { %5612 = vmatmul.mubr.msk.bf16.gmra.mxu0 %vm224_vm0, %v7057_v1 }
  0x8d   : > { %5615 = vmatprep.mubr.msk.bf16.mxu0 %vm224_vm0, %v7059_v2 }
  0x94   : > { %5616 = vmatmul.mubr.msk.bf16.gmra.mxu0 %vm224_vm0, %v7067_v10 }
  0xae   : > { %v7111_v41 = vpop.permute.xlu0 %769 }
  0xaf   : > { %6107 = vmatprep.subr.msk.bf16.mxu1 %vm224_vm0, %v7111_v41  ;;  %v768_v62 = vpop.permute.xlu1 %767 }
  0xb2   : > { %v766_v63 = vpop.permute.xlu0 %765 }
 0x13c   : > { %v7115_v42 = vpop.f32.mrf.mxu0 }
 0x13d   : > { %374 = vmax.xlane.f32.xlu1 %v7115_v42 }
 0x13e   : > { %v307_v43 = vpop.f32.mrf.mxu0 }
 0x13f   : > { %370 = vmax.xlane.f32.xlu0 %v307_v43 }
 0x140   : > { %v5606_v44 = vpop.f32.mrf.mxu0 }
 0x141   : > { %376 = vmax.xlane.f32.xlu1 %v5606_v44 }
 0x142   : > { %v310_v47 = vpop.f32.mrf.mxu0 }
 0x143   : > { %372 = vmax.xlane.f32.xlu0 %v310_v47 }
 0x144   : > { %v7118_v48 = vpop.f32.mrf.mxu0 }
 0x145   : > { %382 = vmax.xlane.f32.xlu1 %v7118_v48 }
 0x146   : > { %v7121_v49 = vpop.f32.mrf.mxu0 }
 0x148   : > { %v7123_v50 = vpop.f32.mrf.mxu0 }
 0x149   : > { %378 = vmax.xlane.f32.xlu1 %v7121_v49 }
 0x14a   : > { %v7126_v51 = vpop.f32.mrf.mxu0 }
 0x14c   : > { %v7128_v52 = vpop.f32.mrf.mxu0 }
 0x14d   : > { %384 = vmax.xlane.f32.xlu1 %v7123_v50 }
 0x14e   : > { %v7131_v53 = vpop.f32.mrf.mxu0 }
 0x150   : > { %v7133_v54 = vpop.f32.mrf.mxu0 }
 0x151   : > { %380 = vmax.xlane.f32.xlu1 %v7126_v51 }
 0x152   : > { %v7136_v57 = vpop.f32.mrf.mxu0 }
 0x154   : > { %v7139_v58 = vpop.f32.mrf.mxu0 }
 0x155   : > { %388 = vmax.xlane.f32.xlu1 %v7136_v57 }
 0x156   : > { %v7144_v59 = vpop.f32.mrf.mxu0 }
 0x158   : > { %v7147_v60 = vpop.f32.mrf.mxu0 }
 0x159   : > { %763 = vrot.lane.b32.xlu0 %v6991_v19, %s6832_s16  ;;  %398 = vmax.xlane.f32.xlu1 %v7139_v58 }
 0x15a   : > { %v7150_v61 = vpop.f32.mrf.mxu0 }
 0x15d   : > { %394 = vmax.xlane.f32.xlu1 %v7144_v59 }
 0x161   : > { %400 = vmax.xlane.f32.xlu1 %v7147_v60 }
 0x165   : > { %396 = vmax.xlane.f32.xlu1 %v7150_v61 }
 0x176   : > { %761 = vrot.lane.b32.xlu1 %v6999_v23, %s6832_s16 }
 0x178   : > { %390 = vmax.xlane.f32.xlu0 %v7128_v52 }
 0x17a   : > { %733 = vrot.lane.b32.xlu1 %v7033_v45, %s6832_s16 }
 0x17c   : > { %386 = vmax.xlane.f32.xlu0 %v7131_v53 }
 0x17e   : > { %737 = vrot.lane.b32.xlu1 %v7045_v55, %s6832_s16 }
 0x180   : > { %392 = vmax.xlane.f32.xlu0 %v7133_v54 }
 0x182   : > { %741 = vrot.lane.b32.xlu1 %v7057_v1, %s6832_s16 }
 0x186   : > { %745 = vrot.lane.b32.xlu1 %v7067_v10, %s6832_s16 }
 0x18a   : > { %1056 = vrot.lane.b32.xlu1 %v7077_v17, %s6832_s16 }
 0x18e   : > { %1048 = vrot.lane.b32.xlu1 %v218_v34, %s6832_s16 }
 0x192   : > { %1044 = vrot.lane.b32.xlu1 %v216_v40, %s6832_s16 }
 0x196   : > { %759 = vrot.lane.b32.xlu0 %v7007_v27, %s6832_s16  ;;  %1410 = vrot.lane.b32.xlu1 %v6959_v5, %s6833_s24 }
 0x19a   : > { %757 = vrot.lane.b32.xlu0 %v7015_v31, %s6832_s16 }
 0x19e   : > { %755 = vrot.lane.b32.xlu0 %v7023_v35, %s6832_s16 }
 0x1a2   : > { %731 = vrot.lane.b32.xlu0 %v6981_v15, %s6832_s16 }
 0x1a6   : > { %735 = vrot.lane.b32.xlu0 %v7035_v46, %s6832_s16 }
 0x1aa   : > { %739 = vrot.lane.b32.xlu0 %v7047_v56, %s6832_s16 }
 0x1ae   : > { %743 = vrot.lane.b32.xlu0 %v7059_v2, %s6832_s16 }
 0x1b2   : > { %1058 = vrot.lane.b32.xlu0 %v7074_v14, %s6832_s16 }
 0x1b6   : > { %1054 = vrot.lane.b32.xlu0 %v7085_v21, %s6832_s16 }
 0x1ba   : > { %1052 = vrot.lane.b32.xlu0 %v7091_v25, %s6832_s16 }
 0x1be   : > { %1050 = vrot.lane.b32.xlu0 %v7097_v29, %s6832_s16 }
 0x1c2   : > { %1046 = vrot.lane.b32.xlu0 %v7105_v37, %s6832_s16 }
 0x1c6   : > { %v375_v0 = vpop.xlane.xlu1 %374  ;;  %1412 = vrot.lane.b32.xlu0 %v6956_v3, %s6833_s24 }
 0x1c7   : > { %v404_v6 = vsub.f32 %v7115_v42, %v375_v0  ;;  %v817_v42 = vsel %vm224_vm0, %v7111_v41, 0 }
 0x1c8   : > { %v371_v4 = vpop.xlane.xlu0 %370 }
 0x1c9   : > { %v402_v2 = vsub.f32 %v307_v43, %v371_v4  ;;  %v422_v14 = vmul.f32 1.442695, %v404_v6 }
 0x1ca   : > { %v377_v7 = vpop.xlane.xlu1 %376 }
 0x1cb   : > { %v418_v8 = vmul.f32 1.442695, %v402_v2  ;;  %v405_v10 = vsub.f32 %v5606_v44, %v377_v7 }
 0x1cc   : > { %v373_v11 = vpop.xlane.xlu0 %372 }
 0x1cd   : > { %v424_v12 = vmul.f32 1.442695, %v405_v10  ;;  %v403_v13 = vsub.f32 %v310_v47, %v373_v11  ;;  %6223 = vpow2.f32 %v418_v8 }
 0x1ce   : > { %v383_v16 = vpop.xlane.xlu1 %382 }
 0x1cf   : > { %v420_v17 = vmul.f32 1.442695, %v403_v13  ;;  %6225 = vpow2.f32 %v424_v12  ;;  %v408_v24 = vsub.f32 %v7118_v48, %v383_v16  ;;  %v814_v48 = vsel %vm224_vm0, %v768_v62, 0 }
 0x1d0   : > { %v764_v2 = vpop.permute.xlu0 %763 }
 0x1d1   : > { %6227 = vpow2.f32 %v420_v17  ;;  %v430_v32 = vmul.f32 1.442695, %v408_v24  ;;  %v808_v8 = vsel %vm224_vm0, %v764_v2, 0 }
 0x1d2   : > { %6229 = vpow2.f32 %v422_v14  ;;  %v379_v18 = vpop.xlane.xlu1 %378 }
 0x1d3   : > { %v406_v20 = vsub.f32 %v7121_v49, %v379_v18 }
 0x1d5   : > { %v426_v25 = vmul.f32 1.442695, %v406_v20 }
 0x1d6   : > { %v385_v21 = vpop.xlane.xlu1 %384 }
 0x1d7   : > { %v409_v22 = vsub.f32 %v7123_v50, %v385_v21  ;;  %6231 = vpow2.f32 %v426_v25 }
 0x1d9   : > { %v432_v26 = vmul.f32 1.442695, %v409_v22 }
 0x1da   : > { %v381_v28 = vpop.xlane.xlu1 %380  ;;  %v7199_v30 = vpop.eup %6223 }
 0x1db   : > { %v407_v29 = vsub.f32 %v7126_v51, %v381_v28  ;;  %9966 = vst [vmem:[#allocation9_spill] sm:$0xff] %v7199_v30  ;;  %6233 = vpow2.f32 %v432_v26 }
 0x1dc   : > { %v7201_v33 = vpop.eup %6225 }
 0x1dd   : > { %9967 = vst [vmem:[#allocation10_spill] sm:$0xff] %v7201_v33  ;;  %v428_v34 = vmul.f32 1.442695, %v407_v29 }
 0x1de   : > { %v7203_v36 = vpop.eup %6227  ;;  %v389_v37 = vpop.xlane.xlu1 %388 }
 0x1df   : > { %9968 = vst [vmem:[#allocation11_spill] sm:$0xff] %v7203_v36  ;;  %v7205_v38 = vpop.eup %6229  ;;  %6235 = vpow2.f32 %v428_v34  ;;  %v482_v39 = vpack.c.bf16 %v7203_v36, %v7199_v30  ;;  %v411_v11 = vsub.f32 %v7136_v57, %v389_v37  ;;  %v1962_v30 = vld [vmem:[%s6947_s29 + $0x20] sm:$0xff] }
 0x1e0   : > { %9969 = vst [vmem:[#allocation12_spill] sm:$0xff] %v7205_v38  ;;  %6237 = vpow2.f32 %v430_v32  ;;  %v483_v40 = vpack.c.bf16 %v7201_v33, %v7205_v38  ;;  %v1925_v38 = vld [vmem:[%s6947_s29 + $0x60] sm:$0xff] }
 0x1e1   : > { %5635 = vmatprep.mubr.bf16.mxu1 %v482_v39  ;;  %v1941_v36 = vmul.f32 0.25, %v1925_v38 }
 0x1e2   : > { %5636 = vmatmul.mubr.bf16.vlgmr.msra.gmra.mxu1 %v483_v40  ;;  %v399_v43 = vpop.xlane.xlu1 %398 }
 0x1e3   : > { %5652 = vmatpush3.bf16.xpose.msra.mxu1 %v817_v42  ;;  %v416_v28 = vsub.f32 %v7139_v58, %v399_v43 }
 0x1e4   : > { %6108 = vmatprep.subr.msk.bf16.mxu1 %vm224_vm0, %v768_v62  ;;  %v7214_v47 = vpop.eup %6231  ;;  %v811_v62 = vsel %vm224_vm0, %v766_v63, 0 }
 0x1e5   : > { %9970 = vst [vmem:[#allocation13_spill] sm:$0xff] %v7214_v47  ;;  %v446_v32 = vmul.f32 1.442695, %v416_v28 }
 0x1e6   : > { %v395_v44 = vpop.xlane.xlu1 %394 }
 0x1e7   : > { %v414_v18 = vsub.f32 %v7144_v59, %v395_v44 }
 0x1e8   : > { %v7217_v49 = vpop.eup %6233 }
 0x1e9   : > { %9971 = vst [vmem:[#allocation14_spill] sm:$0xff] %v7217_v49  ;;  %v442_v25 = vmul.f32 1.442695, %v414_v18 }
 0x1ea   : > { %v401_v4 = vpop.xlane.xlu1 %400 }
 0x1eb   : > { %5654 = vmatpush3.bf16.xpose.msra.mxu1 %v814_v48  ;;  %v417_v26 = vsub.f32 %v7147_v60, %v401_v4 }
 0x1ec   : > { %v7219_v50 = vpop.eup %6235  ;;  %6109 = vmatprep.subr.msk.bf16.mxu1 %vm224_vm0, %v766_v63  ;;  %v436_v63 = vmul.f32 1.442695, %v411_v11 }
 0x1ed   : > { %9972 = vst [vmem:[#allocation15_spill] sm:$0xff] %v7219_v50  ;;  %v7222_v51 = vpop.eup %6237  ;;  %v484_v41 = vpack.c.bf16 %v7219_v50, %v7214_v47  ;;  %v448_v59 = vmul.f32 1.442695, %v417_v26  ;;  %v1924_v50 = vld [vmem:[%s6947_s29 + $0x48] sm:$0xff] }
 0x1ee   : > { %9973 = vst [vmem:[#allocation16_spill] sm:$0xff] %v7222_v51  ;;  %v485_v0 = vpack.c.bf16 %v7217_v49, %v7222_v51  ;;  %v397_v6 = vpop.xlane.xlu1 %396  ;;  %6239 = vpow2.f32 %v436_v63  ;;  %v1923_v49 = vld [vmem:[%s6947_s29 + $0x30] sm:$0xff] }
 0x1ef   : > { %5639 = vmatprep.mubr.bf16.mxu1 %v484_v41  ;;  %v415_v13 = vsub.f32 %v7150_v61, %v397_v6 }
 0x1f0   : > { %5640 = vmatmul.mubr.bf16.gmra.mxu1 %v485_v0 }
 0x1f1   : > { %v444_v20 = vmul.f32 1.442695, %v415_v13 }
 0x1f2   : > { %v762_v7 = vpop.permute.xlu1 %761 }
 0x1f3   : > { %5656 = vmatpush3.bf16.xpose.msra.mxu1 %v811_v62  ;;  %v805_v10 = vsel %vm224_vm0, %v762_v7, 0 }
 0x1f4   : > { %6110 = vmatprep.subr.msk.bf16.mxu1 %vm224_vm0, %v764_v2 }
 0x1f6   : > { %v734_v6 = vpop.permute.xlu1 %733 }
 0x1fb   : > { %5658 = vmatpush3.bf16.xpose.msra.mxu1 %v808_v8  ;;  %v7245_v34 = vpop.eup %6239  ;;  %v738_v8 = vpop.permute.xlu1 %737 }
 0x1fc   : > { %6111 = vmatprep.subr.msk.bf16.mxu1 %vm224_vm0, %v762_v7  ;;  %9974 = vst [vmem:[#allocation17_spill] sm:$0xff] %v7245_v34 }
 0x1ff   : > { %v742_v11 = vpop.permute.xlu1 %741 }
 0x201   : > { %v391_v12 = vpop.xlane.xlu0 %390 }
 0x202   : > { %v412_v14 = vsub.f32 %v7128_v52, %v391_v12 }
 0x203   : > { %5660 = vmatpush3.bf16.xpose.msra.mxu1 %v805_v10  ;;  %v746_v13 = vpop.permute.xlu1 %745 }
 0x204   : > { %v438_v22 = vmul.f32 1.442695, %v412_v14 }
 0x205   : > { %v387_v16 = vpop.xlane.xlu0 %386 }
 0x206   : > { %v410_v17 = vsub.f32 %v7131_v53, %v387_v16 }
 0x207   : > { %v1057_v14 = vpop.permute.xlu1 %1056 }
 0x208   : > { %v434_v21 = vmul.f32 1.442695, %v410_v17 }
 0x209   : > { %v393_v24 = vpop.xlane.xlu0 %392 }
 0x20a   : > { %6241 = vpow2.f32 %v434_v21  ;;  %v413_v57 = vsub.f32 %v7133_v54, %v393_v24 }
 0x20b   : > { %6243 = vpow2.f32 %v444_v20  ;;  %v1049_v17 = vpop.permute.xlu1 %1048 }
 0x20c   : > { %v440_v61 = vmul.f32 1.442695, %v413_v57  ;;  %6245 = vpow2.f32 %v438_v22 }
 0x20d   : > { %v760_v52 = vpop.permute.xlu0 %759 }
 0x20e   : > { %6247 = vpow2.f32 %v440_v61  ;;  %6112 = vmatprep.subr.msk.bf16.mxu1 %vm224_vm0, %v760_v52  ;;  %v802_v53 = vsel %vm224_vm0, %v760_v52, 0 }
 0x20f   : > { %6249 = vpow2.f32 %v442_v25  ;;  %5662 = vmatpush3.bf16.xpose.msra.mxu1 %v802_v53  ;;  %v1045_v21 = vpop.permute.xlu1 %1044 }
 0x210   : > { %6251 = vpow2.f32 %v448_v59 }
 0x211   : > { %v758_v29 = vpop.permute.xlu0 %757  ;;  %6253 = vpow2.f32 %v446_v32 }
 0x212   : > { %6113 = vmatprep.subr.msk.bf16.mxu1 %vm224_vm0, %v758_v29  ;;  %v799_v54 = vsel %vm224_vm0, %v758_v29, 0 }
 0x215   : > { %v756_v60 = vpop.permute.xlu0 %755 }
 0x216   : > { %v796_v48 = vsel %vm224_vm0, %v756_v60, 0 }
 0x217   : > { %v7247_v58 = vpop.eup %6241  ;;  %5664 = vmatpush3.bf16.xpose.msra.mxu1 %v799_v54 }
 0x218   : > { %9975 = vst [vmem:[#allocation18_spill] sm:$0xff] %v7247_v58  ;;  %v486_v37 = vpack.c.bf16 %v7245_v34, %v7247_v58  ;;  %6114 = vmatprep.subr.msk.bf16.mxu1 %vm224_vm0, %v756_v60  ;;  %v7252_v39 = vpop.eup %6243  ;;  %v1921_v58 = vld [vmem:[%s6947_s29] sm:$0xff]  ;;  %v1926_v34 = vld [vmem:[%s6947_s29 + $0x78] sm:$0xff] }
 0x219   : > { %9976 = vst [vmem:[#allocation19_spill] sm:$0xff] %v7252_v39  ;;  %v7254_v40 = vpop.eup %6245  ;;  %v732_v2 = vpop.permute.xlu0 %731 }
 0x21a   : > { %9977 = vst [vmem:[#allocation20_spill] sm:$0xff] %v7254_v40  ;;  %5643 = vmatprep.mubr.bf16.mxu1 %v486_v37 }
 0x21b   : > { %v7256_v42 = vpop.eup %6247 }
 0x21c   : > { %9978 = vst [vmem:[#allocation21_spill] sm:$0xff] %v7256_v42  ;;  %v7258_v43 = vpop.eup %6249  ;;  %v487_v44 = vpack.c.bf16 %v7256_v42, %v7254_v40  ;;  %v1964_v40 = vld [vmem:[%s6947_s29 + $0x50] sm:$0xff]  ;;  %v1961_v42 = vld [vmem:[%s6947_s29 + $0x8] sm:$0xff] }
 0x21d   : > { %9979 = vst [vmem:[#allocation22_spill] sm:$0xff] %v7258_v43  ;;  %v488_v41 = vpack.c.bf16 %v7252_v39, %v7258_v43  ;;  %v7265_v0 = vpop.eup %6251  ;;  %v736_v7 = vpop.permute.xlu0 %735  ;;  %v1937_v39 = vmul.f32 0.25, %v1921_v58  ;;  %v1939_v58 = vmul.f32 0.25, %v1923_v49  ;;  %v1931_v49 = vld [vmem:[%s6947_s29 + $0xf0] sm:$0xff] }
 0x21e   : > { %5644 = vmatmul.mubr.bf16.gmra.mxu1 %v487_v44  ;;  %9980 = vst [vmem:[#allocation23_spill] sm:$0xff] %v7265_v0  ;;  %v7267_v4 = vpop.eup %6253 }
 0x21f   : > { %5647 = vmatprep.mubr.bf16.mxu1 %v488_v41  ;;  %5666 = vmatpush3.bf16.xpose.msra.mxu1 %v796_v48  ;;  %9981 = vst [vmem:[#allocation24_spill] sm:$0xff] %v7267_v4  ;;  %v489_v62 = vpack.c.bf16 %v7265_v0, %v7267_v4  ;;  %v1922_v0 = vld [vmem:[%s6947_s29 + $0x18] sm:$0xff] }
 0x220   : > { %v1938_v47 = vmul.f32 0.25, %v1922_v0  ;;  %v1940_v0 = vmul.f32 0.25, %v1924_v50  ;;  %v1932_v50 = vld [vmem:[%s6947_s29 + $0x108] sm:$0xff] }
 0x221   : > { %v740_v10 = vpop.permute.xlu0 %739 }
 0x222   : > { %v7665_v33 = vpack.c.bf16 %v1938_v47, %v1937_v39  ;;  %v7679_v38 = vpack.c.bf16 %v1940_v0, %v1939_v58 }
 0x225   : > { %v744_v12 = vpop.permute.xlu0 %743 }
 0x226   : > { %5648 = vmatmul.mubr.bf16.gmra.mxu1 %v489_v62 }
 0x227   : > { %5667 = vmatprep.mubr.msk.bf16.mxu1 %vm224_vm0, %v732_v2 }
 0x229   : > { %v1059_v63 = vpop.permute.xlu0 %1058 }
 0x22a   : > { %5683 = vmatprep.subr.bf16.mxu0 %v1059_v63 }
 0x22b   : > { %5684 = vmatpush3.bf16.msra.mxu0 %v1059_v63 }
 0x22c   : > { %5685 = vmatprep.subr.bf16.mxu0 %v1057_v14 }
 0x22d   : > { %v1055_v16 = vpop.permute.xlu0 %1054 }
 0x22e   : > { %5668 = vmatmul.mubr.msk.bf16.vlgmr.msra.gmra.mxu1 %vm224_vm0, %v734_v6 }
 0x22f   : > { %5671 = vmatprep.mubr.msk.bf16.mxu1 %vm224_vm0, %v736_v7  ;;  %5686 = vmatpush3.bf16.msra.mxu0 %v1057_v14 }
 0x230   : > { %5687 = vmatprep.subr.bf16.mxu0 %v1055_v16 }
 0x231   : > { %v1053_v5 = vpop.permute.xlu0 %1052 }
 0x233   : > { %5688 = vmatpush3.bf16.msra.mxu0 %v1055_v16  ;;  %v1292_v16 = vld [vmem:[%s6947_s29 + $0x150] sm:$0xff] }
 0x234   : > { %5689 = vmatprep.subr.bf16.mxu0 %v1053_v5 }
 0x235   : > { %v1051_v3 = vpop.permute.xlu0 %1050 }
 0x236   : > { %5672 = vmatmul.mubr.msk.bf16.gmra.mxu1 %vm224_vm0, %v738_v8 }
 0x237   : > { %5675 = vmatprep.mubr.msk.bf16.mxu1 %vm224_vm0, %v740_v10  ;;  %5690 = vmatpush3.bf16.msra.mxu0 %v1053_v5  ;;  %v1293_v5 = vld [vmem:[%s6947_s29 + $0x168] sm:$0xff] }
 0x238   : > { %5691 = vmatprep.subr.bf16.mxu0 %v1051_v3 }
 0x239   : > { %v1047_v18 = vpop.permute.xlu0 %1046 }
 0x23b   : > { %5692 = vmatpush3.bf16.msra.mxu0 %v1051_v3  ;;  %v1308_v3 = vmul.f32 0.25, %v1292_v16 }
 0x23c   : > { %5693 = vmatprep.subr.bf16.mxu0 %v1049_v17 }
 0x23d   : > { %v7285_v22 = vpop.permute.xlu0 %1412 }
 0x23e   : > { %5676 = vmatmul.mubr.msk.bf16.gmra.mxu1 %vm224_vm0, %v742_v11 }
 0x23f   : > { %5679 = vmatprep.mubr.msk.bf16.mxu1 %vm224_vm0, %v744_v12  ;;  %5694 = vmatpush3.bf16.msra.mxu0 %v1049_v17  ;;  %v1309_v17 = vmul.f32 0.25, %v1293_v5 }
 0x240   : > { %5695 = vmatprep.subr.bf16.mxu0 %v1047_v18 }
 0x243   : > { %5696 = vmatpush3.bf16.msra.mxu0 %v1047_v18  ;;  %v7373_v18 = vpack.c.bf16 %v1309_v17, %v1308_v3 }
 0x244   : > { %5697 = vmatprep.subr.bf16.mxu0 %v1045_v21 }
 0x246   : > { %5680 = vmatmul.mubr.msk.bf16.gmra.mxu1 %vm224_vm0, %v746_v13 }
 0x247   : > { %5698 = vmatpush3.bf16.msra.mxu0 %v1045_v21 }
 0x248   : > { %6115 = vmatprep.subr.msk.bf16.mxu0 %vm224_vm0, %v7285_v22 }
 0x2a2   : > { %v7283_v20 = vpop.f32.mrf.mxu1 }
 0x2a3   : > { %9982 = vst [vmem:[#allocation25_spill] sm:$0xff] %v7283_v20 }
 0x2a4   : > { %v7289_v24 = vpop.f32.mrf.mxu1 }
 0x2a5   : > { %9983 = vst [vmem:[#allocation26_spill] sm:$0xff] %v7289_v24 }
 0x2a6   : > { %v7291_v57 = vpop.f32.mrf.mxu1 }
 0x2a7   : > { %9984 = vst [vmem:[#allocation27_spill] sm:$0xff] %v7291_v57 }
 0x2a8   : > { %v7293_v25 = vpop.f32.mrf.mxu1 }
 0x2a9   : > { %9985 = vst [vmem:[#allocation28_spill] sm:$0xff] %v7293_v25 }
 0x2b0   : > { %v7295_v26 = vpop.f32.mrf.mxu1 }
 0x2b1   : > { %9986 = vst [vmem:[#allocation29_spill] sm:$0xff] %v7295_v26 }
 0x2b2   : > { %v7297_v61 = vpop.f32.mrf.mxu1 }
 0x2b3   : > { %9987 = vst [vmem:[#allocation30_spill] sm:$0xff] %v7297_v61 }
 0x2b4   : > { %v7299_v52 = vpop.f32.mrf.mxu1 }
 0x2b5   : > { %9988 = vst [vmem:[#allocation31_spill] sm:$0xff] %v7299_v52 }
 0x2b6   : > { %v7301_v28 = vpop.f32.mrf.mxu1 }
 0x2b7   : > { %9989 = vst [vmem:[#allocation32_spill] sm:$0xff] %v7301_v28 }
 0x2de   : > { %v7303_v53 = vpop.f32.mrf.mxu1 }
 0x2df   : > { %9990 = vst [vmem:[#allocation33_spill] sm:$0xff] %v7303_v53 }
 0x2e0   : > { %v7305_v59 = vpop.f32.mrf.mxu1 }
 0x2e1   : > { %9991 = vst [vmem:[#allocation34_spill] sm:$0xff] %v7305_v59 }
 0x2e2   : > { %v7307_v29 = vpop.f32.mrf.mxu1 }
 0x2e3   : > { %9992 = vst [vmem:[#allocation35_spill] sm:$0xff] %v7307_v29 }
 0x2e4   : > { %v7309_v32 = vpop.f32.mrf.mxu1 }
 0x2e5   : > { %9993 = vst [vmem:[#allocation36_spill] sm:$0xff] %v7309_v32 }
 0x2e6   : > { %v7311_v54 = vpop.f32.mrf.mxu1 }
 0x2e7   : > { %9994 = vst [vmem:[#allocation37_spill] sm:$0xff] %v7311_v54 }
 0x2e8   : > { %v7313_v60 = vpop.f32.mrf.mxu1 }
 0x2e9   : > { %9995 = vst [vmem:[#allocation38_spill] sm:$0xff] %v7313_v60 }
 0x2ea   : > { %v7315_v37 = vpop.f32.mrf.mxu1 }
 0x2eb   : > { %9996 = vst [vmem:[#allocation39_spill] sm:$0xff] %v7315_v37 }
 0x2ec   : > { %v7317_v44 = vpop.f32.mrf.mxu1 }
 0x2ed   : > { %9997 = vst [vmem:[#allocation40_spill] sm:$0xff] %v7317_v44 }
 0x2ee   : > { %v7319_v48 = vpop.f32.mrf.mxu1 }
 0x2ef   : > { %920 = vmax.xlane.f32.xlu1 %v7319_v48 }
 0x2f0   : > { %v853_v41 = vpop.f32.mrf.mxu1 }
 0x2f1   : > { %916 = vmax.xlane.f32.xlu0 %v853_v41 }
 0x2f2   : > { %v5670_v62 = vpop.f32.mrf.mxu1 }
 0x2f3   : > { %922 = vmax.xlane.f32.xlu1 %v5670_v62 }
 0x2f4   : > { %v7322_v2 = vpop.f32.mrf.mxu1 }
 0x2f6   : > { %v7325_v6 = vpop.f32.mrf.mxu1 }
 0x2f7   : > { %918 = vmax.xlane.f32.xlu1 %v7322_v2 }
 0x2f8   : > { %v7327_v7 = vpop.f32.mrf.mxu1 }
 0x2fa   : > { %v7333_v8 = vpop.f32.mrf.mxu1 }
 0x2fc   : > { %v7337_v10 = vpop.f32.mrf.mxu1 }
 0x2fe   : > { %v7339_v11 = vpop.f32.mrf.mxu1 }
 0x300   : > { %v7341_v12 = vpop.f32.mrf.mxu1 }
 0x302   : > { %v7343_v13 = vpop.f32.mrf.mxu1 }
 0x304   : > { %v7345_v63 = vpop.f32.mrf.mxu1 }
 0x307   : > { %1406 = vrot.lane.b32.xlu0 %v6991_v19, %s6833_s24  ;;  %v7347_v19 = vpop.f32.mrf.mxu1 }
 0x308   : > { %1408 = vrot.lane.b32.xlu1 %v6973_v9, %s6833_s24 }
 0x309   : > { %v7349_v9 = vpop.f32.mrf.mxu1 }
 0x30b   : > { %1404 = vrot.lane.b32.xlu0 %v6999_v23, %s6833_s24  ;;  %v7351_v14 = vpop.f32.mrf.mxu1 }
 0x30d   : > { %v7355_v23 = vpop.f32.mrf.mxu1 }
 0x32a   : > { %928 = vmax.xlane.f32.xlu0 %v7325_v6 }
 0x32c   : > { %924 = vmax.xlane.f32.xlu1 %v7327_v7 }
 0x32e   : > { %930 = vmax.xlane.f32.xlu0 %v7333_v8 }
 0x330   : > { %942 = vmax.xlane.f32.xlu1 %v7355_v23 }
 0x332   : > { %926 = vmax.xlane.f32.xlu0 %v7337_v10 }
 0x336   : > { %936 = vmax.xlane.f32.xlu0 %v7339_v11 }
 0x33a   : > { %932 = vmax.xlane.f32.xlu0 %v7341_v12 }
 0x33e   : > { %938 = vmax.xlane.f32.xlu0 %v7343_v13 }
 0x341   : > { %1402 = vrot.lane.b32.xlu1 %v7007_v27, %s6833_s24  ;;  %v1290_v27 = vld [vmem:[%s6947_s29 + $0x120] sm:$0xff] }
 0x342   : > { %934 = vmax.xlane.f32.xlu0 %v7345_v63  ;;  %v1306_v21 = vmul.f32 0.25, %v1290_v27 }
 0x345   : > { %1380 = vrot.lane.b32.xlu1 %v7045_v55, %s6833_s24  ;;  %v1291_v55 = vld [vmem:[%s6947_s29 + $0x138] sm:$0xff] }
 0x346   : > { %944 = vmax.xlane.f32.xlu0 %v7347_v19  ;;  %v1307_v16 = vmul.f32 0.25, %v1291_v55 }
 0x349   : > { %1384 = vrot.lane.b32.xlu1 %v7057_v1, %s6833_s24  ;;  %v1411_v1 = vpop.permute.xlu1 %1410 }
 0x34a   : > { %940 = vmax.xlane.f32.xlu0 %v7349_v9 }
 0x34d   : > { %1388 = vrot.lane.b32.xlu1 %v7373_v18, %s6833_s24 }
 0x34e   : > { %946 = vmax.xlane.f32.xlu0 %v7351_v14 }
 0x364   : > { %1400 = vrot.lane.b32.xlu0 %v7015_v31, %s6833_s24  ;;  %v7393_v31 = vpack.c.bf16 %v1307_v16, %v1306_v21 }
 0x368   : > { %1398 = vrot.lane.b32.xlu0 %v7023_v35, %s6833_s24 }
 0x36c   : > { %1374 = vrot.lane.b32.xlu0 %v6981_v15, %s6833_s24 }
 0x370   : > { %1376 = vrot.lane.b32.xlu0 %v7033_v45, %s6833_s24 }
 0x374   : > { %1378 = vrot.lane.b32.xlu0 %v7035_v46, %s6833_s24 }
 0x378   : > { %v921_v5 = vpop.xlane.xlu1 %920  ;;  %1382 = vrot.lane.b32.xlu0 %v7047_v56, %s6833_s24 }
 0x379   : > { %v950_v17 = vsub.f32 %v7319_v48, %v921_v5 }
 0x37a   : > { %v917_v35 = vpop.xlane.xlu0 %916 }
 0x37b   : > { %v948_v3 = vsub.f32 %v853_v41, %v917_v35  ;;  %v968_v55 = vmul.f32 1.442695, %v950_v17 }
 0x37c   : > { %v923_v15 = vpop.xlane.xlu1 %922  ;;  %1386 = vrot.lane.b32.xlu0 %v7393_v31, %s6833_s24 }
 0x37d   : > { %v951_v45 = vsub.f32 %v5670_v62, %v923_v15  ;;  %v964_v54 = vmul.f32 1.442695, %v948_v3 }
 0x37e   : > { %v1407_v5 = vpop.permute.xlu0 %1406 }
 0x37f   : > { %v970_v60 = vmul.f32 1.442695, %v951_v45  ;;  %6255 = vpow2.f32 %v964_v54  ;;  %v1457_v54 = vsel %vm224_vm0, %v1411_v1, 0  ;;  %v1451_v35 = vsel %vm224_vm0, %v1407_v5, 0 }
 0x380   : > { %v919_v46 = vpop.xlane.xlu1 %918 }
 0x381   : > { %v949_v27 = vsub.f32 %v7322_v2, %v919_v46  ;;  %6257 = vpow2.f32 %v970_v60 }
 0x382   : > { %v1405_v3 = vpop.permute.xlu0 %1404 }
 0x383   : > { %v966_v53 = vmul.f32 1.442695, %v949_v27  ;;  %v1448_v45 = vsel %vm224_vm0, %v1405_v3, 0 }
 0x384   : > { %v1409_v60 = vpop.permute.xlu1 %1408 }
 0x385   : > { %6259 = vpow2.f32 %v966_v53  ;;  %v1460_v53 = vsel %vm224_vm0, %v7285_v22, 0  ;;  %v1454_v16 = vsel %vm224_vm0, %v1409_v60, 0 }
 0x386   : > { %6261 = vpow2.f32 %v968_v55 }
 0x38c   : > { %v7399_v56 = vpop.eup %6255 }
 0x38e   : > { %v7401_v41 = vpop.eup %6257 }
 0x392   : > { %v7403_v21 = vpop.eup %6259 }
 0x393   : > { %v7405_v62 = vpop.eup %6261  ;;  %v1028_v48 = vpack.c.bf16 %v7403_v21, %v7399_v56 }
 0x394   : > { %v1029_v2 = vpack.c.bf16 %v7401_v41, %v7405_v62 }
 0x395   : > { %5699 = vmatprep.mubr.bf16.mxu0 %v1028_v48 }
 0x396   : > { %5700 = vmatmul.mubr.bf16.vlgmr.msra.gmra.mxu0 %v1029_v2 }
 0x397   : > { %5716 = vmatpush3.bf16.xpose.msra.mxu0 %v1460_v53 }
 0x398   : > { %6116 = vmatprep.subr.msk.bf16.mxu0 %vm224_vm0, %v1411_v1 }
 0x39f   : > { %5718 = vmatpush3.bf16.xpose.msra.mxu0 %v1457_v54 }
 0x3a0   : > { %6117 = vmatprep.subr.msk.bf16.mxu0 %vm224_vm0, %v1409_v60 }
 0x3a7   : > { %5720 = vmatpush3.bf16.xpose.msra.mxu0 %v1454_v16 }
 0x3a8   : > { %6118 = vmatprep.subr.msk.bf16.mxu0 %vm224_vm0, %v1407_v5 }
 0x3af   : > { %5722 = vmatpush3.bf16.xpose.msra.mxu0 %v1451_v35 }
 0x3b0   : > { %6119 = vmatprep.subr.msk.bf16.mxu0 %vm224_vm0, %v1405_v3 }
 0x3b3   : > { %v929_v22 = vpop.xlane.xlu0 %928 }
 0x3b4   : > { %v954_v27 = vsub.f32 %v7325_v6, %v929_v22 }
 0x3b5   : > { %v925_v15 = vpop.xlane.xlu1 %924 }
 0x3b6   : > { %v952_v1 = vsub.f32 %v7327_v7, %v925_v15  ;;  %v976_v60 = vmul.f32 1.442695, %v954_v27 }
 0x3b7   : > { %5724 = vmatpush3.bf16.xpose.msra.mxu0 %v1448_v45  ;;  %v931_v17 = vpop.xlane.xlu0 %930 }
 0x3b8   : > { %v955_v46 = vsub.f32 %v7333_v8, %v931_v17  ;;  %v972_v48 = vmul.f32 1.442695, %v952_v1 }
 0x3b9   : > { %v943_v55 = vpop.xlane.xlu1 %942 }
 0x3ba   : > { %v978_v2 = vmul.f32 1.442695, %v955_v46  ;;  %6263 = vpow2.f32 %v972_v48 }
 0x3bb   : > { %v927_v53 = vpop.xlane.xlu0 %926 }
 0x3bc   : > { %v953_v54 = vsub.f32 %v7337_v10, %v927_v53  ;;  %6265 = vpow2.f32 %v978_v2 }
 0x3bd   : > { %v1403_v16 = vpop.permute.xlu1 %1402 }
 0x3be   : > { %v974_v5 = vmul.f32 1.442695, %v953_v54  ;;  %6120 = vmatprep.subr.msk.bf16.mxu0 %vm224_vm0, %v1403_v16  ;;  %v1445_v7 = vsel %vm224_vm0, %v1403_v16, 0 }
 0x3bf   : > { %v937_v35 = vpop.xlane.xlu0 %936  ;;  %5726 = vmatpush3.bf16.xpose.msra.mxu0 %v1445_v7 }
 0x3c0   : > { %6267 = vpow2.f32 %v974_v5  ;;  %v958_v10 = vsub.f32 %v7339_v11, %v937_v35  ;;  %v961_v11 = vsub.f32 %v7355_v23, %v943_v55 }
 0x3c1   : > { %6269 = vpow2.f32 %v976_v60 }
 0x3c2   : > { %v984_v2 = vmul.f32 1.442695, %v958_v10  ;;  %v1356_v10 = vld [vmem:[%s6947_s29 + $0x160] sm:$0xff] }
 0x3c3   : > { %v933_v6 = vpop.xlane.xlu0 %932 }
 0x3c4   : > { %v956_v8 = vsub.f32 %v7341_v12, %v933_v6 }
 0x3c6   : > { %v980_v15 = vmul.f32 1.442695, %v956_v8 }
 0x3c7   : > { %v939_v3 = vpop.xlane.xlu0 %938  ;;  %v7430_v1 = vpop.eup %6263 }
 0x3c8   : > { %v959_v22 = vsub.f32 %v7343_v13, %v939_v3  ;;  %6271 = vpow2.f32 %v980_v15  ;;  %v1357_v15 = vld [vmem:[%s6947_s29 + $0x178] sm:$0xff] }
 0x3c9   : > { %v7432_v46 = vpop.eup %6265 }
 0x3ca   : > { %v986_v45 = vmul.f32 1.442695, %v959_v22 }
 0x3cb   : > { %v935_v17 = vpop.xlane.xlu0 %934 }
 0x3cc   : > { %v957_v27 = vsub.f32 %v7345_v63, %v935_v17  ;;  %6273 = vpow2.f32 %v986_v45  ;;  %v990_v63 = vmul.f32 1.442695, %v961_v11  ;;  %v1354_v45 = vld [vmem:[%s6947_s29 + $0x130] sm:$0xff]  ;;  %v7458_v17 = vpack.c.bf16 %v1357_v15, %v1356_v10  ;;  %v1348_v15 = vld [vmem:[%s6947_s29 + $0xa0] sm:$0xff] }
 0x3cd   : > { %v7435_v48 = vpop.eup %6267 }
 0x3ce   : > { %v7437_v53 = vpop.eup %6269  ;;  %v982_v12 = vmul.f32 1.442695, %v957_v27  ;;  %v1030_v13 = vpack.c.bf16 %v7435_v48, %v7430_v1  ;;  %v1355_v27 = vld [vmem:[%s6947_s29 + $0x148] sm:$0xff]  ;;  %1701 = vrot.lane.b32.xlu0 %v7458_v17, %s6833_s24 }
 0x3cf   : > { %v945_v54 = vpop.xlane.xlu0 %944  ;;  %v1031_v60 = vpack.c.bf16 %v7432_v46, %v7437_v53 }
 0x3d0   : > { %6275 = vpow2.f32 %v982_v12  ;;  %5703 = vmatprep.mubr.bf16.mxu0 %v1030_v13  ;;  %v962_v16 = vsub.f32 %v7347_v19, %v945_v54  ;;  %v1353_v12 = vld [vmem:[%s6947_s29 + $0x118] sm:$0xff]  ;;  %v7467_v54 = vpack.c.bf16 %v1355_v27, %v1354_v45 }
 0x3d1   : > { %6277 = vpow2.f32 %v984_v2  ;;  %5704 = vmatmul.mubr.bf16.gmra.mxu0 %v1031_v60  ;;  %v1352_v2 = vld [vmem:[%s6947_s29 + $0x100] sm:$0xff]  ;;  %v1349_v45 = vld [vmem:[%s6947_s29 + $0xb8] sm:$0xff] }
 0x3d2   : > { %6279 = vpow2.f32 %v990_v63  ;;  %v992_v23 = vmul.f32 1.442695, %v962_v16  ;;  %v7473_v16 = vpack.c.bf16 %v1353_v12, %v1352_v2  ;;  %1699 = vrot.lane.b32.xlu1 %v7467_v54, %s6833_s24 }
 0x3d3   : > { %v941_v5 = vpop.xlane.xlu0 %940 }
 0x3d4   : > { %v960_v7 = vsub.f32 %v7349_v9, %v941_v5  ;;  %v1346_v5 = vld [vmem:[%s6947_s29 + $0x70] sm:$0xff]  ;;  %1697 = vrot.lane.b32.xlu0 %v7473_v16, %s6833_s24 }
 0x3d5   : > { %v7447_v3 = vpop.eup %6271 }
 0x3d6   : > { %v988_v35 = vmul.f32 1.442695, %v960_v7  ;;  %9998 = vst [vmem:[#allocation41_spill] sm:$0xff] %v7447_v3  ;;  %v1347_v7 = vld [vmem:[%s6947_s29 + $0x88] sm:$0xff] }
 0x3d7   : > { %v947_v55 = vpop.xlane.xlu0 %946 }
 0x3d8   : > { %6281 = vpow2.f32 %v988_v35  ;;  %v963_v6 = vsub.f32 %v7351_v14, %v947_v55  ;;  %v1350_v35 = vld [vmem:[%s6947_s29 + $0xd0] sm:$0xff]  ;;  %v7482_v55 = vpack.c.bf16 %v1347_v7, %v1346_v5 }
 0x3d9   : > { %6283 = vpow2.f32 %v992_v23  ;;  %v7449_v22 = vpop.eup %6273  ;;  %v1351_v23 = vld [vmem:[%s6947_s29 + $0xe8] sm:$0xff] }
 0x3da   : > { %v994_v8 = vmul.f32 1.442695, %v963_v6  ;;  %1691 = vrot.lane.b32.xlu1 %v7482_v55, %s6833_s24 }
 0x3db   : > { %v1401_v19 = vpop.permute.xlu0 %1400 }
 0x3dc   : > { %6285 = vpow2.f32 %v994_v8  ;;  %6121 = vmatprep.subr.msk.bf16.mxu0 %vm224_vm0, %v1401_v19  ;;  %v1442_v9 = vsel %vm224_vm0, %v1401_v19, 0  ;;  %v1342_v8 = vld [vmem:[%s6947_s29 + $0x10] sm:$0xff]  ;;  %v1343_v19 = vld [vmem:[%s6947_s29 + $0x28] sm:$0xff] }
 0x3dd   : > { %v7456_v14 = vpop.eup %6275  ;;  %5728 = vmatpush3.bf16.xpose.msra.mxu0 %v1442_v9  ;;  %v7489_v9 = vpack.c.bf16 %v1351_v23, %v1350_v35  ;;  %v7499_v2 = vpack.c.bf16 %v1343_v19, %v1342_v8  ;;  %v1344_v35 = vld [vmem:[%s6947_s29 + $0x40] sm:$0xff]  ;;  %v1345_v23 = vld [vmem:[%s6947_s29 + $0x58] sm:$0xff] }
 0x3de   : > { %v7463_v13 = vpop.eup %6277  ;;  %v1032_v11 = vpack.c.bf16 %v7456_v14, %v7447_v3 }
 0x3df   : > { %9999 = vst [vmem:[#allocation42_spill] sm:$0xff] %v7463_v13  ;;  %v1033_v60 = vpack.c.bf16 %v7449_v22, %v7463_v13  ;;  %v1399_v63 = vpop.permute.xlu0 %1398  ;;  %v7491_v10 = vpop.eup %6279  ;;  %1695 = vrot.lane.b32.xlu0 %v7489_v9, %s6833_s24  ;;  %1687 = vrot.lane.b32.xlu1 %v7499_v2, %s6833_s24  ;;  %v1927_v13 = vld [vmem:[%s6947_s29 + $0x90] sm:$0xff] }
 0x3e0   : > { %5707 = vmatprep.mubr.bf16.mxu0 %v1032_v11  ;;  %6122 = vmatprep.subr.msk.bf16.mxu0 %vm224_vm0, %v1399_v63  ;;  %v1439_v6 = vsel %vm224_vm0, %v1399_v63, 0  ;;  %10000 = vst [vmem:[#allocation43_spill] sm:$0xff] %v7491_v10  ;;  %v1971_v11 = vld [vmem:[%s6947_s29 + $0xf8] sm:$0xff]  ;;  %v7507_v63 = vpack.c.bf16 %v1349_v45, %v1348_v15  ;;  %v7523_v15 = vpack.c.bf16 %v1345_v23, %v1344_v35 }
 0x3e1   : > { %5708 = vmatmul.mubr.bf16.gmra.mxu0 %v1033_v60  ;;  %v1972_v60 = vld [vmem:[%s6947_s29 + $0x110] sm:$0xff]  ;;  %v1975_v45 = vld [vmem:[%s6947_s29 + $0x158] sm:$0xff] }
 0x3e2   : > { %v7517_v8 = vpack.c.bf16 %v1972_v60, %v1971_v11 }
 0x3e3   : > { %v1375_v7 = vpop.permute.xlu0 %1374  ;;  %1693 = vrot.lane.b32.xlu0 %v7507_v63, %s6833_s24 }
 0x3e4   : > { %2051 = vrot.lane.b32.xlu1 %v7517_v8, %s6834_s25 }
 0x3e5   : > { %v7495_v27 = vpop.eup %6281  ;;  %5730 = vmatpush3.bf16.xpose.msra.mxu0 %v1439_v6 }
 0x3e6   : > { %10001 = vst [vmem:[#allocation44_spill] sm:$0xff] %v7495_v27  ;;  %v1034_v12 = vpack.c.bf16 %v7491_v10, %v7495_v27  ;;  %v7509_v5 = vpop.eup %6283  ;;  %v1930_v27 = vld [vmem:[%s6947_s29 + $0xd8] sm:$0xff] }
 0x3e7   : > { %10002 = vst [vmem:[#allocation45_spill] sm:$0xff] %v7509_v5  ;;  %v1377_v59 = vpop.permute.xlu0 %1376  ;;  %1689 = vrot.lane.b32.xlu0 %v7523_v15, %s6833_s24  ;;  %v1946_v47 = vmul.f32 0.25, %v1930_v27  ;;  %v1948_v27 = vmul.f32 0.25, %v1932_v50 }
 0x3e8   : > { %5711 = vmatprep.mubr.bf16.mxu0 %v1034_v12  ;;  %v1976_v12 = vld [vmem:[%s6947_s29 + $0x170] sm:$0xff] }
 0x3e9   : > { %v7513_v6 = vpop.eup %6285  ;;  %v7532_v11 = vpack.c.bf16 %v1976_v12, %v1975_v45  ;;  %v1974_v12 = vld [vmem:[%s6947_s29 + $0x140] sm:$0xff] }
 0x3ea   : > { %10003 = vst [vmem:[#allocation46_spill] sm:$0xff] %v7513_v6  ;;  %v1035_v19 = vpack.c.bf16 %v7513_v6, %v7509_v5  ;;  %v1929_v5 = vld [vmem:[%s6947_s29 + $0xc0] sm:$0xff]  ;;  %v1928_v6 = vld [vmem:[%s6947_s29 + $0xa8] sm:$0xff] }
 0x3eb   : > { %v1379_v60 = vpop.permute.xlu0 %1378  ;;  %2055 = vrot.lane.b32.xlu0 %v7532_v11, %s6834_s25  ;;  %v1945_v10 = vmul.f32 0.25, %v1929_v5 }
 0x3ec   : > { %5712 = vmatmul.mubr.bf16.gmra.mxu0 %v1035_v19 }
 0x3ed   : > { %5731 = vmatprep.mubr.msk.bf16.mxu0 %vm224_vm0, %v1375_v7  ;;  %v1381_v7 = vpop.permute.xlu1 %1380  ;;  %v7685_v39 = vpack.c.bf16 %v1946_v47, %v1945_v10 }
 0x3ef   : > { %v1383_v35 = vpop.permute.xlu0 %1382 }
 0x3f1   : > { %v1385_v23 = vpop.permute.xlu1 %1384 }
 0x3f3   : > { %v1387_v19 = vpop.permute.xlu0 %1386 }
 0x3f4   : > { %5732 = vmatmul.mubr.msk.bf16.vlgmr.msra.gmra.mxu0 %vm224_vm0, %v1377_v59  ;;  %v1973_v59 = vld [vmem:[%s6947_s29 + $0x128] sm:$0xff] }
 0x3f5   : > { %5735 = vmatprep.mubr.msk.bf16.mxu0 %vm224_vm0, %v1379_v60  ;;  %v1389_v45 = vpop.permute.xlu1 %1388  ;;  %v7545_v37 = vpack.c.bf16 %v1974_v12, %v1973_v59  ;;  %v1969_v60 = vld [vmem:[%s6947_s29 + $0xc8] sm:$0xff] }
 0x3f7   : > { %2053 = vrot.lane.b32.xlu0 %v7545_v37, %s6834_s25 }
 0x3fc   : > { %5736 = vmatmul.mubr.msk.bf16.gmra.mxu0 %vm224_vm0, %v1381_v7  ;;  %v1970_v7 = vld [vmem:[%s6947_s29 + $0xe0] sm:$0xff] }
 0x3fd   : > { %5739 = vmatprep.mubr.msk.bf16.mxu0 %vm224_vm0, %v1383_v35  ;;  %v7551_v26 = vpack.c.bf16 %v1970_v7, %v1969_v60 }
 0x3ff   : > { %2049 = vrot.lane.b32.xlu0 %v7551_v26, %s6834_s25 }
 0x404   : > { %5740 = vmatmul.mubr.msk.bf16.gmra.mxu0 %vm224_vm0, %v1385_v23 }
 0x405   : > { %5743 = vmatprep.mubr.msk.bf16.mxu0 %vm224_vm0, %v1387_v19 }
 0x40c   : > { %5744 = vmatmul.mubr.msk.bf16.gmra.mxu0 %vm224_vm0, %v1389_v45 }
 0x440   : > { %v1702_v35 = vpop.permute.xlu0 %1701 }
 0x441   : > { %5747 = vmatprep.subr.bf16.mxu1 %v1702_v35 }
 0x442   : > { %5748 = vmatpush3.bf16.msra.mxu1 %v1702_v35 }
 0x444   : > { %v1700_v23 = vpop.permute.xlu1 %1699 }
 0x445   : > { %5749 = vmatprep.subr.bf16.mxu1 %v1700_v23 }
 0x446   : > { %v1698_v19 = vpop.permute.xlu0 %1697  ;;  %5750 = vmatpush3.bf16.msra.mxu1 %v1700_v23 }
 0x447   : > { %5751 = vmatprep.subr.bf16.mxu1 %v1698_v19 }
 0x44a   : > { %5752 = vmatpush3.bf16.msra.mxu1 %v1698_v19 }
 0x44c   : > { %v1692_v12 = vpop.permute.xlu1 %1691 }
 0x451   : > { %v1696_v45 = vpop.permute.xlu0 %1695  ;;  %v1688_v7 = vpop.permute.xlu1 %1687 }
 0x452   : > { %5753 = vmatprep.subr.bf16.mxu1 %v1696_v45 }
 0x453   : > { %5754 = vmatpush3.bf16.msra.mxu1 %v1696_v45 }
 0x455   : > { %v1694_v59 = vpop.permute.xlu0 %1693 }
 0x456   : > { %5755 = vmatprep.subr.bf16.mxu1 %v1694_v59  ;;  %v7555_v35 = vpop.f32.mrf.mxu0 }
 0x457   : > { %5756 = vmatpush3.bf16.msra.mxu1 %v1694_v59  ;;  %10004 = vst [vmem:[#allocation47_spill] sm:$0xff] %v7555_v35  ;;  %v1965_v35 = vld [vmem:[%s6947_s29 + $0x68] sm:$0xff] }
 0x458   : > { %5757 = vmatprep.subr.bf16.mxu1 %v1692_v12  ;;  %v7557_v23 = vpop.f32.mrf.mxu0 }
 0x459   : > { %v1690_v60 = vpop.permute.xlu0 %1689  ;;  %10005 = vst [vmem:[#allocation48_spill] sm:$0xff] %v7557_v23 }
 0x45a   : > { %v7563_v19 = vpop.f32.mrf.mxu0 }
 0x45b   : > { %5758 = vmatpush3.bf16.msra.mxu1 %v1692_v12  ;;  %10006 = vst [vmem:[#allocation49_spill] sm:$0xff] %v7563_v19 }
 0x45c   : > { %5759 = vmatprep.subr.bf16.mxu1 %v1690_v60  ;;  %v7565_v45 = vpop.f32.mrf.mxu0 }
 0x45d   : > { %v7559_v44 = vpop.permute.xlu0 %2055  ;;  %10007 = vst [vmem:[#allocation50_spill] sm:$0xff] %v7565_v45  ;;  %v1968_v45 = vld [vmem:[%s6947_s29 + $0xb0] sm:$0xff] }
 0x45f   : > { %5760 = vmatpush3.bf16.msra.mxu1 %v1690_v60 }
 0x460   : > { %5761 = vmatprep.subr.bf16.mxu1 %v1688_v7 }
 0x463   : > { %5762 = vmatpush3.bf16.msra.mxu1 %v1688_v7 }
 0x464   : > { %6123 = vmatprep.subr.msk.bf16.mxu1 %vm224_vm0, %v7559_v44 }
 0x491   : > { %v7567_v59 = vpop.f32.mrf.mxu0 }
 0x492   : > { %10008 = vst [vmem:[#allocation51_spill] sm:$0xff] %v7567_v59 }
 0x493   : > { %v7569_v12 = vpop.f32.mrf.mxu0 }
 0x494   : > { %10009 = vst [vmem:[#allocation52_spill] sm:$0xff] %v7569_v12  ;;  %v1967_v12 = vld [vmem:[%s6947_s29 + $0x98] sm:$0xff] }
 0x495   : > { %v7571_v60 = vpop.f32.mrf.mxu0  ;;  %v7635_v4 = vpack.c.bf16 %v1968_v45, %v1967_v12  ;;  %v1963_v12 = vld [vmem:[%s6947_s29 + $0x38] sm:$0xff] }
 0x496   : > { %10010 = vst [vmem:[#allocation53_spill] sm:$0xff] %v7571_v60  ;;  %v7655_v51 = vpack.c.bf16 %v1964_v40, %v1963_v12  ;;  %v1942_v40 = vmul.f32 0.25, %v1926_v34  ;;  %v7667_v12 = vpack.c.bf16 %v1962_v30, %v1961_v42  ;;  %v1943_v30 = vmul.f32 0.25, %v1927_v13 }
 0x497   : > { %v7573_v7 = vpop.f32.mrf.mxu0  ;;  %v1944_v34 = vmul.f32 0.25, %v1928_v6  ;;  %v1947_v42 = vmul.f32 0.25, %v1931_v49 }
 0x498   : > { %10011 = vst [vmem:[#allocation54_spill] sm:$0xff] %v7573_v7  ;;  %v7675_v3 = vpack.c.bf16 %v1942_v40, %v1941_v36 }
 0x499   : > { %v7689_v36 = vpack.c.bf16 %v1944_v34, %v1943_v30  ;;  %v7695_v13 = vpack.c.bf16 %v1948_v27, %v1947_v42 }
 0x4a1   : > { %v7575_v61 = vpop.f32.mrf.mxu0 }
 0x4a2   : > { %10012 = vst [vmem:[#allocation55_spill] sm:$0xff] %v7575_v61 }
 0x4a3   : > { %v7577_v29 = vpop.f32.mrf.mxu0 }
 0x4a4   : > { %10013 = vst [vmem:[#allocation56_spill] sm:$0xff] %v7577_v29  ;;  %v1966_v29 = vld [vmem:[%s6947_s29 + $0x80] sm:$0xff] }
 0x4a5   : > { %v7579_v20 = vpop.f32.mrf.mxu0  ;;  %v7629_v59 = vpack.c.bf16 %v1966_v29, %v1965_v35 }
 0x4a6   : > { %10014 = vst [vmem:[#allocation57_spill] sm:$0xff] %v7579_v20 }
 0x4a7   : > { %v7581_v32 = vpop.f32.mrf.mxu0 }
 0x4a8   : > { %10015 = vst [vmem:[#allocation58_spill] sm:$0xff] %v7581_v32 }
 0x4ac   : > { %v7583_v24 = vpop.f32.mrf.mxu0 }
 0x4ad   : > { %10016 = vst [vmem:[#allocation59_spill] sm:$0xff] %v7583_v24 }
 0x4ae   : > { %v7585_v52 = vpop.f32.mrf.mxu0 }
 0x4af   : > { %10017 = vst [vmem:[#allocation60_spill] sm:$0xff] %v7585_v52 }
 0x4b0   : > { %v7587_v28 = vpop.f32.mrf.mxu0 }
 0x4b1   : > { %10018 = vst [vmem:[#allocation61_spill] sm:$0xff] %v7587_v28 }
 0x4b2   : > { %v7589_v57 = vpop.f32.mrf.mxu0 }
 0x4b3   : > { %10019 = vst [vmem:[#allocation62_spill] sm:$0xff] %v7589_v57 }
 0x4b4   : > { %v7591_v25 = vpop.f32.mrf.mxu0 }
 0x4b5   : > { %1563 = vmax.xlane.f32.xlu1 %v7591_v25 }
 0x4b6   : > { %v7594_v60 = vpop.f32.mrf.mxu0 }
 0x4b7   : > { %1559 = vmax.xlane.f32.xlu0 %v7594_v60 }
 0x4b8   : > { %v7597_v7 = vpop.f32.mrf.mxu0 }
 0x4b9   : > { %1565 = vmax.xlane.f32.xlu1 %v7597_v7 }
 0x4ba   : > { %v7600_v20 = vpop.f32.mrf.mxu0 }
 0x4bc   : > { %v7602_v32 = vpop.f32.mrf.mxu0 }
 0x4bd   : > { %1561 = vmax.xlane.f32.xlu1 %v7600_v20  ;;  %1571 = vmax.xlane.f32.xlu0 %v7602_v32 }
 0x4be   : > { %v7606_v28 = vpop.f32.mrf.mxu0 }
 0x4c0   : > { %v7608_v57 = vpop.f32.mrf.mxu0 }
 0x4c1   : > { %1567 = vmax.xlane.f32.xlu1 %v7606_v28 }
 0x4c2   : > { %v7611_v24 = vpop.f32.mrf.mxu0 }
 0x4c3   : > { %1569 = vmax.xlane.f32.xlu0 %v7611_v24 }
 0x4c4   : > { %v7615_v52 = vpop.f32.mrf.mxu0 }
 0x4c5   : > { %1573 = vmax.xlane.f32.xlu1 %v7608_v57 }
 0x4c6   : > { %v7618_v19 = vpop.f32.mrf.mxu0 }
 0x4c8   : > { %v7621_v61 = vpop.f32.mrf.mxu0 }
 0x4c9   : > { %1579 = vmax.xlane.f32.xlu1 %v7615_v52 }
 0x4ca   : > { %v7626_v23 = vpop.f32.mrf.mxu0 }
 0x4cc   : > { %v7639_v43 = vpop.f32.mrf.mxu0 }
 0x4cd   : > { %1575 = vmax.xlane.f32.xlu1 %v7618_v19 }
 0x4ce   : > { %v7642_v29 = vpop.f32.mrf.mxu0 }
 0x4d0   : > { %v7645_v35 = vpop.f32.mrf.mxu0 }
 0x4d1   : > { %1581 = vmax.xlane.f32.xlu1 %v7621_v61 }
 0x4d2   : > { %v7648_v45 = vpop.f32.mrf.mxu0 }
 0x4d5   : > { %1577 = vmax.xlane.f32.xlu1 %v7626_v23 }
 0x4d9   : > { %2045 = vrot.lane.b32.xlu0 %v7629_v59, %s6834_s25 }
 0x4e6   : > { %2047 = vrot.lane.b32.xlu1 %v7635_v4, %s6834_s25 }
 0x4f8   : > { %1587 = vmax.xlane.f32.xlu0 %v7639_v43 }
 0x4fc   : > { %1583 = vmax.xlane.f32.xlu0 %v7642_v29 }
 0x500   : > { %1589 = vmax.xlane.f32.xlu0 %v7645_v35 }
 0x50a   : > { %1585 = vmax.xlane.f32.xlu1 %v7648_v45 }
 0x516   : > { %2043 = vrot.lane.b32.xlu0 %v7655_v51, %s6834_s25 }
 0x51a   : > { %2017 = vrot.lane.b32.xlu0 %v7665_v33, %s6834_s25 }
 0x51b   : > { %2041 = vrot.lane.b32.xlu1 %v7667_v12, %s6834_s25 }
 0x51e   : > { %2021 = vrot.lane.b32.xlu0 %v7675_v3, %s6834_s25 }
 0x51f   : > { %2019 = vrot.lane.b32.xlu1 %v7679_v38, %s6834_s25 }
 0x522   : > { %2025 = vrot.lane.b32.xlu0 %v7685_v39, %s6834_s25 }
 0x523   : > { %2023 = vrot.lane.b32.xlu1 %v7689_v36, %s6834_s25 }
 0x526   : > { %2029 = vrot.lane.b32.xlu0 %v7393_v31, %s6834_s25  ;;  %v7713_v31 = vpop.permute.xlu0 %2053 }
 0x527   : > { %2027 = vrot.lane.b32.xlu1 %v7695_v13, %s6834_s25 }
 0x52a   : > { %2344 = vrot.lane.b32.xlu0 %v7458_v17, %s6834_s25  ;;  %v7723_v17 = vpop.permute.xlu0 %2049 }
 0x52b   : > { %2031 = vrot.lane.b32.xlu1 %v7373_v18, %s6834_s25  ;;  %v7719_v18 = vpop.permute.xlu1 %2051 }
 0x52e   : > { %2340 = vrot.lane.b32.xlu0 %v7473_v16, %s6834_s25 }
 0x52f   : > { %2342 = vrot.lane.b32.xlu1 %v7467_v54, %s6834_s25 }
 0x532   : > { %2338 = vrot.lane.b32.xlu0 %v7489_v9, %s6834_s25 }
 0x533   : > { %2334 = vrot.lane.b32.xlu1 %v7482_v55, %s6834_s25 }
 0x536   : > { %2336 = vrot.lane.b32.xlu0 %v7507_v63, %s6834_s25 }
 0x537   : > { %2330 = vrot.lane.b32.xlu1 %v7499_v2, %s6834_s25 }
 0x53a   : > { %2332 = vrot.lane.b32.xlu0 %v7523_v15, %s6834_s25 }
 0x53b   : > { %2694 = vrot.lane.b32.xlu1 %v7517_v8, %s6835_s27 }
 0x53e   : > { %v1564_v54 = vpop.xlane.xlu1 %1563  ;;  %2698 = vrot.lane.b32.xlu0 %v7532_v11, %s6835_s27 }
 0x53f   : > { %v1593_v5 = vsub.f32 %v7591_v25, %v1564_v54 }
 0x540   : > { %v1560_v16 = vpop.xlane.xlu0 %1559 }
 0x541   : > { %v1591_v9 = vsub.f32 %v7594_v60, %v1560_v16  ;;  %v1611_v0 = vmul.f32 1.442695, %v1593_v5 }
 0x542   : > { %v1566_v55 = vpop.xlane.xlu1 %1565  ;;  %2696 = vrot.lane.b32.xlu0 %v7545_v37, %s6835_s27 }
 0x543   : > { %v1594_v10 = vsub.f32 %v7597_v7, %v1566_v55  ;;  %v1607_v63 = vmul.f32 1.442695, %v1591_v9 }
 0x545   : > { %v1613_v40 = vmul.f32 1.442695, %v1594_v10  ;;  %6287 = vpow2.f32 %v1607_v63 }
 0x546   : > { %v1562_v6 = vpop.xlane.xlu1 %1561  ;;  %v1572_v2 = vpop.xlane.xlu0 %1571  ;;  %2692 = vrot.lane.b32.xlu0 %v7551_v26, %s6835_s27 }
 0x547   : > { %v1592_v58 = vsub.f32 %v7600_v20, %v1562_v6  ;;  %v1597_v15 = vsub.f32 %v7602_v32, %v1572_v2  ;;  %6289 = vpow2.f32 %v1613_v40 }
 0x549   : > { %v1609_v47 = vmul.f32 1.442695, %v1592_v58  ;;  %v1619_v49 = vmul.f32 1.442695, %v1597_v15 }
 0x54a   : > { %v1568_v30 = vpop.xlane.xlu1 %1567 }
 0x54b   : > { %v1595_v60 = vsub.f32 %v7606_v28, %v1568_v30  ;;  %6291 = vpow2.f32 %v1609_v47 }
 0x54c   : > { %v1570_v34 = vpop.xlane.xlu0 %1569  ;;  %6293 = vpow2.f32 %v1611_v0 }
 0x54d   : > { %v1615_v7 = vmul.f32 1.442695, %v1595_v60  ;;  %v1596_v25 = vsub.f32 %v7611_v24, %v1570_v34 }
 0x54e   : > { %v1574_v50 = vpop.xlane.xlu1 %1573 }
 0x54f   : > { %v1617_v42 = vmul.f32 1.442695, %v1596_v25  ;;  %v1598_v20 = vsub.f32 %v7608_v57, %v1574_v50  ;;  %6295 = vpow2.f32 %v1615_v7  ;;  %v2100_v7 = vsel %vm224_vm0, %v7713_v31, 0 }
 0x551   : > { %6297 = vpow2.f32 %v1617_v42  ;;  %v1621_v27 = vmul.f32 1.442695, %v1598_v20 }
 0x552   : > { %6299 = vpow2.f32 %v1619_v49  ;;  %v1580_v32 = vpop.xlane.xlu1 %1579  ;;  %v7733_v16 = vpop.eup %6287 }
 0x553   : > { %6301 = vpow2.f32 %v1621_v27  ;;  %10020 = vst [vmem:[#allocation63_spill] sm:$0xff] %v7733_v16  ;;  %v1601_v6 = vsub.f32 %v7615_v52, %v1580_v32  ;;  %v2046_v32 = vpop.permute.xlu0 %2045 }
 0x554   : > { %v7735_v28 = vpop.eup %6289 }
 0x555   : > { %10021 = vst [vmem:[#allocation64_spill] sm:$0xff] %v7735_v28  ;;  %v1627_v60 = vmul.f32 1.442695, %v1601_v6 }
 0x556   : > { %v1576_v54 = vpop.xlane.xlu1 %1575 }
 0x557   : > { %v1599_v24 = vsub.f32 %v7618_v19, %v1576_v54  ;;  %v2103_v19 = vsel %vm224_vm0, %v7559_v44, 0 }
 0x558   : > { %v7737_v9 = vpop.eup %6291 }
 0x559   : > { %10022 = vst [vmem:[#allocation65_spill] sm:$0xff] %v7737_v9  ;;  %v7740_v55 = vpop.eup %6293  ;;  %v1671_v57 = vpack.c.bf16 %v7737_v9, %v7733_v16  ;;  %v1623_v2 = vmul.f32 1.442695, %v1599_v24  ;;  %v3216_v16 = vld [vmem:[%s6947_s29 + $0xd8] sm:$0xff] }
 0x55a   : > { %10023 = vst [vmem:[#allocation66_spill] sm:$0xff] %v7740_v55  ;;  %v1582_v10 = vpop.xlane.xlu1 %1581  ;;  %v1672_v63 = vpack.c.bf16 %v7735_v28, %v7740_v55 }
 0x55b   : > { %v1602_v5 = vsub.f32 %v7621_v61, %v1582_v10  ;;  %5763 = vmatprep.mubr.bf16.mxu1 %v1671_v57  ;;  %6303 = vpow2.f32 %v1623_v2  ;;  %v2088_v10 = vsel %vm224_vm0, %v2046_v32, 0 }
 0x55c   : > { %v7748_v40 = vpop.eup %6295  ;;  %5764 = vmatmul.mubr.bf16.vlgmr.msra.gmra.mxu1 %v1672_v63 }
 0x55d   : > { %10024 = vst [vmem:[#allocation67_spill] sm:$0xff] %v7748_v40  ;;  %v1629_v0 = vmul.f32 1.442695, %v1602_v5  ;;  %5780 = vmatpush3.bf16.xpose.msra.mxu1 %v2103_v19 }
 0x55e   : > { %v7752_v58 = vpop.eup %6297  ;;  %v1578_v47 = vpop.xlane.xlu1 %1577  ;;  %6124 = vmatprep.subr.msk.bf16.mxu1 %vm224_vm0, %v7713_v31 }
 0x55f   : > { %10025 = vst [vmem:[#allocation68_spill] sm:$0xff] %v7752_v58  ;;  %v7754_v15 = vpop.eup %6299  ;;  %v1600_v61 = vsub.f32 %v7626_v23, %v1578_v47  ;;  %v1673_v52 = vpack.c.bf16 %v7752_v58, %v7748_v40  ;;  %6305 = vpow2.f32 %v1629_v0  ;;  %v2097_v23 = vsel %vm224_vm0, %v7719_v18, 0  ;;  %v3210_v40 = vld [vmem:[%s6947_s29 + $0x48] sm:$0xff] }
 0x560   : > { %10026 = vst [vmem:[#allocation69_spill] sm:$0xff] %v7754_v15  ;;  %v7761_v30 = vpop.eup %6301  ;;  %v3214_v58 = vld [vmem:[%s6947_s29 + $0xa8] sm:$0xff] }
 0x561   : > { %10027 = vst [vmem:[#allocation70_spill] sm:$0xff] %v7761_v30  ;;  %v1625_v44 = vmul.f32 1.442695, %v1600_v61  ;;  %5767 = vmatprep.mubr.bf16.mxu1 %v1673_v52  ;;  %v1674_v34 = vpack.c.bf16 %v7761_v30, %v7754_v15  ;;  %v3248_v15 = vld [vmem:[%s6947_s29 + $0x20] sm:$0xff]  ;;  %v3213_v30 = vld [vmem:[%s6947_s29 + $0x90] sm:$0xff] }
 0x562   : > { %v2048_v27 = vpop.permute.xlu1 %2047 }
 0x563   : > { %6307 = vpow2.f32 %v1625_v44  ;;  %v2091_v54 = vsel %vm224_vm0, %v2048_v27, 0 }
 0x564   : > { %6309 = vpow2.f32 %v1627_v60  ;;  %5768 = vmatmul.mubr.bf16.gmra.mxu1 %v1674_v34 }
 0x565   : > { %5782 = vmatpush3.bf16.xpose.msra.mxu1 %v2100_v7 }
 0x566   : > { %6125 = vmatprep.subr.msk.bf16.mxu1 %vm224_vm0, %v7719_v18  ;;  %v2094_v18 = vsel %vm224_vm0, %v7723_v17, 0 }
 0x568   : > { %v7771_v25 = vpop.eup %6303 }
 0x569   : > { %10028 = vst [vmem:[#allocation71_spill] sm:$0xff] %v7771_v25 }
 0x56c   : > { %v7773_v49 = vpop.eup %6305 }
 0x56d   : > { %5784 = vmatpush3.bf16.xpose.msra.mxu1 %v2097_v23  ;;  %10029 = vst [vmem:[#allocation72_spill] sm:$0xff] %v7773_v49 }
 0x56e   : > { %6126 = vmatprep.subr.msk.bf16.mxu1 %vm224_vm0, %v7723_v17 }
 0x570   : > { %v7777_v50 = vpop.eup %6307 }
 0x571   : > { %10030 = vst [vmem:[#allocation73_spill] sm:$0xff] %v7777_v50  ;;  %v7779_v42 = vpop.eup %6309  ;;  %v1675_v31 = vpack.c.bf16 %v7777_v50, %v7771_v25  ;;  %v3211_v25 = vld [vmem:[%s6947_s29 + $0x60] sm:$0xff] }
 0x572   : > { %10031 = vst [vmem:[#allocation74_spill] sm:$0xff] %v7779_v42  ;;  %v1676_v20 = vpack.c.bf16 %v7773_v49, %v7779_v42  ;;  %v3227_v55 = vmul.f32 0.25, %v3211_v25  ;;  %v3215_v50 = vld [vmem:[%s6947_s29 + $0xc0] sm:$0xff] }
 0x573   : > { %5771 = vmatprep.mubr.bf16.mxu1 %v1675_v31  ;;  %v3231_v9 = vmul.f32 0.25, %v3215_v50 }
 0x574   : > { %5772 = vmatmul.mubr.bf16.gmra.mxu1 %v1676_v20 }
 0x575   : > { %5786 = vmatpush3.bf16.xpose.msra.mxu1 %v2094_v18 }
 0x576   : > { %6127 = vmatprep.subr.msk.bf16.mxu1 %vm224_vm0, %v2048_v27 }
 0x57d   : > { %5788 = vmatpush3.bf16.xpose.msra.mxu1 %v2091_v54 }
 0x57e   : > { %6128 = vmatprep.subr.msk.bf16.mxu1 %vm224_vm0, %v2046_v32 }
 0x581   : > { %v1588_v24 = vpop.xlane.xlu0 %1587 }
 0x582   : > { %v1605_v19 = vsub.f32 %v7639_v43, %v1588_v24 }
 0x584   : > { %v1635_v60 = vmul.f32 1.442695, %v1605_v19 }
 0x585   : > { %v1584_v57 = vpop.xlane.xlu0 %1583  ;;  %5790 = vmatpush3.bf16.xpose.msra.mxu1 %v2088_v10 }
 0x586   : > { %v1603_v6 = vsub.f32 %v7642_v29, %v1584_v57 }
 0x588   : > { %v1631_v0 = vmul.f32 1.442695, %v1603_v6 }
 0x589   : > { %v1590_v5 = vpop.xlane.xlu0 %1589 }
 0x58a   : > { %v1606_v2 = vsub.f32 %v7645_v35, %v1590_v5  ;;  %6311 = vpow2.f32 %v1631_v0 }
 0x58c   : > { %v1637_v47 = vmul.f32 1.442695, %v1606_v2 }
 0x58d   : > { %v2044_v63 = vpop.permute.xlu0 %2043 }
 0x58e   : > { %6129 = vmatprep.subr.msk.bf16.mxu1 %vm224_vm0, %v2044_v63  ;;  %v2085_v17 = vsel %vm224_vm0, %v2044_v63, 0  ;;  %6313 = vpow2.f32 %v1637_v47 }
 0x58f   : > { %5792 = vmatpush3.bf16.xpose.msra.mxu1 %v2085_v17 }
 0x591   : > { %v2018_v20 = vpop.permute.xlu0 %2017 }
 0x593   : > { %v1586_v61 = vpop.xlane.xlu1 %1585 }
 0x594   : > { %v1604_v52 = vsub.f32 %v7648_v45, %v1586_v61 }
 0x595   : > { %v2022_v27 = vpop.permute.xlu0 %2021 }
 0x596   : > { %v1633_v44 = vmul.f32 1.442695, %v1604_v52 }
 0x597   : > { %v2042_v34 = vpop.permute.xlu1 %2041  ;;  %v7799_v35 = vpop.eup %6311 }
 0x598   : > { %6315 = vpow2.f32 %v1633_v44  ;;  %6130 = vmatprep.subr.msk.bf16.mxu1 %vm224_vm0, %v2042_v34  ;;  %v2082_v29 = vsel %vm224_vm0, %v2042_v34, 0  ;;  %10032 = vst [vmem:[#allocation75_spill] sm:$0xff] %v7799_v35 }
 0x599   : > { %6317 = vpow2.f32 %v1635_v60  ;;  %5794 = vmatpush3.bf16.xpose.msra.mxu1 %v2082_v29  ;;  %v2026_v54 = vpop.permute.xlu0 %2025 }
 0x59b   : > { %v7801_v43 = vpop.eup %6313  ;;  %v2020_v18 = vpop.permute.xlu1 %2019 }
 0x59c   : > { %10033 = vst [vmem:[#allocation76_spill] sm:$0xff] %v7801_v43 }
 0x59d   : > { %v2030_v10 = vpop.permute.xlu0 %2029 }
 0x59f   : > { %v2024_v32 = vpop.permute.xlu1 %2023 }
 0x5a1   : > { %v2345_v5 = vpop.permute.xlu0 %2344 }
 0x5a2   : > { %5811 = vmatprep.subr.bf16.mxu0 %v2345_v5 }
 0x5a3   : > { %v2028_v24 = vpop.permute.xlu1 %2027  ;;  %5812 = vmatpush3.bf16.msra.mxu0 %v2345_v5 }
 0x5a5   : > { %v7803_v7 = vpop.eup %6315  ;;  %v2341_v8 = vpop.permute.xlu0 %2340 }
 0x5a6   : > { %10034 = vst [vmem:[#allocation77_spill] sm:$0xff] %v7803_v7  ;;  %v7805_v23 = vpop.eup %6317  ;;  %v1677_v45 = vpack.c.bf16 %v7803_v7, %v7799_v35  ;;  %v3209_v7 = vld [vmem:[%s6947_s29 + $0x30] sm:$0xff] }
 0x5a7   : > { %10035 = vst [vmem:[#allocation78_spill] sm:$0xff] %v7805_v23  ;;  %v1678_v31 = vpack.c.bf16 %v7801_v43, %v7805_v23  ;;  %v2032_v57 = vpop.permute.xlu1 %2031  ;;  %v3207_v23 = vld [vmem:[%s6947_s29] sm:$0xff]  ;;  %v3212_v43 = vld [vmem:[%s6947_s29 + $0x78] sm:$0xff] }
 0x5a8   : > { %5775 = vmatprep.mubr.bf16.mxu1 %v1677_v45 }
 0x5a9   : > { %5776 = vmatmul.mubr.bf16.gmra.mxu1 %v1678_v31  ;;  %v2339_v63 = vpop.permute.xlu0 %2338 }
 0x5aa   : > { %5795 = vmatprep.mubr.msk.bf16.mxu1 %vm224_vm0, %v2018_v20 }
 0x5ab   : > { %v2343_v11 = vpop.permute.xlu1 %2342 }
 0x5ac   : > { %5813 = vmatprep.subr.bf16.mxu0 %v2343_v11 }
 0x5ad   : > { %5814 = vmatpush3.bf16.msra.mxu0 %v2343_v11  ;;  %v2337_v37 = vpop.permute.xlu0 %2336 }
 0x5ae   : > { %5815 = vmatprep.subr.bf16.mxu0 %v2341_v8 }
 0x5af   : > { %v2335_v6 = vpop.permute.xlu1 %2334 }
 0x5b1   : > { %5796 = vmatmul.mubr.msk.bf16.vlgmr.msra.gmra.mxu1 %vm224_vm0, %v2020_v18  ;;  %5816 = vmatpush3.bf16.msra.mxu0 %v2341_v8  ;;  %v2333_v26 = vpop.permute.xlu0 %2332 }
 0x5b2   : > { %5799 = vmatprep.mubr.msk.bf16.mxu1 %vm224_vm0, %v2022_v27  ;;  %5817 = vmatprep.subr.bf16.mxu0 %v2339_v63 }
 0x5b3   : > { %v2331_v17 = vpop.permute.xlu1 %2330 }
 0x5b5   : > { %5818 = vmatpush3.bf16.msra.mxu0 %v2339_v63  ;;  %v7833_v47 = vpop.permute.xlu0 %2698 }
 0x5b6   : > { %5819 = vmatprep.subr.bf16.mxu0 %v2337_v37 }
 0x5b9   : > { %5800 = vmatmul.mubr.msk.bf16.gmra.mxu1 %vm224_vm0, %v2024_v32  ;;  %5820 = vmatpush3.bf16.msra.mxu0 %v2337_v37 }
 0x5ba   : > { %5803 = vmatprep.mubr.msk.bf16.mxu1 %vm224_vm0, %v2026_v54  ;;  %5821 = vmatprep.subr.bf16.mxu0 %v2335_v6 }
 0x5bd   : > { %5822 = vmatpush3.bf16.msra.mxu0 %v2335_v6 }
 0x5be   : > { %5823 = vmatprep.subr.bf16.mxu0 %v2333_v26 }
 0x5c1   : > { %5804 = vmatmul.mubr.msk.bf16.gmra.mxu1 %vm224_vm0, %v2028_v24  ;;  %5824 = vmatpush3.bf16.msra.mxu0 %v2333_v26 }
 0x5c2   : > { %5807 = vmatprep.mubr.msk.bf16.mxu1 %vm224_vm0, %v2030_v10  ;;  %5825 = vmatprep.subr.bf16.mxu0 %v2331_v17 }
 0x5c5   : > { %5826 = vmatpush3.bf16.msra.mxu0 %v2331_v17 }
 0x5c6   : > { %6131 = vmatprep.subr.msk.bf16.mxu0 %vm224_vm0, %v7833_v47 }
 0x5c9   : > { %5808 = vmatmul.mubr.msk.bf16.gmra.mxu1 %vm224_vm0, %v2032_v57 }
 0x61c   : > { %v7827_v2 = vpop.f32.mrf.mxu1 }
 0x61d   : > { %10036 = vst [vmem:[#allocation79_spill] sm:$0xff] %v7827_v2 }
 0x61e   : > { %v7829_v19 = vpop.f32.mrf.mxu1 }
 0x61f   : > { %10037 = vst [vmem:[#allocation80_spill] sm:$0xff] %v7829_v19 }
 0x620   : > { %v7831_v0 = vpop.f32.mrf.mxu1 }
 0x621   : > { %10038 = vst [vmem:[#allocation81_spill] sm:$0xff] %v7831_v0 }
 0x622   : > { %v7837_v61 = vpop.f32.mrf.mxu1 }
 0x623   : > { %10039 = vst [vmem:[#allocation82_spill] sm:$0xff] %v7837_v61 }
 0x624   : > { %v7839_v52 = vpop.f32.mrf.mxu1 }
 0x625   : > { %10040 = vst [vmem:[#allocation83_spill] sm:$0xff] %v7839_v52  ;;  %v2578_v52 = vld [vmem:[%s6947_s29 + $0x150] sm:$0xff] }
 0x626   : > { %v7841_v60 = vpop.f32.mrf.mxu1 }
 0x627   : > { %10041 = vst [vmem:[#allocation84_spill] sm:$0xff] %v7841_v60 }
 0x628   : > { %v7843_v44 = vpop.f32.mrf.mxu1 }
 0x629   : > { %10042 = vst [vmem:[#allocation85_spill] sm:$0xff] %v7843_v44 }
 0x62a   : > { %v7845_v34 = vpop.f32.mrf.mxu1 }
 0x62b   : > { %10043 = vst [vmem:[#allocation86_spill] sm:$0xff] %v7845_v34 }
 0x634   : > { %v7847_v29 = vpop.f32.mrf.mxu1 }
 0x635   : > { %10044 = vst [vmem:[#allocation87_spill] sm:$0xff] %v7847_v29 }
 0x636   : > { %v7849_v45 = vpop.f32.mrf.mxu1 }
 0x637   : > { %10045 = vst [vmem:[#allocation88_spill] sm:$0xff] %v7849_v45 }
 0x638   : > { %v7851_v31 = vpop.f32.mrf.mxu1 }
 0x639   : > { %10046 = vst [vmem:[#allocation89_spill] sm:$0xff] %v7851_v31 }
 0x63a   : > { %v7853_v20 = vpop.f32.mrf.mxu1 }
 0x63b   : > { %10047 = vst [vmem:[#allocation90_spill] sm:$0xff] %v7853_v20  ;;  %v2579_v20 = vld [vmem:[%s6947_s29 + $0x168] sm:$0xff] }
 0x669   : > { %v7855_v18 = vpop.f32.mrf.mxu1 }
 0x66a   : > { %10048 = vst [vmem:[#allocation91_spill] sm:$0xff] %v7855_v18 }
 0x66b   : > { %v7857_v27 = vpop.f32.mrf.mxu1 }
 0x66c   : > { %10049 = vst [vmem:[#allocation92_spill] sm:$0xff] %v7857_v27 }
 0x66d   : > { %v7859_v32 = vpop.f32.mrf.mxu1 }
 0x66e   : > { %10050 = vst [vmem:[#allocation93_spill] sm:$0xff] %v7859_v32 }
 0x66f   : > { %v7861_v54 = vpop.f32.mrf.mxu1 }
 0x670   : > { %10051 = vst [vmem:[#allocation94_spill] sm:$0xff] %v7861_v54 }
 0x671   : > { %v7863_v24 = vpop.f32.mrf.mxu1 }
 0x672   : > { %2206 = vmax.xlane.f32.xlu1 %v7863_v24 }
 0x673   : > { %v2139_v10 = vpop.f32.mrf.mxu1 }
 0x674   : > { %2202 = vmax.xlane.f32.xlu0 %v2139_v10 }
 0x675   : > { %v5798_v57 = vpop.f32.mrf.mxu1 }
 0x676   : > { %2208 = vmax.xlane.f32.xlu1 %v5798_v57 }
 0x677   : > { %v7866_v5 = vpop.f32.mrf.mxu1 }
 0x679   : > { %v7868_v11 = vpop.f32.mrf.mxu1 }
 0x67a   : > { %2204 = vmax.xlane.f32.xlu1 %v7866_v5  ;;  %2214 = vmax.xlane.f32.xlu0 %v7868_v11 }
 0x67b   : > { %v7872_v8 = vpop.f32.mrf.mxu1 }
 0x67d   : > { %v7874_v63 = vpop.f32.mrf.mxu1 }
 0x67e   : > { %2210 = vmax.xlane.f32.xlu1 %v7872_v8 }
 0x67f   : > { %v7877_v37 = vpop.f32.mrf.mxu1 }
 0x680   : > { %2212 = vmax.xlane.f32.xlu0 %v7877_v37 }
 0x681   : > { %v7881_v6 = vpop.f32.mrf.mxu1 }
 0x682   : > { %2216 = vmax.xlane.f32.xlu1 %v7874_v63 }
 0x683   : > { %v7884_v26 = vpop.f32.mrf.mxu1 }
 0x685   : > { %v7887_v17 = vpop.f32.mrf.mxu1 }
 0x686   : > { %2222 = vmax.xlane.f32.xlu1 %v7881_v6 }
 0x687   : > { %v7890_v18 = vpop.f32.mrf.mxu1 }
 0x689   : > { %v7897_v27 = vpop.f32.mrf.mxu1 }
 0x68a   : > { %2218 = vmax.xlane.f32.xlu1 %v7884_v26 }
 0x68b   : > { %v7900_v32 = vpop.f32.mrf.mxu1 }
 0x68d   : > { %v7903_v29 = vpop.f32.mrf.mxu1 }
 0x68e   : > { %2224 = vmax.xlane.f32.xlu1 %v7887_v17 }
 0x68f   : > { %v7906_v54 = vpop.f32.mrf.mxu1 }
 0x692   : > { %2220 = vmax.xlane.f32.xlu1 %v7890_v18 }
 0x696   : > { %2688 = vrot.lane.b32.xlu0 %v7629_v59, %s6835_s27  ;;  %v2577_v59 = vld [vmem:[%s6947_s29 + $0x138] sm:$0xff] }
 0x697   : > { %v2593_v31 = vmul.f32 0.25, %v2577_v59 }
 0x6a3   : > { %2690 = vrot.lane.b32.xlu1 %v7635_v4, %s6835_s27  ;;  %v2576_v4 = vld [vmem:[%s6947_s29 + $0x120] sm:$0xff] }
 0x6a4   : > { %v2592_v45 = vmul.f32 0.25, %v2576_v4 }
 0x6b5   : > { %2230 = vmax.xlane.f32.xlu0 %v7897_v27 }
 0x6b9   : > { %2226 = vmax.xlane.f32.xlu0 %v7900_v32 }
 0x6bd   : > { %2232 = vmax.xlane.f32.xlu0 %v7903_v29 }
 0x6c7   : > { %2228 = vmax.xlane.f32.xlu1 %v7906_v54 }
 0x6d3   : > { %2686 = vrot.lane.b32.xlu0 %v7655_v51, %s6835_s27  ;;  %v7925_v51 = vpack.c.bf16 %v2593_v31, %v2592_v45 }
 0x6d7   : > { %2660 = vrot.lane.b32.xlu0 %v7665_v33, %s6835_s27  ;;  %v2594_v33 = vmul.f32 0.25, %v2578_v52 }
 0x6d8   : > { %2684 = vrot.lane.b32.xlu1 %v7667_v12, %s6835_s27  ;;  %v2595_v12 = vmul.f32 0.25, %v2579_v20 }
 0x6db   : > { %2664 = vrot.lane.b32.xlu0 %v7675_v3, %s6835_s27  ;;  %v7933_v3 = vpack.c.bf16 %v2595_v12, %v2594_v33 }
 0x6dc   : > { %2662 = vrot.lane.b32.xlu1 %v7679_v38, %s6835_s27  ;;  %v7937_v38 = vpop.permute.xlu0 %2696 }
 0x6df   : > { %2668 = vrot.lane.b32.xlu0 %v7685_v39, %s6835_s27  ;;  %v7939_v39 = vpop.permute.xlu1 %2694 }
 0x6e0   : > { %2666 = vrot.lane.b32.xlu1 %v7689_v36, %s6835_s27  ;;  %v7941_v45 = vpop.permute.xlu0 %2692 }
 0x6e3   : > { %2672 = vrot.lane.b32.xlu0 %v7925_v51, %s6835_s27 }
 0x6e4   : > { %2670 = vrot.lane.b32.xlu1 %v7695_v13, %s6835_s27 }
 0x6e8   : > { %2674 = vrot.lane.b32.xlu1 %v7933_v3, %s6835_s27 }
 0x6fb   : > { %v2207_v36 = vpop.xlane.xlu1 %2206 }
 0x6fc   : > { %v2236_v59 = vsub.f32 %v7863_v24, %v2207_v36 }
 0x6fd   : > { %v2203_v52 = vpop.xlane.xlu0 %2202 }
 0x6fe   : > { %v2234_v31 = vsub.f32 %v2139_v10, %v2203_v52  ;;  %v2254_v2 = vmul.f32 1.442695, %v2236_v59 }
 0x6ff   : > { %v2209_v20 = vpop.xlane.xlu1 %2208 }
 0x700   : > { %v2237_v4 = vsub.f32 %v5798_v57, %v2209_v20  ;;  %v2250_v60 = vmul.f32 1.442695, %v2234_v31 }
 0x702   : > { %v2256_v33 = vmul.f32 1.442695, %v2237_v4  ;;  %6319 = vpow2.f32 %v2250_v60 }
 0x703   : > { %v2205_v13 = vpop.xlane.xlu1 %2204  ;;  %v2215_v12 = vpop.xlane.xlu0 %2214 }
 0x704   : > { %v2235_v44 = vsub.f32 %v7866_v5, %v2205_v13  ;;  %v2240_v0 = vsub.f32 %v7868_v11, %v2215_v12  ;;  %6321 = vpow2.f32 %v2256_v33 }
 0x706   : > { %v2252_v34 = vmul.f32 1.442695, %v2235_v44  ;;  %v2262_v36 = vmul.f32 1.442695, %v2240_v0 }
 0x707   : > { %v2211_v61 = vpop.xlane.xlu1 %2210 }
 0x708   : > { %v2238_v19 = vsub.f32 %v7872_v8, %v2211_v61  ;;  %6323 = vpow2.f32 %v2252_v34 }
 0x709   : > { %v2213_v10 = vpop.xlane.xlu0 %2212  ;;  %6325 = vpow2.f32 %v2254_v2 }
 0x70a   : > { %v2258_v57 = vmul.f32 1.442695, %v2238_v19  ;;  %v2239_v24 = vsub.f32 %v7877_v37, %v2213_v10 }
 0x70b   : > { %v2217_v52 = vpop.xlane.xlu1 %2216 }
 0x70c   : > { %v2260_v31 = vmul.f32 1.442695, %v2239_v24  ;;  %v2241_v5 = vsub.f32 %v7874_v63, %v2217_v52  ;;  %6327 = vpow2.f32 %v2258_v57 }
 0x70e   : > { %6329 = vpow2.f32 %v2260_v31  ;;  %v2264_v60 = vmul.f32 1.442695, %v2241_v5  ;;  %v2743_v31 = vsel %vm224_vm0, %v7937_v38, 0 }
 0x70f   : > { %6331 = vpow2.f32 %v2262_v36  ;;  %v2223_v44 = vpop.xlane.xlu1 %2222  ;;  %v7949_v20 = vpop.eup %6319 }
 0x710   : > { %6333 = vpow2.f32 %v2264_v60  ;;  %10052 = vst [vmem:[#allocation95_spill] sm:$0xff] %v7949_v20  ;;  %v2244_v4 = vsub.f32 %v7881_v6, %v2223_v44 }
 0x711   : > { %v7951_v61 = vpop.eup %6321 }
 0x712   : > { %10053 = vst [vmem:[#allocation96_spill] sm:$0xff] %v7951_v61  ;;  %v2270_v36 = vmul.f32 1.442695, %v2244_v4 }
 0x713   : > { %v2219_v11 = vpop.xlane.xlu1 %2218 }
 0x714   : > { %v2242_v19 = vsub.f32 %v7884_v26, %v2219_v11  ;;  %v2746_v26 = vsel %vm224_vm0, %v7833_v47, 0 }
 0x715   : > { %v7953_v2 = vpop.eup %6323 }
 0x716   : > { %10054 = vst [vmem:[#allocation97_spill] sm:$0xff] %v7953_v2  ;;  %v7956_v0 = vpop.eup %6325  ;;  %v2314_v8 = vpack.c.bf16 %v7953_v2, %v7949_v20  ;;  %v2266_v13 = vmul.f32 1.442695, %v2242_v19  ;;  %v3247_v2 = vld [vmem:[%s6947_s29 + $0x8] sm:$0xff] }
 0x717   : > { %10055 = vst [vmem:[#allocation98_spill] sm:$0xff] %v7956_v0  ;;  %v2225_v34 = vpop.xlane.xlu1 %2224  ;;  %v2315_v37 = vpack.c.bf16 %v7951_v61, %v7956_v0  ;;  %v3254_v0 = vld [vmem:[%s6947_s29 + $0xb0] sm:$0xff]  ;;  %v3223_v61 = vmul.f32 0.25, %v3207_v23  ;;  %v3225_v23 = vmul.f32 0.25, %v3209_v7 }
 0x718   : > { %v2245_v63 = vsub.f32 %v7887_v17, %v2225_v34  ;;  %5827 = vmatprep.mubr.bf16.mxu0 %v2314_v8  ;;  %6335 = vpow2.f32 %v2266_v13  ;;  %v2689_v8 = vpop.permute.xlu0 %2688  ;;  %v3217_v7 = vld [vmem:[%s6947_s29 + $0xf0] sm:$0xff] }
 0x719   : > { %v7964_v59 = vpop.eup %6327  ;;  %5828 = vmatmul.mubr.bf16.vlgmr.msra.gmra.mxu0 %v2315_v37  ;;  %v2731_v4 = vsel %vm224_vm0, %v2689_v8, 0 }
 0x71a   : > { %10056 = vst [vmem:[#allocation99_spill] sm:$0xff] %v7964_v59  ;;  %v2272_v12 = vmul.f32 1.442695, %v2245_v63  ;;  %5844 = vmatpush3.bf16.xpose.msra.mxu0 %v2746_v26 }
 0x71b   : > { %v7968_v33 = vpop.eup %6329  ;;  %v2221_v10 = vpop.xlane.xlu1 %2220  ;;  %6132 = vmatprep.subr.msk.bf16.mxu0 %vm224_vm0, %v7937_v38 }
 0x71c   : > { %10057 = vst [vmem:[#allocation100_spill] sm:$0xff] %v7968_v33  ;;  %v7970_v57 = vpop.eup %6331  ;;  %v2243_v6 = vsub.f32 %v7890_v18, %v2221_v10  ;;  %v2316_v17 = vpack.c.bf16 %v7968_v33, %v7964_v59  ;;  %6337 = vpow2.f32 %v2272_v12  ;;  %v2740_v18 = vsel %vm224_vm0, %v7939_v39, 0  ;;  %v3208_v33 = vld [vmem:[%s6947_s29 + $0x18] sm:$0xff] }
 0x71d   : > { %10058 = vst [vmem:[#allocation101_spill] sm:$0xff] %v7970_v57  ;;  %v7977_v24 = vpop.eup %6333  ;;  %v3224_v42 = vmul.f32 0.25, %v3208_v33  ;;  %v3226_v33 = vmul.f32 0.25, %v3210_v40  ;;  %v3218_v40 = vld [vmem:[%s6947_s29 + $0x108] sm:$0xff] }
 0x71e   : > { %10059 = vst [vmem:[#allocation102_spill] sm:$0xff] %v7977_v24  ;;  %v2268_v47 = vmul.f32 1.442695, %v2243_v6  ;;  %5831 = vmatprep.mubr.bf16.mxu0 %v2316_v17  ;;  %v2317_v52 = vpack.c.bf16 %v7977_v24, %v7970_v57  ;;  %v3252_v57 = vld [vmem:[%s6947_s29 + $0x80] sm:$0xff]  ;;  %v3250_v24 = vld [vmem:[%s6947_s29 + $0x50] sm:$0xff]  ;;  %v3234_v50 = vmul.f32 0.25, %v3218_v40 }
 0x71f   : > { %v2691_v34 = vpop.permute.xlu1 %2690  ;;  %v8217_v49 = vpack.c.bf16 %v3224_v42, %v3223_v61  ;;  %v3232_v42 = vmul.f32 0.25, %v3216_v16  ;;  %v8231_v25 = vpack.c.bf16 %v3226_v33, %v3225_v23  ;;  %v3233_v16 = vmul.f32 0.25, %v3217_v7 }
 0x720   : > { %6339 = vpow2.f32 %v2268_v47  ;;  %v2734_v63 = vsel %vm224_vm0, %v2691_v34, 0 }
 0x721   : > { %6341 = vpow2.f32 %v2270_v36  ;;  %5832 = vmatmul.mubr.bf16.gmra.mxu0 %v2317_v52  ;;  %v8237_v61 = vpack.c.bf16 %v3232_v42, %v3231_v9 }
 0x722   : > { %5846 = vmatpush3.bf16.xpose.msra.mxu0 %v2743_v31 }
 0x723   : > { %6133 = vmatprep.subr.msk.bf16.mxu0 %vm224_vm0, %v7939_v39  ;;  %v2737_v39 = vsel %vm224_vm0, %v7941_v45, 0 }
 0x725   : > { %v7987_v5 = vpop.eup %6335 }
 0x726   : > { %10060 = vst [vmem:[#allocation103_spill] sm:$0xff] %v7987_v5 }
 0x729   : > { %v7989_v60 = vpop.eup %6337 }
 0x72a   : > { %5848 = vmatpush3.bf16.xpose.msra.mxu0 %v2740_v18  ;;  %10061 = vst [vmem:[#allocation104_spill] sm:$0xff] %v7989_v60 }
 0x72b   : > { %6134 = vmatprep.subr.msk.bf16.mxu0 %vm224_vm0, %v7941_v45 }
 0x72d   : > { %v7993_v44 = vpop.eup %6339 }
 0x72e   : > { %10062 = vst [vmem:[#allocation105_spill] sm:$0xff] %v7993_v44  ;;  %v7995_v11 = vpop.eup %6341  ;;  %v2318_v38 = vpack.c.bf16 %v7993_v44, %v7987_v5 }
 0x72f   : > { %10063 = vst [vmem:[#allocation106_spill] sm:$0xff] %v7995_v11  ;;  %v2319_v19 = vpack.c.bf16 %v7989_v60, %v7995_v11  ;;  %v3253_v60 = vld [vmem:[%s6947_s29 + $0x98] sm:$0xff] }
 0x730   : > { %5835 = vmatprep.mubr.bf16.mxu0 %v2318_v38  ;;  %v8187_v44 = vpack.c.bf16 %v3254_v0, %v3253_v60  ;;  %v3249_v60 = vld [vmem:[%s6947_s29 + $0x38] sm:$0xff] }
 0x731   : > { %5836 = vmatmul.mubr.bf16.gmra.mxu0 %v2319_v19  ;;  %v8207_v35 = vpack.c.bf16 %v3250_v24, %v3249_v60  ;;  %v3228_v24 = vmul.f32 0.25, %v3212_v43  ;;  %v8219_v60 = vpack.c.bf16 %v3248_v15, %v3247_v2  ;;  %v3229_v15 = vmul.f32 0.25, %v3213_v30 }
 0x732   : > { %5850 = vmatpush3.bf16.xpose.msra.mxu0 %v2737_v39  ;;  %v3230_v43 = vmul.f32 0.25, %v3214_v58  ;;  %v8247_v58 = vpack.c.bf16 %v3234_v50, %v3233_v16 }
 0x733   : > { %6135 = vmatprep.subr.msk.bf16.mxu0 %vm224_vm0, %v2691_v34  ;;  %v8227_v28 = vpack.c.bf16 %v3228_v24, %v3227_v55 }
 0x734   : > { %v8241_v55 = vpack.c.bf16 %v3230_v43, %v3229_v15 }
 0x73a   : > { %5852 = vmatpush3.bf16.xpose.msra.mxu0 %v2734_v63 }
 0x73b   : > { %6136 = vmatprep.subr.msk.bf16.mxu0 %vm224_vm0, %v2689_v8 }
 0x73e   : > { %v2231_v37 = vpop.xlane.xlu0 %2230 }
 0x73f   : > { %v2248_v17 = vsub.f32 %v7897_v27, %v2231_v37  ;;  %v2642_v37 = vld [vmem:[%s6947_s29 + $0x160] sm:$0xff] }
 0x741   : > { %v2278_v18 = vmul.f32 1.442695, %v2248_v17  ;;  %v2638_v17 = vld [vmem:[%s6947_s29 + $0x100] sm:$0xff] }
 0x742   : > { %v2227_v13 = vpop.xlane.xlu0 %2226  ;;  %5854 = vmatpush3.bf16.xpose.msra.mxu0 %v2731_v4  ;;  %v2643_v4 = vld [vmem:[%s6947_s29 + $0x178] sm:$0xff] }
 0x743   : > { %v2246_v10 = vsub.f32 %v7900_v32, %v2227_v13  ;;  %v2640_v13 = vld [vmem:[%s6947_s29 + $0x130] sm:$0xff] }
 0x745   : > { %v2274_v36 = vmul.f32 1.442695, %v2246_v10 }
 0x746   : > { %v2233_v26 = vpop.xlane.xlu0 %2232 }
 0x747   : > { %v2249_v6 = vsub.f32 %v7903_v29, %v2233_v26  ;;  %6343 = vpow2.f32 %v2274_v36  ;;  %v8031_v26 = vpack.c.bf16 %v2643_v4, %v2642_v37  ;;  %v2639_v36 = vld [vmem:[%s6947_s29 + $0x118] sm:$0xff]  ;;  %v2633_v37 = vld [vmem:[%s6947_s29 + $0x88] sm:$0xff]  ;;  %v2630_v4 = vld [vmem:[%s6947_s29 + $0x40] sm:$0xff] }
 0x749   : > { %v2280_v47 = vmul.f32 1.442695, %v2249_v6  ;;  %2987 = vrot.lane.b32.xlu0 %v8031_v26, %s6835_s27 }
 0x74a   : > { %v2687_v12 = vpop.permute.xlu0 %2686 }
 0x74b   : > { %6137 = vmatprep.subr.msk.bf16.mxu0 %vm224_vm0, %v2687_v12  ;;  %v2728_v45 = vsel %vm224_vm0, %v2687_v12, 0  ;;  %6345 = vpow2.f32 %v2280_v47  ;;  %v2641_v12 = vld [vmem:[%s6947_s29 + $0x148] sm:$0xff]  ;;  %v8044_v47 = vpack.c.bf16 %v2639_v36, %v2638_v17 }
 0x74c   : > { %5856 = vmatpush3.bf16.xpose.msra.mxu0 %v2728_v45  ;;  %v8034_v10 = vpack.c.bf16 %v2641_v12, %v2640_v13  ;;  %v2631_v12 = vld [vmem:[%s6947_s29 + $0x58] sm:$0xff] }
 0x74d   : > { %2983 = vrot.lane.b32.xlu0 %v8044_v47, %s6835_s27 }
 0x74e   : > { %v2661_v63 = vpop.permute.xlu0 %2660  ;;  %2985 = vrot.lane.b32.xlu1 %v8034_v10, %s6835_s27 }
 0x750   : > { %v2229_v52 = vpop.xlane.xlu1 %2228 }
 0x751   : > { %v2247_v31 = vsub.f32 %v7906_v54, %v2229_v52 }
 0x752   : > { %v2665_v6 = vpop.permute.xlu0 %2664 }
 0x753   : > { %v2276_v38 = vmul.f32 1.442695, %v2247_v31 }
 0x754   : > { %v2685_v19 = vpop.permute.xlu1 %2684  ;;  %v8015_v27 = vpop.eup %6343 }
 0x755   : > { %6347 = vpow2.f32 %v2276_v38  ;;  %6138 = vmatprep.subr.msk.bf16.mxu0 %vm224_vm0, %v2685_v19  ;;  %v2725_v29 = vsel %vm224_vm0, %v2685_v19, 0  ;;  %10064 = vst [vmem:[#allocation107_spill] sm:$0xff] %v8015_v27  ;;  %v2637_v38 = vld [vmem:[%s6947_s29 + $0xe8] sm:$0xff] }
 0x756   : > { %6349 = vpow2.f32 %v2278_v18  ;;  %5858 = vmatpush3.bf16.xpose.msra.mxu0 %v2725_v29  ;;  %v2669_v31 = vpop.permute.xlu0 %2668  ;;  %v2636_v18 = vld [vmem:[%s6947_s29 + $0xd0] sm:$0xff]  ;;  %v2634_v29 = vld [vmem:[%s6947_s29 + $0xa0] sm:$0xff] }
 0x757   : > { %v8051_v19 = vpack.c.bf16 %v2637_v38, %v2636_v18  ;;  %v3257_v18 = vld [vmem:[%s6947_s29 + $0xf8] sm:$0xff]  ;;  %v3258_v38 = vld [vmem:[%s6947_s29 + $0x110] sm:$0xff] }
 0x758   : > { %v8017_v32 = vpop.eup %6345  ;;  %v2663_v45 = vpop.permute.xlu1 %2662 }
 0x759   : > { %10065 = vst [vmem:[#allocation108_spill] sm:$0xff] %v8017_v32  ;;  %2981 = vrot.lane.b32.xlu0 %v8051_v19, %s6835_s27 }
 0x75c   : > { %v2667_v52 = vpop.permute.xlu1 %2666 }
 0x760   : > { %v2671_v17 = vpop.permute.xlu1 %2670 }
 0x762   : > { %v8019_v54 = vpop.eup %6347 }
 0x763   : > { %10066 = vst [vmem:[#allocation109_spill] sm:$0xff] %v8019_v54  ;;  %v8021_v39 = vpop.eup %6349  ;;  %v2320_v34 = vpack.c.bf16 %v8019_v54, %v8015_v27 }
 0x764   : > { %10067 = vst [vmem:[#allocation110_spill] sm:$0xff] %v8021_v39  ;;  %v2321_v8 = vpack.c.bf16 %v8017_v32, %v8021_v39  ;;  %v3251_v32 = vld [vmem:[%s6947_s29 + $0x68] sm:$0xff] }
 0x765   : > { %5839 = vmatprep.mubr.bf16.mxu0 %v2320_v34  ;;  %v2635_v34 = vld [vmem:[%s6947_s29 + $0xb8] sm:$0xff]  ;;  %v8181_v59 = vpack.c.bf16 %v3252_v57, %v3251_v32 }
 0x766   : > { %5840 = vmatmul.mubr.bf16.gmra.mxu0 %v2321_v8  ;;  %v2632_v8 = vld [vmem:[%s6947_s29 + $0x70] sm:$0xff] }
 0x767   : > { %5859 = vmatprep.mubr.msk.bf16.mxu0 %vm224_vm0, %v2661_v63  ;;  %v8059_v63 = vpack.c.bf16 %v2635_v34, %v2634_v29  ;;  %v8063_v13 = vpack.c.bf16 %v2633_v37, %v2632_v8  ;;  %v3261_v29 = vld [vmem:[%s6947_s29 + $0x158] sm:$0xff]  ;;  %v3262_v34 = vld [vmem:[%s6947_s29 + $0x170] sm:$0xff]  ;;  %v8084_v8 = vpack.c.bf16 %v3258_v38, %v3257_v18 }
 0x768   : > { %v8088_v37 = vpack.c.bf16 %v3262_v34, %v3261_v29 }
 0x769   : > { %2977 = vrot.lane.b32.xlu1 %v8063_v13, %s6835_s27  ;;  %2979 = vrot.lane.b32.xlu0 %v8059_v63, %s6835_s27 }
 0x76e   : > { %5860 = vmatmul.mubr.msk.bf16.vlgmr.msra.gmra.mxu0 %vm224_vm0, %v2663_v45  ;;  %v2628_v45 = vld [vmem:[%s6947_s29 + $0x10] sm:$0xff] }
 0x76f   : > { %5863 = vmatprep.mubr.msk.bf16.mxu0 %vm224_vm0, %v2665_v6  ;;  %v2629_v6 = vld [vmem:[%s6947_s29 + $0x28] sm:$0xff] }
 0x770   : > { %v8070_v36 = vpack.c.bf16 %v2629_v6, %v2628_v45  ;;  %v2675_v45 = vpop.permute.xlu1 %2674 }
 0x772   : > { %2973 = vrot.lane.b32.xlu1 %v8070_v36, %s6835_s27 }
 0x776   : > { %5864 = vmatmul.mubr.msk.bf16.gmra.mxu0 %vm224_vm0, %v2667_v52  ;;  %v2673_v52 = vpop.permute.xlu0 %2672  ;;  %3337 = vrot.lane.b32.xlu1 %v8084_v8, %s6836_s28 }
 0x777   : > { %5867 = vmatprep.mubr.msk.bf16.mxu0 %vm224_vm0, %v2669_v31  ;;  %v8074_v31 = vpack.c.bf16 %v2631_v12, %v2630_v4  ;;  %v3259_v4 = vld [vmem:[%s6947_s29 + $0x128] sm:$0xff]  ;;  %v3260_v12 = vld [vmem:[%s6947_s29 + $0x140] sm:$0xff] }
 0x778   : > { %v8096_v6 = vpack.c.bf16 %v3260_v12, %v3259_v4 }
 0x779   : > { %2975 = vrot.lane.b32.xlu0 %v8074_v31, %s6835_s27 }
 0x77d   : > { %3341 = vrot.lane.b32.xlu0 %v8088_v37, %s6836_s28 }
 0x77e   : > { %5868 = vmatmul.mubr.msk.bf16.gmra.mxu0 %vm224_vm0, %v2671_v17  ;;  %v3255_v17 = vld [vmem:[%s6947_s29 + $0xc8] sm:$0xff] }
 0x77f   : > { %5871 = vmatprep.mubr.msk.bf16.mxu0 %vm224_vm0, %v2673_v52  ;;  %v3256_v52 = vld [vmem:[%s6947_s29 + $0xe0] sm:$0xff] }
 0x780   : > { %v8103_v18 = vpack.c.bf16 %v3256_v52, %v3255_v17 }
 0x781   : > { %3339 = vrot.lane.b32.xlu0 %v8096_v6, %s6836_s28 }
 0x785   : > { %3335 = vrot.lane.b32.xlu0 %v8103_v18, %s6836_s28 }
 0x786   : > { %5872 = vmatmul.mubr.msk.bf16.gmra.mxu0 %vm224_vm0, %v2675_v45 }
 0x7bb   : > { %v2988_v38 = vpop.permute.xlu0 %2987 }
 0x7bc   : > { %5875 = vmatprep.subr.bf16.mxu1 %v2988_v38 }
 0x7bd   : > { %5876 = vmatpush3.bf16.msra.mxu1 %v2988_v38 }
 0x7bf   : > { %v2984_v34 = vpop.permute.xlu0 %2983 }
 0x7c0   : > { %v2986_v29 = vpop.permute.xlu1 %2985 }
 0x7c1   : > { %5877 = vmatprep.subr.bf16.mxu1 %v2986_v29 }
 0x7c2   : > { %5878 = vmatpush3.bf16.msra.mxu1 %v2986_v29 }
 0x7c3   : > { %5879 = vmatprep.subr.bf16.mxu1 %v2984_v34 }
 0x7c6   : > { %5880 = vmatpush3.bf16.msra.mxu1 %v2984_v34 }
 0x7cb   : > { %v2982_v4 = vpop.permute.xlu0 %2981 }
 0x7cc   : > { %5881 = vmatprep.subr.bf16.mxu1 %v2982_v4 }
 0x7cd   : > { %5882 = vmatpush3.bf16.msra.mxu1 %v2982_v4 }
 0x7d9   : > { %v8107_v38 = vpop.f32.mrf.mxu0 }
 0x7da   : > { %10068 = vst [vmem:[#allocation111_spill] sm:$0xff] %v8107_v38 }
 0x7db   : > { %v2980_v12 = vpop.permute.xlu0 %2979  ;;  %v2978_v45 = vpop.permute.xlu1 %2977 }
 0x7dc   : > { %5883 = vmatprep.subr.bf16.mxu1 %v2980_v12  ;;  %v8109_v29 = vpop.f32.mrf.mxu0 }
 0x7dd   : > { %5884 = vmatpush3.bf16.msra.mxu1 %v2980_v12  ;;  %10069 = vst [vmem:[#allocation112_spill] sm:$0xff] %v8109_v29 }
 0x7de   : > { %5885 = vmatprep.subr.bf16.mxu1 %v2978_v45  ;;  %v8111_v34 = vpop.f32.mrf.mxu0 }
 0x7df   : > { %10070 = vst [vmem:[#allocation113_spill] sm:$0xff] %v8111_v34 }
 0x7e0   : > { %v8117_v4 = vpop.f32.mrf.mxu0 }
 0x7e1   : > { %5886 = vmatpush3.bf16.msra.mxu1 %v2978_v45  ;;  %10071 = vst [vmem:[#allocation114_spill] sm:$0xff] %v8117_v4 }
 0x7e2   : > { %v8119_v12 = vpop.f32.mrf.mxu0 }
 0x7e3   : > { %10072 = vst [vmem:[#allocation115_spill] sm:$0xff] %v8119_v12 }
 0x7e4   : > { %v2974_v52 = vpop.permute.xlu1 %2973  ;;  %v8121_v45 = vpop.f32.mrf.mxu0 }
 0x7e5   : > { %10073 = vst [vmem:[#allocation116_spill] sm:$0xff] %v8121_v45 }
 0x7e8   : > { %v8271_v30 = vpop.permute.xlu1 %3337 }
 0x7eb   : > { %v2976_v17 = vpop.permute.xlu0 %2975 }
 0x7ec   : > { %5887 = vmatprep.subr.bf16.mxu1 %v2976_v17 }
 0x7ed   : > { %5888 = vmatpush3.bf16.msra.mxu1 %v2976_v17  ;;  %v8123_v17 = vpop.f32.mrf.mxu0 }
 0x7ee   : > { %5889 = vmatprep.subr.bf16.mxu1 %v2974_v52  ;;  %10074 = vst [vmem:[#allocation117_spill] sm:$0xff] %v8123_v17 }
 0x7ef   : > { %v8113_v39 = vpop.permute.xlu0 %3341  ;;  %v8125_v27 = vpop.f32.mrf.mxu0 }
 0x7f0   : > { %10075 = vst [vmem:[#allocation118_spill] sm:$0xff] %v8125_v27 }
 0x7f1   : > { %5890 = vmatpush3.bf16.msra.mxu1 %v2974_v52  ;;  %v8127_v52 = vpop.f32.mrf.mxu0 }
 0x7f2   : > { %6139 = vmatprep.subr.msk.bf16.mxu1 %vm224_vm0, %v8113_v39  ;;  %10076 = vst [vmem:[#allocation119_spill] sm:$0xff] %v8127_v52 }
 0x7f3   : > { %v8129_v38 = vpop.f32.mrf.mxu0  ;;  %v8265_v9 = vpop.permute.xlu0 %3339 }
 0x7f4   : > { %10077 = vst [vmem:[#allocation120_spill] sm:$0xff] %v8129_v38 }
 0x7f5   : > { %v8131_v29 = vpop.f32.mrf.mxu0 }
 0x7f6   : > { %10078 = vst [vmem:[#allocation121_spill] sm:$0xff] %v8131_v29 }
 0x7f7   : > { %v8133_v34 = vpop.f32.mrf.mxu0 }
 0x7f8   : > { %10079 = vst [vmem:[#allocation122_spill] sm:$0xff] %v8133_v34 }
 0x826   : > { %v8135_v11 = vpop.f32.mrf.mxu0 }
 0x827   : > { %10080 = vst [vmem:[#allocation123_spill] sm:$0xff] %v8135_v11 }
 0x828   : > { %v8137_v5 = vpop.f32.mrf.mxu0 }
 0x829   : > { %10081 = vst [vmem:[#allocation124_spill] sm:$0xff] %v8137_v5 }
 0x82a   : > { %v8139_v4 = vpop.f32.mrf.mxu0 }
 0x82b   : > { %10082 = vst [vmem:[#allocation125_spill] sm:$0xff] %v8139_v4 }
 0x82c   : > { %v8141_v12 = vpop.f32.mrf.mxu0 }
 0x82d   : > { %10083 = vst [vmem:[#allocation126_spill] sm:$0xff] %v8141_v12 }
 0x82e   : > { %v8143_v45 = vpop.f32.mrf.mxu0 }
 0x82f   : > { %2849 = vmax.xlane.f32.xlu1 %v8143_v45 }
 0x830   : > { %v8146_v17 = vpop.f32.mrf.mxu0 }
 0x831   : > { %2845 = vmax.xlane.f32.xlu0 %v8146_v17 }
 0x832   : > { %v8149_v52 = vpop.f32.mrf.mxu0 }
 0x833   : > { %2851 = vmax.xlane.f32.xlu1 %v8149_v52 }
 0x834   : > { %v8152_v38 = vpop.f32.mrf.mxu0 }
 0x836   : > { %v8154_v11 = vpop.f32.mrf.mxu0 }
 0x837   : > { %2847 = vmax.xlane.f32.xlu1 %v8152_v38  ;;  %2857 = vmax.xlane.f32.xlu0 %v8154_v11 }
 0x838   : > { %v8158_v5 = vpop.f32.mrf.mxu0 }
 0x83a   : > { %v8160_v4 = vpop.f32.mrf.mxu0 }
 0x83b   : > { %2853 = vmax.xlane.f32.xlu1 %v8158_v5 }
 0x83c   : > { %v8163_v12 = vpop.f32.mrf.mxu0 }
 0x83d   : > { %2855 = vmax.xlane.f32.xlu0 %v8163_v12 }
 0x83e   : > { %v8167_v29 = vpop.f32.mrf.mxu0 }
 0x83f   : > { %2859 = vmax.xlane.f32.xlu1 %v8160_v4 }
 0x840   : > { %v8170_v34 = vpop.f32.mrf.mxu0 }
 0x842   : > { %v8173_v27 = vpop.f32.mrf.mxu0 }
 0x843   : > { %2865 = vmax.xlane.f32.xlu1 %v8167_v29 }
 0x844   : > { %v8178_v54 = vpop.f32.mrf.mxu0 }
 0x846   : > { %v8191_v20 = vpop.f32.mrf.mxu0 }
 0x847   : > { %2861 = vmax.xlane.f32.xlu1 %v8170_v34 }
 0x848   : > { %v8194_v57 = vpop.f32.mrf.mxu0 }
 0x84a   : > { %v8197_v32 = vpop.f32.mrf.mxu0 }
 0x84b   : > { %2867 = vmax.xlane.f32.xlu1 %v8173_v27 }
 0x84c   : > { %v8200_v0 = vpop.f32.mrf.mxu0 }
 0x84f   : > { %2863 = vmax.xlane.f32.xlu1 %v8178_v54 }
 0x853   : > { %3331 = vrot.lane.b32.xlu0 %v8181_v59, %s6836_s28 }
 0x860   : > { %3333 = vrot.lane.b32.xlu1 %v8187_v44, %s6836_s28 }
 0x872   : > { %2873 = vmax.xlane.f32.xlu0 %v8191_v20 }
 0x876   : > { %2869 = vmax.xlane.f32.xlu0 %v8194_v57 }
 0x87a   : > { %2875 = vmax.xlane.f32.xlu0 %v8197_v32 }
 0x884   : > { %2871 = vmax.xlane.f32.xlu1 %v8200_v0 }
 0x890   : > { %3329 = vrot.lane.b32.xlu0 %v8207_v35, %s6836_s28 }
 0x894   : > { %3303 = vrot.lane.b32.xlu0 %v8217_v49, %s6836_s28 }
 0x895   : > { %3327 = vrot.lane.b32.xlu1 %v8219_v60, %s6836_s28 }
 0x898   : > { %3307 = vrot.lane.b32.xlu0 %v8227_v28, %s6836_s28 }
 0x899   : > { %3305 = vrot.lane.b32.xlu1 %v8231_v25, %s6836_s28 }
 0x89c   : > { %3311 = vrot.lane.b32.xlu0 %v8237_v61, %s6836_s28 }
 0x89d   : > { %3309 = vrot.lane.b32.xlu1 %v8241_v55, %s6836_s28 }
 0x8a0   : > { %3315 = vrot.lane.b32.xlu0 %v7925_v51, %s6836_s28  ;;  %v8275_v51 = vpop.permute.xlu0 %3335 }
 0x8a1   : > { %3313 = vrot.lane.b32.xlu1 %v8247_v58, %s6836_s28 }
 0x8a4   : > { %3630 = vrot.lane.b32.xlu0 %v8031_v26, %s6836_s28 }
 0x8a5   : > { %3317 = vrot.lane.b32.xlu1 %v7933_v3, %s6836_s28 }
 0x8a8   : > { %3626 = vrot.lane.b32.xlu0 %v8044_v47, %s6836_s28 }
 0x8a9   : > { %3628 = vrot.lane.b32.xlu1 %v8034_v10, %s6836_s28 }
 0x8ac   : > { %3624 = vrot.lane.b32.xlu0 %v8051_v19, %s6836_s28 }
 0x8ad   : > { %3620 = vrot.lane.b32.xlu1 %v8063_v13, %s6836_s28 }
 0x8b0   : > { %3622 = vrot.lane.b32.xlu0 %v8059_v63, %s6836_s28 }
 0x8b1   : > { %3616 = vrot.lane.b32.xlu1 %v8070_v36, %s6836_s28 }
 0x8b4   : > { %3618 = vrot.lane.b32.xlu0 %v8074_v31, %s6836_s28 }
 0x8b5   : > { %3980 = vrot.lane.b32.xlu1 %v8084_v8, %s6837_s30 }
 0x8b8   : > { %v2850_v3 = vpop.xlane.xlu1 %2849  ;;  %3984 = vrot.lane.b32.xlu0 %v8088_v37, %s6837_s30 }
 0x8b9   : > { %v2879_v19 = vsub.f32 %v8143_v45, %v2850_v3 }
 0x8ba   : > { %v2846_v2 = vpop.xlane.xlu0 %2845 }
 0x8bb   : > { %v2877_v26 = vsub.f32 %v8146_v17, %v2846_v2  ;;  %v2897_v33 = vmul.f32 1.442695, %v2879_v19 }
 0x8bc   : > { %v2852_v10 = vpop.xlane.xlu1 %2851  ;;  %3982 = vrot.lane.b32.xlu0 %v8096_v6, %s6837_s30 }
 0x8bd   : > { %v2880_v47 = vsub.f32 %v8149_v52, %v2852_v10  ;;  %v2893_v63 = vmul.f32 1.442695, %v2877_v26 }
 0x8bf   : > { %v2899_v24 = vmul.f32 1.442695, %v2880_v47  ;;  %6351 = vpow2.f32 %v2893_v63 }
 0x8c0   : > { %v2848_v13 = vpop.xlane.xlu1 %2847  ;;  %v2858_v36 = vpop.xlane.xlu0 %2857  ;;  %3978 = vrot.lane.b32.xlu0 %v8103_v18, %s6837_s30 }
 0x8c1   : > { %v2878_v23 = vsub.f32 %v8152_v38, %v2848_v13  ;;  %v2883_v31 = vsub.f32 %v8154_v11, %v2858_v36  ;;  %6353 = vpow2.f32 %v2899_v24 }
 0x8c3   : > { %v2895_v42 = vmul.f32 1.442695, %v2878_v23  ;;  %v2905_v7 = vmul.f32 1.442695, %v2883_v31 }
 0x8c4   : > { %v2854_v15 = vpop.xlane.xlu1 %2853 }
 0x8c5   : > { %v2881_v17 = vsub.f32 %v8158_v5, %v2854_v15  ;;  %6355 = vpow2.f32 %v2895_v42 }
 0x8c6   : > { %v2856_v43 = vpop.xlane.xlu0 %2855  ;;  %6357 = vpow2.f32 %v2897_v33 }
 0x8c7   : > { %v2901_v52 = vmul.f32 1.442695, %v2881_v17  ;;  %v2882_v45 = vsub.f32 %v8163_v12, %v2856_v43 }
 0x8c8   : > { %v2860_v40 = vpop.xlane.xlu1 %2859 }
 0x8c9   : > { %v2903_v16 = vmul.f32 1.442695, %v2882_v45  ;;  %v2884_v38 = vsub.f32 %v8160_v4, %v2860_v40  ;;  %6359 = vpow2.f32 %v2901_v52  ;;  %v3386_v52 = vsel %vm224_vm0, %v8265_v9, 0 }
 0x8cb   : > { %6361 = vpow2.f32 %v2903_v16  ;;  %v2907_v50 = vmul.f32 1.442695, %v2884_v38 }
 0x8cc   : > { %6363 = vpow2.f32 %v2905_v7  ;;  %v2866_v11 = vpop.xlane.xlu1 %2865  ;;  %v8285_v2 = vpop.eup %6351 }
 0x8cd   : > { %6365 = vpow2.f32 %v2907_v50  ;;  %v2887_v13 = vsub.f32 %v8167_v29, %v2866_v11  ;;  %v3332_v11 = vpop.permute.xlu0 %3331 }
 0x8ce   : > { %v8287_v5 = vpop.eup %6353 }
 0x8cf   : > { %v2913_v17 = vmul.f32 1.442695, %v2887_v13 }
 0x8d0   : > { %v2862_v3 = vpop.xlane.xlu1 %2861 }
 0x8d1   : > { %v2885_v12 = vsub.f32 %v8170_v34, %v2862_v3  ;;  %v3389_v34 = vsel %vm224_vm0, %v8113_v39, 0 }
 0x8d2   : > { %v8289_v26 = vpop.eup %6355 }
 0x8d3   : > { %v8292_v10 = vpop.eup %6357  ;;  %v2957_v4 = vpack.c.bf16 %v8289_v26, %v8285_v2  ;;  %v2909_v36 = vmul.f32 1.442695, %v2885_v12 }
 0x8d4   : > { %v2868_v47 = vpop.xlane.xlu1 %2867  ;;  %v2958_v63 = vpack.c.bf16 %v8287_v5, %v8292_v10 }
 0x8d5   : > { %v2888_v19 = vsub.f32 %v8173_v27, %v2868_v47  ;;  %5891 = vmatprep.mubr.bf16.mxu1 %v2957_v4  ;;  %6367 = vpow2.f32 %v2909_v36  ;;  %v3374_v47 = vsel %vm224_vm0, %v3332_v11, 0 }
 0x8d6   : > { %v8300_v24 = vpop.eup %6359  ;;  %5892 = vmatmul.mubr.bf16.vlgmr.msra.gmra.mxu1 %v2958_v63 }
 0x8d7   : > { %v2915_v33 = vmul.f32 1.442695, %v2888_v19  ;;  %5908 = vmatpush3.bf16.xpose.msra.mxu1 %v3389_v34 }
 0x8d8   : > { %v8304_v23 = vpop.eup %6361  ;;  %v2864_v42 = vpop.xlane.xlu1 %2863  ;;  %6140 = vmatprep.subr.msk.bf16.mxu1 %vm224_vm0, %v8265_v9 }
 0x8d9   : > { %v8306_v31 = vpop.eup %6363  ;;  %v2886_v27 = vsub.f32 %v8178_v54, %v2864_v42  ;;  %v2959_v29 = vpack.c.bf16 %v8304_v23, %v8300_v24  ;;  %6369 = vpow2.f32 %v2915_v33  ;;  %v3383_v54 = vsel %vm224_vm0, %v8271_v30, 0 }
 0x8da   : > { %v8313_v15 = vpop.eup %6365 }
 0x8db   : > { %v2911_v39 = vmul.f32 1.442695, %v2886_v27  ;;  %5895 = vmatprep.mubr.bf16.mxu1 %v2959_v29  ;;  %v2960_v43 = vpack.c.bf16 %v8313_v15, %v8306_v31 }
 0x8dc   : > { %v3334_v50 = vpop.permute.xlu1 %3333 }
 0x8dd   : > { %6371 = vpow2.f32 %v2911_v39  ;;  %v3377_v3 = vsel %vm224_vm0, %v3334_v50, 0 }
 0x8de   : > { %6373 = vpow2.f32 %v2913_v17  ;;  %5896 = vmatmul.mubr.bf16.gmra.mxu1 %v2960_v43 }
 0x8df   : > { %5910 = vmatpush3.bf16.xpose.msra.mxu1 %v3386_v52 }
 0x8e0   : > { %6141 = vmatprep.subr.msk.bf16.mxu1 %vm224_vm0, %v8271_v30  ;;  %v3380_v30 = vsel %vm224_vm0, %v8275_v51, 0 }
 0x8e2   : > { %v8323_v45 = vpop.eup %6367 }
 0x8e6   : > { %v8325_v7 = vpop.eup %6369 }
 0x8e7   : > { %5912 = vmatpush3.bf16.xpose.msra.mxu1 %v3383_v54 }
 0x8e8   : > { %6142 = vmatprep.subr.msk.bf16.mxu1 %vm224_vm0, %v8275_v51 }
 0x8ea   : > { %v8329_v40 = vpop.eup %6371 }
 0x8eb   : > { %v8331_v16 = vpop.eup %6373  ;;  %v2961_v9 = vpack.c.bf16 %v8329_v40, %v8323_v45 }
 0x8ec   : > { %v2962_v38 = vpack.c.bf16 %v8325_v7, %v8331_v16 }
 0x8ed   : > { %5899 = vmatprep.mubr.bf16.mxu1 %v2961_v9 }
 0x8ee   : > { %5900 = vmatmul.mubr.bf16.gmra.mxu1 %v2962_v38 }
 0x8ef   : > { %5914 = vmatpush3.bf16.xpose.msra.mxu1 %v3380_v30 }
 0x8f0   : > { %6143 = vmatprep.subr.msk.bf16.mxu1 %vm224_vm0, %v3334_v50 }
 0x8f7   : > { %5916 = vmatpush3.bf16.xpose.msra.mxu1 %v3377_v3 }
 0x8f8   : > { %6144 = vmatprep.subr.msk.bf16.mxu1 %vm224_vm0, %v3332_v11 }
 0x8fb   : > { %v2874_v12 = vpop.xlane.xlu0 %2873 }
 0x8fc   : > { %v2891_v34 = vsub.f32 %v8191_v20, %v2874_v12 }
 0x8fe   : > { %v2921_v17 = vmul.f32 1.442695, %v2891_v34 }
 0x8ff   : > { %v2870_v4 = vpop.xlane.xlu0 %2869  ;;  %5918 = vmatpush3.bf16.xpose.msra.mxu1 %v3374_v47 }
 0x900   : > { %v2889_v13 = vsub.f32 %v8194_v57, %v2870_v4 }
 0x902   : > { %v2917_v33 = vmul.f32 1.442695, %v2889_v13 }
 0x903   : > { %v2876_v19 = vpop.xlane.xlu0 %2875 }
 0x904   : > { %v2892_v36 = vsub.f32 %v8197_v32, %v2876_v19  ;;  %6375 = vpow2.f32 %v2917_v33 }
 0x906   : > { %v2923_v42 = vmul.f32 1.442695, %v2892_v36 }
 0x907   : > { %v3330_v63 = vpop.permute.xlu0 %3329 }
 0x908   : > { %6145 = vmatprep.subr.msk.bf16.mxu1 %vm224_vm0, %v3330_v63  ;;  %v3371_v51 = vsel %vm224_vm0, %v3330_v63, 0  ;;  %6377 = vpow2.f32 %v2923_v42 }
 0x909   : > { %5920 = vmatpush3.bf16.xpose.msra.mxu1 %v3371_v51 }
 0x90b   : > { %v3304_v38 = vpop.permute.xlu0 %3303 }
 0x90d   : > { %v2872_v27 = vpop.xlane.xlu1 %2871 }
 0x90e   : > { %v2890_v29 = vsub.f32 %v8200_v0, %v2872_v27 }
 0x90f   : > { %v3308_v50 = vpop.permute.xlu0 %3307 }
 0x910   : > { %v2919_v39 = vmul.f32 1.442695, %v2890_v29 }
 0x911   : > { %v3328_v43 = vpop.permute.xlu1 %3327  ;;  %v8351_v32 = vpop.eup %6375 }
 0x912   : > { %6379 = vpow2.f32 %v2919_v39  ;;  %6146 = vmatprep.subr.msk.bf16.mxu1 %vm224_vm0, %v3328_v43  ;;  %v3368_v57 = vsel %vm224_vm0, %v3328_v43, 0 }
 0x913   : > { %6381 = vpow2.f32 %v2921_v17  ;;  %5922 = vmatpush3.bf16.xpose.msra.mxu1 %v3368_v57  ;;  %v3312_v3 = vpop.permute.xlu0 %3311 }
 0x915   : > { %v8353_v20 = vpop.eup %6377  ;;  %v3306_v30 = vpop.permute.xlu1 %3305 }
 0x917   : > { %v3316_v47 = vpop.permute.xlu0 %3315 }
 0x919   : > { %v3310_v11 = vpop.permute.xlu1 %3309 }
 0x91b   : > { %v3631_v19 = vpop.permute.xlu0 %3630 }
 0x91c   : > { %5939 = vmatprep.subr.bf16.mxu0 %v3631_v19 }
 0x91d   : > { %v3314_v12 = vpop.permute.xlu1 %3313  ;;  %5940 = vmatpush3.bf16.msra.mxu0 %v3631_v19 }
 0x91f   : > { %v8355_v52 = vpop.eup %6379  ;;  %v3627_v8 = vpop.permute.xlu0 %3626 }
 0x920   : > { %v8357_v54 = vpop.eup %6381  ;;  %v2963_v0 = vpack.c.bf16 %v8355_v52, %v8351_v32 }
 0x921   : > { %v2964_v9 = vpack.c.bf16 %v8353_v20, %v8357_v54  ;;  %v3318_v4 = vpop.permute.xlu1 %3317 }
 0x922   : > { %5903 = vmatprep.mubr.bf16.mxu1 %v2963_v0 }
 0x923   : > { %5904 = vmatmul.mubr.bf16.gmra.mxu1 %v2964_v9  ;;  %v3625_v63 = vpop.permute.xlu0 %3624 }
 0x924   : > { %5923 = vmatprep.mubr.msk.bf16.mxu1 %vm224_vm0, %v3304_v38 }
 0x925   : > { %v3629_v37 = vpop.permute.xlu1 %3628 }
 0x926   : > { %5941 = vmatprep.subr.bf16.mxu0 %v3629_v37 }
 0x927   : > { %5942 = vmatpush3.bf16.msra.mxu0 %v3629_v37  ;;  %v3623_v6 = vpop.permute.xlu0 %3622 }
 0x928   : > { %5943 = vmatprep.subr.bf16.mxu0 %v3627_v8 }
 0x929   : > { %v3621_v13 = vpop.permute.xlu1 %3620 }
 0x92b   : > { %5924 = vmatmul.mubr.msk.bf16.vlgmr.msra.gmra.mxu1 %vm224_vm0, %v3306_v30  ;;  %5944 = vmatpush3.bf16.msra.mxu0 %v3627_v8  ;;  %v3619_v18 = vpop.permute.xlu0 %3618 }
 0x92c   : > { %5927 = vmatprep.mubr.msk.bf16.mxu1 %vm224_vm0, %v3308_v50  ;;  %5945 = vmatprep.subr.bf16.mxu0 %v3625_v63 }
 0x92d   : > { %v3617_v51 = vpop.permute.xlu1 %3616 }
 0x92f   : > { %5946 = vmatpush3.bf16.msra.mxu0 %v3625_v63  ;;  %v8385_v42 = vpop.permute.xlu0 %3984 }
 0x930   : > { %5947 = vmatprep.subr.bf16.mxu0 %v3623_v6 }
 0x933   : > { %5928 = vmatmul.mubr.msk.bf16.gmra.mxu1 %vm224_vm0, %v3310_v11  ;;  %5948 = vmatpush3.bf16.msra.mxu0 %v3623_v6 }
 0x934   : > { %5931 = vmatprep.mubr.msk.bf16.mxu1 %vm224_vm0, %v3312_v3  ;;  %5949 = vmatprep.subr.bf16.mxu0 %v3621_v13 }
 0x937   : > { %5950 = vmatpush3.bf16.msra.mxu0 %v3621_v13 }
 0x938   : > { %5951 = vmatprep.subr.bf16.mxu0 %v3619_v18 }
 0x93b   : > { %5932 = vmatmul.mubr.msk.bf16.gmra.mxu1 %vm224_vm0, %v3314_v12  ;;  %5952 = vmatpush3.bf16.msra.mxu0 %v3619_v18 }
 0x93c   : > { %5935 = vmatprep.mubr.msk.bf16.mxu1 %vm224_vm0, %v3316_v47  ;;  %5953 = vmatprep.subr.bf16.mxu0 %v3617_v51 }
 0x93f   : > { %5954 = vmatpush3.bf16.msra.mxu0 %v3617_v51 }
 0x940   : > { %6147 = vmatprep.subr.msk.bf16.mxu0 %vm224_vm0, %v8385_v42 }
 0x943   : > { %5936 = vmatmul.mubr.msk.bf16.gmra.mxu1 %vm224_vm0, %v3318_v4 }
 0x996   : > { %v8379_v36 = vpop.f32.mrf.mxu1 }
 0x997   : > { %10084 = vst [vmem:[#allocation127_spill] sm:$0xff] %v8379_v36 }
 0x998   : > { %v8381_v34 = vpop.f32.mrf.mxu1 }
 0x999   : > { %10085 = vst [vmem:[#allocation128_spill] sm:$0xff] %v8381_v34  ;;  %v3928_v34 = vld [vmem:[%s6947_s29 + $0x160] sm:$0xff] }
 0x99a   : > { %v8383_v33 = vpop.f32.mrf.mxu1 }
 0x99b   : > { %10086 = vst [vmem:[#allocation129_spill] sm:$0xff] %v8383_v33  ;;  %v3929_v33 = vld [vmem:[%s6947_s29 + $0x178] sm:$0xff] }
 0x99c   : > { %v8389_v27 = vpop.f32.mrf.mxu1 }
 0x99d   : > { %10087 = vst [vmem:[#allocation130_spill] sm:$0xff] %v8389_v27 }
 0x99e   : > { %v8391_v29 = vpop.f32.mrf.mxu1 }
 0x99f   : > { %10088 = vst [vmem:[#allocation131_spill] sm:$0xff] %v8391_v29  ;;  %v3864_v29 = vld [vmem:[%s6947_s29 + $0x150] sm:$0xff] }
 0x9a0   : > { %v8393_v17 = vpop.f32.mrf.mxu1 }
 0x9a1   : > { %10089 = vst [vmem:[#allocation132_spill] sm:$0xff] %v8393_v17 }
 0x9a2   : > { %v8395_v39 = vpop.f32.mrf.mxu1 }
 0x9a3   : > { %10090 = vst [vmem:[#allocation133_spill] sm:$0xff] %v8395_v39 }
 0x9a4   : > { %v8397_v43 = vpop.f32.mrf.mxu1 }
 0x9a5   : > { %10091 = vst [vmem:[#allocation134_spill] sm:$0xff] %v8397_v43 }
 0x9ae   : > { %v8399_v57 = vpop.f32.mrf.mxu1 }
 0x9af   : > { %10092 = vst [vmem:[#allocation135_spill] sm:$0xff] %v8399_v57 }
 0x9b0   : > { %v8401_v0 = vpop.f32.mrf.mxu1 }
 0x9b1   : > { %10093 = vst [vmem:[#allocation136_spill] sm:$0xff] %v8401_v0 }
 0x9b2   : > { %v8403_v9 = vpop.f32.mrf.mxu1 }
 0x9b3   : > { %10094 = vst [vmem:[#allocation137_spill] sm:$0xff] %v8403_v9 }
 0x9b4   : > { %v8405_v38 = vpop.f32.mrf.mxu1 }
 0x9b5   : > { %10095 = vst [vmem:[#allocation138_spill] sm:$0xff] %v8405_v38  ;;  %v3865_v38 = vld [vmem:[%s6947_s29 + $0x168] sm:$0xff] }
 0x9e3   : > { %v8407_v30 = vpop.f32.mrf.mxu1 }
 0x9e4   : > { %10096 = vst [vmem:[#allocation139_spill] sm:$0xff] %v8407_v30 }
 0x9e5   : > { %v8409_v50 = vpop.f32.mrf.mxu1 }
 0x9e6   : > { %10097 = vst [vmem:[#allocation140_spill] sm:$0xff] %v8409_v50 }
 0x9e7   : > { %v8411_v11 = vpop.f32.mrf.mxu1 }
 0x9e8   : > { %10098 = vst [vmem:[#allocation141_spill] sm:$0xff] %v8411_v11 }
 0x9e9   : > { %v8413_v3 = vpop.f32.mrf.mxu1 }
 0x9ea   : > { %10099 = vst [vmem:[#allocation142_spill] sm:$0xff] %v8413_v3 }
 0x9eb   : > { %v8415_v12 = vpop.f32.mrf.mxu1 }
 0x9ec   : > { %3492 = vmax.xlane.f32.xlu1 %v8415_v12 }
 0x9ed   : > { %v3425_v47 = vpop.f32.mrf.mxu1 }
 0x9ee   : > { %3488 = vmax.xlane.f32.xlu0 %v3425_v47 }
 0x9ef   : > { %v5926_v4 = vpop.f32.mrf.mxu1 }
 0x9f0   : > { %3494 = vmax.xlane.f32.xlu1 %v5926_v4 }
 0x9f1   : > { %v8418_v19 = vpop.f32.mrf.mxu1 }
 0x9f3   : > { %v8420_v37 = vpop.f32.mrf.mxu1 }
 0x9f4   : > { %3490 = vmax.xlane.f32.xlu1 %v8418_v19  ;;  %3500 = vmax.xlane.f32.xlu0 %v8420_v37 }
 0x9f5   : > { %v8424_v8 = vpop.f32.mrf.mxu1 }
 0x9f7   : > { %v8426_v63 = vpop.f32.mrf.mxu1 }
 0x9f8   : > { %3496 = vmax.xlane.f32.xlu1 %v8424_v8 }
 0x9f9   : > { %v8429_v6 = vpop.f32.mrf.mxu1 }
 0x9fa   : > { %3498 = vmax.xlane.f32.xlu0 %v8429_v6 }
 0x9fb   : > { %v8433_v13 = vpop.f32.mrf.mxu1 }
 0x9fc   : > { %3502 = vmax.xlane.f32.xlu1 %v8426_v63 }
 0x9fd   : > { %v8436_v18 = vpop.f32.mrf.mxu1 }
 0x9ff   : > { %v8439_v51 = vpop.f32.mrf.mxu1 }
 0xa00   : > { %3508 = vmax.xlane.f32.xlu1 %v8433_v13 }
 0xa01   : > { %v8442_v30 = vpop.f32.mrf.mxu1 }
 0xa03   : > { %v8449_v50 = vpop.f32.mrf.mxu1 }
 0xa04   : > { %3504 = vmax.xlane.f32.xlu1 %v8436_v18 }
 0xa05   : > { %v8452_v11 = vpop.f32.mrf.mxu1 }
 0xa07   : > { %v8455_v57 = vpop.f32.mrf.mxu1 }
 0xa08   : > { %3510 = vmax.xlane.f32.xlu1 %v8439_v51 }
 0xa09   : > { %v8458_v3 = vpop.f32.mrf.mxu1 }
 0xa0c   : > { %3506 = vmax.xlane.f32.xlu1 %v8442_v30 }
 0xa10   : > { %3974 = vrot.lane.b32.xlu0 %v8181_v59, %s6837_s30  ;;  %v3862_v59 = vld [vmem:[%s6947_s29 + $0x120] sm:$0xff] }
 0xa11   : > { %v3878_v0 = vmul.f32 0.25, %v3862_v59 }
 0xa1d   : > { %3976 = vrot.lane.b32.xlu1 %v8187_v44, %s6837_s30  ;;  %v3863_v44 = vld [vmem:[%s6947_s29 + $0x138] sm:$0xff] }
 0xa1e   : > { %v3879_v9 = vmul.f32 0.25, %v3863_v44 }
 0xa2f   : > { %3516 = vmax.xlane.f32.xlu0 %v8449_v50 }
 0xa33   : > { %3512 = vmax.xlane.f32.xlu0 %v8452_v11 }
 0xa37   : > { %3518 = vmax.xlane.f32.xlu0 %v8455_v57 }
 0xa41   : > { %3514 = vmax.xlane.f32.xlu1 %v8458_v3 }
 0xa4d   : > { %3972 = vrot.lane.b32.xlu0 %v8207_v35, %s6837_s30  ;;  %v8477_v35 = vpack.c.bf16 %v3879_v9, %v3878_v0 }
 0xa51   : > { %3946 = vrot.lane.b32.xlu0 %v8217_v49, %s6837_s30  ;;  %v3880_v49 = vmul.f32 0.25, %v3864_v29 }
 0xa52   : > { %3970 = vrot.lane.b32.xlu1 %v8219_v60, %s6837_s30  ;;  %v3881_v60 = vmul.f32 0.25, %v3865_v38 }
 0xa55   : > { %3950 = vrot.lane.b32.xlu0 %v8227_v28, %s6837_s30  ;;  %v8485_v28 = vpack.c.bf16 %v3881_v60, %v3880_v49 }
 0xa56   : > { %3948 = vrot.lane.b32.xlu1 %v8231_v25, %s6837_s30  ;;  %v8489_v25 = vpop.permute.xlu0 %3982 }
 0xa59   : > { %3954 = vrot.lane.b32.xlu0 %v8237_v61, %s6837_s30  ;;  %v8491_v61 = vpop.permute.xlu1 %3980 }
 0xa5a   : > { %3952 = vrot.lane.b32.xlu1 %v8241_v55, %s6837_s30  ;;  %v8493_v55 = vpop.permute.xlu0 %3978 }
 0xa5d   : > { %3958 = vrot.lane.b32.xlu0 %v8477_v35, %s6837_s30 }
 0xa5e   : > { %3956 = vrot.lane.b32.xlu1 %v8247_v58, %s6837_s30 }
 0xa62   : > { %3960 = vrot.lane.b32.xlu1 %v8485_v28, %s6837_s30 }
 0xa75   : > { %v3493_v29 = vpop.xlane.xlu1 %3492 }
 0xa76   : > { %v3522_v58 = vsub.f32 %v8415_v12, %v3493_v29  ;;  %v3924_v12 = vld [vmem:[%s6947_s29 + $0x100] sm:$0xff]  ;;  %v3925_v29 = vld [vmem:[%s6947_s29 + $0x118] sm:$0xff] }
 0xa77   : > { %v3489_v0 = vpop.xlane.xlu0 %3488 }
 0xa78   : > { %v3520_v9 = vsub.f32 %v3425_v47, %v3489_v0  ;;  %v3540_v36 = vmul.f32 1.442695, %v3522_v58  ;;  %v8500_v0 = vpack.c.bf16 %v3929_v33, %v3928_v34  ;;  %v3922_v34 = vld [vmem:[%s6947_s29 + $0xd0] sm:$0xff]  ;;  %v3923_v58 = vld [vmem:[%s6947_s29 + $0xe8] sm:$0xff] }
 0xa79   : > { %v3495_v38 = vpop.xlane.xlu1 %3494 }
 0xa7a   : > { %v3523_v59 = vsub.f32 %v5926_v4, %v3495_v38  ;;  %v3536_v44 = vmul.f32 1.442695, %v3520_v9  ;;  %v3926_v9 = vld [vmem:[%s6947_s29 + $0x130] sm:$0xff]  ;;  %v3927_v38 = vld [vmem:[%s6947_s29 + $0x148] sm:$0xff]  ;;  %4273 = vrot.lane.b32.xlu0 %v8500_v0, %s6837_s30 }
 0xa7c   : > { %v3542_v60 = vmul.f32 1.442695, %v3523_v59  ;;  %6383 = vpow2.f32 %v3536_v44  ;;  %v8509_v59 = vpack.c.bf16 %v3925_v29, %v3924_v12  ;;  %v3918_v44 = vld [vmem:[%s6947_s29 + $0x70] sm:$0xff]  ;;  %v3921_v29 = vld [vmem:[%s6947_s29 + $0xb8] sm:$0xff] }
 0xa7d   : > { %v3491_v49 = vpop.xlane.xlu1 %3490  ;;  %v3501_v17 = vpop.xlane.xlu0 %3500 }
 0xa7e   : > { %v3521_v39 = vsub.f32 %v8418_v19, %v3491_v49  ;;  %v3526_v47 = vsub.f32 %v8420_v37, %v3501_v17  ;;  %6385 = vpow2.f32 %v3542_v60  ;;  %v8511_v17 = vpack.c.bf16 %v3927_v38, %v3926_v9  ;;  %4269 = vrot.lane.b32.xlu0 %v8509_v59, %s6837_s30  ;;  %v3917_v38 = vld [vmem:[%s6947_s29 + $0x58] sm:$0xff] }
 0xa80   : > { %v3538_v43 = vmul.f32 1.442695, %v3521_v39  ;;  %v3548_v49 = vmul.f32 1.442695, %v3526_v47  ;;  %4271 = vrot.lane.b32.xlu1 %v8511_v17, %s6837_s30  ;;  %v3920_v47 = vld [vmem:[%s6947_s29 + $0xa0] sm:$0xff] }
 0xa81   : > { %v3497_v4 = vpop.xlane.xlu1 %3496 }
 0xa82   : > { %v3524_v19 = vsub.f32 %v8424_v8, %v3497_v4  ;;  %6387 = vpow2.f32 %v3538_v43  ;;  %v3919_v8 = vld [vmem:[%s6947_s29 + $0x88] sm:$0xff] }
 0xa83   : > { %v3499_v39 = vpop.xlane.xlu0 %3498  ;;  %6389 = vpow2.f32 %v3540_v36  ;;  %v8520_v60 = vpack.c.bf16 %v3919_v8, %v3918_v44 }
 0xa84   : > { %v3544_v33 = vmul.f32 1.442695, %v3524_v19  ;;  %v3525_v37 = vsub.f32 %v8429_v6, %v3499_v39  ;;  %v8525_v6 = vpack.c.bf16 %v3923_v58, %v3922_v34  ;;  %v3916_v19 = vld [vmem:[%s6947_s29 + $0x40] sm:$0xff] }
 0xa85   : > { %v3503_v43 = vpop.xlane.xlu1 %3502  ;;  %4263 = vrot.lane.b32.xlu1 %v8520_v60, %s6837_s30 }
 0xa86   : > { %v3546_v4 = vmul.f32 1.442695, %v3525_v37  ;;  %v3527_v36 = vsub.f32 %v8426_v63, %v3503_v43  ;;  %6391 = vpow2.f32 %v3544_v33  ;;  %4267 = vrot.lane.b32.xlu0 %v8525_v6, %s6837_s30  ;;  %v8533_v63 = vpack.c.bf16 %v3921_v29, %v3920_v47 }
 0xa87   : > { %v8543_v37 = vpack.c.bf16 %v3917_v38, %v3916_v19  ;;  %v4032_v29 = vsel %vm224_vm0, %v8385_v42, 0 }
 0xa88   : > { %6393 = vpow2.f32 %v3546_v4  ;;  %v3550_v12 = vmul.f32 1.442695, %v3527_v36 }
 0xa89   : > { %6395 = vpow2.f32 %v3548_v49  ;;  %v3509_v9 = vpop.xlane.xlu1 %3508  ;;  %v8537_v34 = vpop.eup %6383 }
 0xa8a   : > { %6397 = vpow2.f32 %v3550_v12  ;;  %4265 = vrot.lane.b32.xlu0 %v8533_v63, %s6837_s30  ;;  %v3530_v12 = vsub.f32 %v8433_v13, %v3509_v9 }
 0xa8b   : > { %v8539_v33 = vpop.eup %6385 }
 0xa8d   : > { %v3505_v39 = vpop.xlane.xlu1 %3504 }
 0xa8e   : > { %v3528_v44 = vsub.f32 %v8436_v18, %v3505_v39  ;;  %4261 = vrot.lane.b32.xlu0 %v8543_v37, %s6837_s30 }
 0xa8f   : > { %v8545_v58 = vpop.eup %6387 }
 0xa90   : > { %v8548_v8 = vpop.eup %6389  ;;  %v3600_v43 = vpack.c.bf16 %v8545_v58, %v8537_v34  ;;  %v3552_v18 = vmul.f32 1.442695, %v3528_v44 }
 0xa91   : > { %v3511_v49 = vpop.xlane.xlu1 %3510  ;;  %v3601_v36 = vpack.c.bf16 %v8539_v33, %v8548_v8 }
 0xa92   : > { %v3531_v4 = vsub.f32 %v8439_v51, %v3511_v49  ;;  %5955 = vmatprep.mubr.bf16.mxu0 %v3600_v43  ;;  %v3556_v49 = vmul.f32 1.442695, %v3530_v12  ;;  %6399 = vpow2.f32 %v3552_v18 }
 0xa93   : > { %v8558_v47 = vpop.eup %6391  ;;  %5956 = vmatmul.mubr.bf16.vlgmr.msra.gmra.mxu0 %v3601_v36 }
 0xa94   : > { %v3558_v38 = vmul.f32 1.442695, %v3531_v4  ;;  %5972 = vmatpush3.bf16.xpose.msra.mxu0 %v4032_v29  ;;  %v4029_v4 = vsel %vm224_vm0, %v8489_v25, 0 }
 0xa95   : > { %v8562_v19 = vpop.eup %6393  ;;  %v3507_v51 = vpop.xlane.xlu1 %3506  ;;  %6148 = vmatprep.subr.msk.bf16.mxu0 %vm224_vm0, %v8489_v25 }
 0xa96   : > { %v8564_v39 = vpop.eup %6395  ;;  %v3529_v13 = vsub.f32 %v8442_v30, %v3507_v51  ;;  %v3602_v9 = vpack.c.bf16 %v8562_v19, %v8558_v47  ;;  %6401 = vpow2.f32 %v3558_v38  ;;  %v4026_v30 = vsel %vm224_vm0, %v8491_v61, 0 }
 0xa97   : > { %10100 = vst [vmem:[#allocation143_spill] sm:$0xff] %v8564_v39  ;;  %v8571_v44 = vpop.eup %6397 }
 0xa98   : > { %v3554_v42 = vmul.f32 1.442695, %v3529_v13  ;;  %5959 = vmatprep.mubr.bf16.mxu0 %v3602_v9  ;;  %v3603_v43 = vpack.c.bf16 %v8571_v44, %v8564_v39  ;;  %v3975_v13 = vpop.permute.xlu0 %3974 }
 0xa99   : > { %v3977_v51 = vpop.permute.xlu1 %3976 }
 0xa9a   : > { %6403 = vpow2.f32 %v3554_v42  ;;  %v4020_v9 = vsel %vm224_vm0, %v3977_v51, 0  ;;  %v4017_v42 = vsel %vm224_vm0, %v3975_v13, 0 }
 0xa9b   : > { %6405 = vpow2.f32 %v3556_v49  ;;  %5960 = vmatmul.mubr.bf16.gmra.mxu0 %v3603_v43 }
 0xa9c   : > { %5974 = vmatpush3.bf16.xpose.msra.mxu0 %v4029_v4 }
 0xa9d   : > { %6149 = vmatprep.subr.msk.bf16.mxu0 %vm224_vm0, %v8491_v61  ;;  %v4023_v61 = vsel %vm224_vm0, %v8493_v55, 0 }
 0xa9f   : > { %v8581_v36 = vpop.eup %6399 }
 0xaa0   : > { %10101 = vst [vmem:[#allocation144_spill] sm:$0xff] %v8581_v36 }
 0xaa3   : > { %v8583_v12 = vpop.eup %6401 }
 0xaa4   : > { %5976 = vmatpush3.bf16.xpose.msra.mxu0 %v4026_v30 }
 0xaa5   : > { %6150 = vmatprep.subr.msk.bf16.mxu0 %vm224_vm0, %v8493_v55 }
 0xaa7   : > { %v8587_v18 = vpop.eup %6403 }
 0xaa8   : > { %v8589_v29 = vpop.eup %6405  ;;  %v3604_v25 = vpack.c.bf16 %v8587_v18, %v8581_v36 }
 0xaa9   : > { %10102 = vst [vmem:[#allocation145_spill] sm:$0xff] %v8589_v29  ;;  %v3605_v38 = vpack.c.bf16 %v8583_v12, %v8589_v29  ;;  %v4493_v29 = vld [vmem:[%s6947_s29] sm:$0xff] }
 0xaaa   : > { %5963 = vmatprep.mubr.bf16.mxu0 %v3604_v25 }
 0xaab   : > { %5964 = vmatmul.mubr.bf16.gmra.mxu0 %v3605_v38 }
 0xaac   : > { %5978 = vmatpush3.bf16.xpose.msra.mxu0 %v4023_v61 }
 0xaad   : > { %6151 = vmatprep.subr.msk.bf16.mxu0 %vm224_vm0, %v3977_v51 }
 0xab4   : > { %5980 = vmatpush3.bf16.xpose.msra.mxu0 %v4020_v9 }
 0xab5   : > { %6152 = vmatprep.subr.msk.bf16.mxu0 %vm224_vm0, %v3975_v13 }
 0xab8   : > { %v3517_v49 = vpop.xlane.xlu0 %3516 }
 0xab9   : > { %v3534_v61 = vsub.f32 %v8449_v50, %v3517_v49  ;;  %v4547_v50 = vld [vmem:[%s6947_s29 + $0x158] sm:$0xff]  ;;  %v4548_v49 = vld [vmem:[%s6947_s29 + $0x170] sm:$0xff] }
 0xabb   : > { %v3564_v27 = vmul.f32 1.442695, %v3534_v61 }
 0xabc   : > { %v3513_v43 = vpop.xlane.xlu0 %3512  ;;  %5982 = vmatpush3.bf16.xpose.msra.mxu0 %v4017_v42 }
 0xabd   : > { %v3532_v25 = vsub.f32 %v8452_v11, %v3513_v43 }
 0xabf   : > { %v3560_v51 = vmul.f32 1.442695, %v3532_v25 }
 0xac0   : > { %v3519_v4 = vpop.xlane.xlu0 %3518 }
 0xac1   : > { %v3535_v38 = vsub.f32 %v8455_v57, %v3519_v4  ;;  %6407 = vpow2.f32 %v3560_v51  ;;  %v3914_v4 = vld [vmem:[%s6947_s29 + $0x10] sm:$0xff] }
 0xac2   : > { %v4544_v51 = vld [vmem:[%s6947_s29 + $0x110] sm:$0xff] }
 0xac3   : > { %v3566_v13 = vmul.f32 1.442695, %v3535_v38  ;;  %v4543_v38 = vld [vmem:[%s6947_s29 + $0xf8] sm:$0xff] }
 0xac4   : > { %v3973_v30 = vpop.permute.xlu0 %3972 }
 0xac5   : > { %6153 = vmatprep.subr.msk.bf16.mxu0 %vm224_vm0, %v3973_v30  ;;  %v4014_v55 = vsel %vm224_vm0, %v3973_v30, 0  ;;  %6409 = vpow2.f32 %v3566_v13  ;;  %v3915_v30 = vld [vmem:[%s6947_s29 + $0x28] sm:$0xff]  ;;  %v4554_v13 = vpack.c.bf16 %v4544_v51, %v4543_v38  ;;  %v4538_v51 = vld [vmem:[%s6947_s29 + $0x80] sm:$0xff] }
 0xac6   : > { %5984 = vmatpush3.bf16.xpose.msra.mxu0 %v4014_v55  ;;  %v8613_v25 = vpack.c.bf16 %v3915_v30, %v3914_v4  ;;  %v4545_v55 = vld [vmem:[%s6947_s29 + $0x128] sm:$0xff]  ;;  %v4540_v4 = vld [vmem:[%s6947_s29 + $0xb0] sm:$0xff] }
 0xac8   : > { %4259 = vrot.lane.b32.xlu1 %v8613_v25, %s6837_s30  ;;  %v3947_v38 = vpop.permute.xlu0 %3946 }
 0xaca   : > { %v3515_v9 = vpop.xlane.xlu1 %3514 }
 0xacb   : > { %v3533_v42 = vsub.f32 %v8458_v3, %v3515_v9  ;;  %v4556_v3 = vpack.c.bf16 %v4548_v49, %v4547_v50 }
 0xacc   : > { %4623 = vrot.lane.b32.xlu1 %v4554_v13, %s6838_s2  ;;  %v4533_v13 = vld [vmem:[%s6947_s29 + $0x8] sm:$0xff] }
 0xacd   : > { %v3562_v11 = vmul.f32 1.442695, %v3533_v42  ;;  %4627 = vrot.lane.b32.xlu0 %v4556_v3, %s6838_s2 }
 0xace   : > { %v3971_v43 = vpop.permute.xlu1 %3970  ;;  %v8622_v9 = vpop.eup %6407 }
 0xacf   : > { %6411 = vpow2.f32 %v3562_v11  ;;  %6154 = vmatprep.subr.msk.bf16.mxu0 %vm224_vm0, %v3971_v43  ;;  %v4011_v57 = vsel %vm224_vm0, %v3971_v43, 0  ;;  %10103 = vst [vmem:[#allocation146_spill] sm:$0xff] %v8622_v9  ;;  %v4541_v11 = vld [vmem:[%s6947_s29 + $0xc8] sm:$0xff]  ;;  %v4542_v43 = vld [vmem:[%s6947_s29 + $0xe0] sm:$0xff] }
 0xad0   : > { %6413 = vpow2.f32 %v3564_v27  ;;  %5986 = vmatpush3.bf16.xpose.msra.mxu0 %v4011_v57  ;;  %v4546_v27 = vld [vmem:[%s6947_s29 + $0x140] sm:$0xff]  ;;  %v4539_v57 = vld [vmem:[%s6947_s29 + $0x98] sm:$0xff]  ;;  %v4553_v49 = vpack.c.bf16 %v4542_v43, %v4541_v11 }
 0xad1   : > { %v4555_v61 = vpack.c.bf16 %v4546_v27, %v4545_v55  ;;  %v4552_v55 = vpack.c.bf16 %v4540_v4, %v4539_v57  ;;  %v4534_v43 = vld [vmem:[%s6947_s29 + $0x20] sm:$0xff]  ;;  %v4495_v4 = vld [vmem:[%s6947_s29 + $0x30] sm:$0xff] }
 0xad2   : > { %v8625_v42 = vpop.eup %6409  ;;  %v4549_v57 = vpack.c.bf16 %v4534_v43, %v4533_v13  ;;  %v3949_v39 = vpop.permute.xlu1 %3948 }
 0xad3   : > { %4625 = vrot.lane.b32.xlu0 %v4555_v61, %s6838_s2  ;;  %10104 = vst [vmem:[#allocation147_spill] sm:$0xff] %v8625_v42  ;;  %4619 = vrot.lane.b32.xlu1 %v4552_v55, %s6838_s2  ;;  %v4537_v61 = vld [vmem:[%s6947_s29 + $0x68] sm:$0xff]  ;;  %v4511_v55 = vmul.f32 0.25, %v4495_v4  ;;  %v4503_v4 = vld [vmem:[%s6947_s29 + $0xf0] sm:$0xff] }
 0xad4   : > { %v4551_v11 = vpack.c.bf16 %v4538_v51, %v4537_v61  ;;  %v4509_v61 = vmul.f32 0.25, %v4493_v29  ;;  %v4499_v51 = vld [vmem:[%s6947_s29 + $0x90] sm:$0xff]  ;;  %v4497_v29 = vld [vmem:[%s6947_s29 + $0x60] sm:$0xff] }
 0xad7   : > { %4621 = vrot.lane.b32.xlu0 %v4553_v49, %s6838_s2  ;;  %v4535_v49 = vld [vmem:[%s6947_s29 + $0x38] sm:$0xff]  ;;  %4613 = vrot.lane.b32.xlu1 %v4549_v57, %s6838_s2 }
 0xadb   : > { %4617 = vrot.lane.b32.xlu0 %v4551_v11, %s6838_s2 }
 0xadc   : > { %v8631_v50 = vpop.eup %6411 }
 0xadd   : > { %10105 = vst [vmem:[#allocation148_spill] sm:$0xff] %v8631_v50  ;;  %v8634_v3 = vpop.eup %6413  ;;  %v3606_v30 = vpack.c.bf16 %v8631_v50, %v8622_v9  ;;  %v3951_v50 = vpop.permute.xlu0 %3950 }
 0xade   : > { %10106 = vst [vmem:[#allocation149_spill] sm:$0xff] %v8634_v3  ;;  %v3607_v27 = vpack.c.bf16 %v8625_v42, %v8634_v3  ;;  %v4496_v3 = vld [vmem:[%s6947_s29 + $0x48] sm:$0xff]  ;;  %v4515_v42 = vmul.f32 0.25, %v4499_v51 }
 0xadf   : > { %5967 = vmatprep.mubr.bf16.mxu0 %v3606_v30  ;;  %v4536_v30 = vld [vmem:[%s6947_s29 + $0x50] sm:$0xff]  ;;  %v4512_v9 = vmul.f32 0.25, %v4496_v3 }
 0xae0   : > { %5968 = vmatmul.mubr.bf16.gmra.mxu0 %v3607_v27  ;;  %v4550_v36 = vpack.c.bf16 %v4536_v30, %v4535_v49  ;;  %v4494_v27 = vld [vmem:[%s6947_s29 + $0x18] sm:$0xff]  ;;  %v4513_v49 = vmul.f32 0.25, %v4497_v29 }
 0xae1   : > { %5987 = vmatprep.mubr.msk.bf16.mxu0 %vm224_vm0, %v3947_v38  ;;  %v4500_v38 = vld [vmem:[%s6947_s29 + $0xa8] sm:$0xff]  ;;  %v4526_v13 = vpack.c.bf16 %v4512_v9, %v4511_v55  ;;  %v4510_v43 = vmul.f32 0.25, %v4494_v27  ;;  %v4498_v9 = vld [vmem:[%s6947_s29 + $0x78] sm:$0xff]  ;;  %v4519_v27 = vmul.f32 0.25, %v4503_v4 }
 0xae2   : > { %v4516_v11 = vmul.f32 0.25, %v4500_v38  ;;  %4615 = vrot.lane.b32.xlu0 %v4550_v36, %s6838_s2  ;;  %v4514_v30 = vmul.f32 0.25, %v4498_v9  ;;  %v4504_v55 = vld [vmem:[%s6947_s29 + $0x108] sm:$0xff]  ;;  %v4501_v38 = vld [vmem:[%s6947_s29 + $0xc0] sm:$0xff] }
 0xae3   : > { %v4525_v3 = vpack.c.bf16 %v4510_v43, %v4509_v61  ;;  %4591 = vrot.lane.b32.xlu1 %v4526_v13, %s6838_s2  ;;  %v4520_v36 = vmul.f32 0.25, %v4504_v55  ;;  %v3955_v13 = vpop.permute.xlu0 %3954 }
 0xae4   : > { %v4528_v57 = vpack.c.bf16 %v4516_v11, %v4515_v42  ;;  %v4527_v61 = vpack.c.bf16 %v4514_v30, %v4513_v49  ;;  %v3953_v42 = vpop.permute.xlu1 %3952 }
 0xae5   : > { %v4530_v51 = vpack.c.bf16 %v4520_v36, %v4519_v27 }
 0xae6   : > { %4589 = vrot.lane.b32.xlu0 %v4525_v3, %s6838_s2 }
 0xae7   : > { %4595 = vrot.lane.b32.xlu1 %v4528_v57, %s6838_s2  ;;  %v3959_v57 = vpop.permute.xlu0 %3958 }
 0xae8   : > { %5988 = vmatmul.mubr.msk.bf16.vlgmr.msra.gmra.mxu0 %vm224_vm0, %v3949_v39  ;;  %v4502_v39 = vld [vmem:[%s6947_s29 + $0xd8] sm:$0xff]  ;;  %v3957_v3 = vpop.permute.xlu1 %3956 }
 0xae9   : > { %5991 = vmatprep.mubr.msk.bf16.mxu0 %vm224_vm0, %v3951_v50  ;;  %v4517_v50 = vmul.f32 0.25, %v4501_v38  ;;  %v4518_v43 = vmul.f32 0.25, %v4502_v39 }
 0xaea   : > { %4593 = vrot.lane.b32.xlu0 %v4527_v61, %s6838_s2 }
 0xaeb   : > { %4599 = vrot.lane.b32.xlu1 %v4530_v51, %s6838_s2  ;;  %v4529_v11 = vpack.c.bf16 %v4518_v43, %v4517_v50 }
 0xaec   : > { %v3961_v29 = vpop.permute.xlu1 %3960 }
 0xaee   : > { %4597 = vrot.lane.b32.xlu0 %v4529_v11, %s6838_s2 }
 0xaef   : > { %4603 = vrot.lane.b32.xlu1 %v8485_v28, %s6838_s2 }
 0xaf0   : > { %5992 = vmatmul.mubr.msk.bf16.gmra.mxu0 %vm224_vm0, %v3953_v42 }
 0xaf1   : > { %5995 = vmatprep.mubr.msk.bf16.mxu0 %vm224_vm0, %v3955_v13 }
 0xaf2   : > { %4601 = vrot.lane.b32.xlu0 %v8477_v35, %s6838_s2  ;;  %v4274_v35 = vpop.permute.xlu0 %4273  ;;  %v4272_v28 = vpop.permute.xlu1 %4271 }
 0xaf3   : > { %4916 = vrot.lane.b32.xlu1 %v8500_v0, %s6838_s2  ;;  %6003 = vmatprep.subr.bf16.mxu1 %v4274_v35 }
 0xaf4   : > { %6004 = vmatpush3.bf16.msra.mxu1 %v4274_v35 }
 0xaf5   : > { %6005 = vmatprep.subr.bf16.mxu1 %v4272_v28 }
 0xaf6   : > { %4914 = vrot.lane.b32.xlu0 %v8511_v17, %s6838_s2  ;;  %v4270_v0 = vpop.permute.xlu0 %4269 }
 0xaf7   : > { %4912 = vrot.lane.b32.xlu1 %v8509_v59, %s6838_s2 }
 0xaf8   : > { %5996 = vmatmul.mubr.msk.bf16.gmra.mxu0 %vm224_vm0, %v3957_v3  ;;  %6006 = vmatpush3.bf16.msra.mxu1 %v4272_v28 }
 0xaf9   : > { %5999 = vmatprep.mubr.msk.bf16.mxu0 %vm224_vm0, %v3959_v57  ;;  %6007 = vmatprep.subr.bf16.mxu1 %v4270_v0 }
 0xafa   : > { %4910 = vrot.lane.b32.xlu0 %v8525_v6, %s6838_s2  ;;  %v4268_v59 = vpop.permute.xlu0 %4267 }
 0xafb   : > { %4908 = vrot.lane.b32.xlu1 %v8533_v63, %s6838_s2  ;;  %v4264_v63 = vpop.permute.xlu1 %4263 }
 0xafc   : > { %6008 = vmatpush3.bf16.msra.mxu1 %v4270_v0 }
 0xafd   : > { %6009 = vmatprep.subr.bf16.mxu1 %v4268_v59 }
 0xafe   : > { %4906 = vrot.lane.b32.xlu0 %v8520_v60, %s6838_s2  ;;  %v4266_v17 = vpop.permute.xlu0 %4265 }
 0xb00   : > { %6000 = vmatmul.mubr.msk.bf16.gmra.mxu0 %vm224_vm0, %v3961_v29  ;;  %6010 = vmatpush3.bf16.msra.mxu1 %v4268_v59 }
 0xb01   : > { %6011 = vmatprep.subr.bf16.mxu1 %v4266_v17 }
 0xb02   : > { %v4262_v6 = vpop.permute.xlu0 %4261 }
 0xb04   : > { %6012 = vmatpush3.bf16.msra.mxu1 %v4266_v17 }
 0xb05   : > { %6013 = vmatprep.subr.bf16.mxu1 %v4264_v63 }
 0xb08   : > { %6014 = vmatpush3.bf16.msra.mxu1 %v4264_v63 }
 0xb09   : > { %6015 = vmatprep.subr.bf16.mxu1 %v4262_v6 }
 0xb0c   : > { %6016 = vmatpush3.bf16.msra.mxu1 %v4262_v6 }
 0xb3a   : > { %v4260_v9 = vpop.permute.xlu1 %4259 }
 0xb3b   : > { %6017 = vmatprep.subr.bf16.mxu1 %v4260_v9 }
 0xb3c   : > { %6018 = vmatpush3.bf16.msra.mxu1 %v4260_v9 }
 0xb3e   : > { %v8697_v49 = vpop.permute.xlu1 %4623 }
 0xb3f   : > { %v8693_v60 = vpop.permute.xlu0 %4627 }
 0xb40   : > { %6155 = vmatprep.subr.msk.bf16.mxu1 %vm224_vm0, %v8693_v60 }
 0xb45   : > { %v8695_v4 = vpop.permute.xlu0 %4625  ;;  %v8703_v55 = vpop.permute.xlu1 %4619 }
 0xb49   : > { %v8699_v30 = vpop.permute.xlu0 %4621  ;;  %v8707_v36 = vpop.permute.xlu1 %4613 }
 0xb4d   : > { %v8705_v27 = vpop.permute.xlu0 %4617 }
 0xb53   : > { %v8727_v28 = vpop.f32.mrf.mxu0 }
 0xb54   : > { %v8709_v61 = vpop.permute.xlu0 %4615  ;;  %10115 = vst [vmem:[#allocation158_spill] sm:$0xff] %v8727_v28 }
 0xb55   : > { %v8711_v42 = vpop.permute.xlu1 %4591  ;;  %v8729_v59 = vpop.f32.mrf.mxu0 }
 0xb56   : > { %10107 = vst [vmem:[#allocation150_spill] sm:$0xff] %v8711_v42  ;;  %10116 = vst [vmem:[#allocation159_spill] sm:$0xff] %v8729_v59 }
 0xb57   : > { %v8731_v17 = vpop.f32.mrf.mxu0 }
 0xb58   : > { %v8713_v51 = vpop.permute.xlu0 %4589  ;;  %10117 = vst [vmem:[#allocation160_spill] sm:$0xff] %v8731_v17 }
 0xb59   : > { %10108 = vst [vmem:[#allocation151_spill] sm:$0xff] %v8713_v51  ;;  %v8715_v38 = vpop.permute.xlu1 %4595  ;;  %v8733_v6 = vpop.f32.mrf.mxu0 }
 0xb5a   : > { %10109 = vst [vmem:[#allocation152_spill] sm:$0xff] %v8715_v38  ;;  %10118 = vst [vmem:[#allocation161_spill] sm:$0xff] %v8733_v6  ;;  %v10150_v38 = vld [vmem:[#allocation97_spill] sm:$0xff] }
 0xb5b   : > { %v8735_v63 = vpop.f32.mrf.mxu0 }
 0xb5c   : > { %v8717_v39 = vpop.permute.xlu0 %4593  ;;  %10119 = vst [vmem:[#allocation162_spill] sm:$0xff] %v8735_v63 }
 0xb5d   : > { %10110 = vst [vmem:[#allocation153_spill] sm:$0xff] %v8717_v39  ;;  %v8719_v13 = vpop.permute.xlu1 %4599  ;;  %v8737_v9 = vpop.f32.mrf.mxu0 }
 0xb5e   : > { %10111 = vst [vmem:[#allocation154_spill] sm:$0xff] %v8719_v13  ;;  %10120 = vst [vmem:[#allocation163_spill] sm:$0xff] %v8737_v9  ;;  %v10143_v13 = vld [vmem:[#allocation66_spill] sm:$0xff] }
 0xb60   : > { %v8721_v50 = vpop.permute.xlu0 %4597 }
 0xb61   : > { %10112 = vst [vmem:[#allocation155_spill] sm:$0xff] %v8721_v50  ;;  %v8723_v43 = vpop.permute.xlu1 %4603  ;;  %v10144_v50 = vld [vmem:[#allocation72_spill] sm:$0xff] }
 0xb62   : > { %10113 = vst [vmem:[#allocation156_spill] sm:$0xff] %v8723_v43  ;;  %v10137_v43 = vld [vmem:[#allocation44_spill] sm:$0xff] }
 0xb64   : > { %v8725_v11 = vpop.permute.xlu0 %4601 }
 0xb65   : > { %10114 = vst [vmem:[#allocation157_spill] sm:$0xff] %v8725_v11  ;;  %v4917_v3 = vpop.permute.xlu1 %4916  ;;  %v10139_v11 = vld [vmem:[#allocation45_spill] sm:$0xff] }
 0xb66   : > { %6067 = vmatprep.subr.bf16.mxu0 %v4917_v3 }
 0xb67   : > { %6068 = vmatpush3.bf16.msra.mxu0 %v4917_v3  ;;  %v8739_v3 = vpop.f32.mrf.mxu0 }
 0xb68   : > { %v4915_v57 = vpop.permute.xlu0 %4914  ;;  %10121 = vst [vmem:[#allocation164_spill] sm:$0xff] %v8739_v3 }
 0xb69   : > { %6069 = vmatprep.subr.bf16.mxu0 %v4915_v57  ;;  %v4913_v29 = vpop.permute.xlu1 %4912 }
 0xb6b   : > { %6070 = vmatpush3.bf16.msra.mxu0 %v4915_v57 }
 0xb6c   : > { %6071 = vmatprep.subr.bf16.mxu0 %v4913_v29  ;;  %v4911_v35 = vpop.permute.xlu0 %4910 }
 0xb6d   : > { %v4909_v0 = vpop.permute.xlu1 %4908 }
 0xb6f   : > { %6072 = vmatpush3.bf16.msra.mxu0 %v4913_v29  ;;  %v8741_v29 = vpop.f32.mrf.mxu0 }
 0xb70   : > { %6073 = vmatprep.subr.bf16.mxu0 %v4911_v35  ;;  %v4907_v57 = vpop.permute.xlu0 %4906  ;;  %10122 = vst [vmem:[#allocation165_spill] sm:$0xff] %v8741_v29  ;;  %v10135_v29 = vld [vmem:[#allocation42_spill] sm:$0xff] }
 0xb73   : > { %6074 = vmatpush3.bf16.msra.mxu0 %v4911_v35  ;;  %v8743_v35 = vpop.f32.mrf.mxu0 }
 0xb74   : > { %6075 = vmatprep.subr.bf16.mxu0 %v4909_v0  ;;  %10123 = vst [vmem:[#allocation166_spill] sm:$0xff] %v8743_v35 }
 0xb75   : > { %v8745_v28 = vpop.f32.mrf.mxu0 }
 0xb76   : > { %10124 = vst [vmem:[#allocation167_spill] sm:$0xff] %v8745_v28 }
 0xb77   : > { %6076 = vmatpush3.bf16.msra.mxu0 %v4909_v0  ;;  %v8747_v0 = vpop.f32.mrf.mxu0 }
 0xb78   : > { %6077 = vmatprep.subr.bf16.mxu0 %v4907_v57  ;;  %10125 = vst [vmem:[#allocation168_spill] sm:$0xff] %v8747_v0 }
 0xb79   : > { %v8749_v59 = vpop.f32.mrf.mxu0 }
 0xb7a   : > { %10126 = vst [vmem:[#allocation169_spill] sm:$0xff] %v8749_v59  ;;  %v10134_v59 = vld [vmem:[#allocation65_spill] sm:$0xff] }
 0xb7b   : > { %6078 = vmatpush3.bf16.msra.mxu0 %v4907_v57 }
 0xba0   : > { %v8751_v17 = vpop.f32.mrf.mxu0 }
 0xba1   : > { %10127 = vst [vmem:[#allocation170_spill] sm:$0xff] %v8751_v17 }
 0xba2   : > { %v8753_v63 = vpop.f32.mrf.mxu0 }
 0xba3   : > { %10128 = vst [vmem:[#allocation171_spill] sm:$0xff] %v8753_v63 }
 0xba4   : > { %v8755_v9 = vpop.f32.mrf.mxu0 }
 0xba5   : > { %10129 = vst [vmem:[#allocation172_spill] sm:$0xff] %v8755_v9 }
 0xba6   : > { %v8757_v3 = vpop.f32.mrf.mxu0 }
 0xba7   : > { %10130 = vst [vmem:[#allocation173_spill] sm:$0xff] %v8757_v3 }
 0xba8   : > { %v8759_v6 = vpop.f32.mrf.mxu0 }
 0xba9   : > { %4135 = vmax.xlane.f32.xlu1 %v8759_v6 }
 0xbaa   : > { %v8762_v57 = vpop.f32.mrf.mxu0 }
 0xbab   : > { %4131 = vmax.xlane.f32.xlu0 %v8762_v57 }
 0xbac   : > { %v8765_v35 = vpop.f32.mrf.mxu0 }
 0xbad   : > { %4137 = vmax.xlane.f32.xlu1 %v8765_v35 }
 0xbae   : > { %v8768_v28 = vpop.f32.mrf.mxu0 }
 0xbb0   : > { %v8775_v17 = vpop.f32.mrf.mxu0 }
 0xbb1   : > { %4133 = vmax.xlane.f32.xlu1 %v8768_v28 }
 0xbb2   : > { %v8777_v63 = vpop.f32.mrf.mxu0 }
 0xbb4   : > { %v8779_v9 = vpop.f32.mrf.mxu0 }
 0xbb6   : > { %v8782_v3 = vpop.f32.mrf.mxu0 }
 0xbb8   : > { %v8785_v0 = vpop.f32.mrf.mxu0 }
 0xbc1   : > { %4902 = vrot.lane.b32.xlu0 %v8613_v25, %s6838_s2  ;;  %v8789_v25 = vpop.f32.mrf.mxu0 }
 0xbc2   : > { %4904 = vrot.lane.b32.xlu1 %v8543_v37, %s6838_s2 }
 0xbc3   : > { %v8793_v37 = vpop.f32.mrf.mxu0 }
 0xbe0   : > { %998 = vadd.xlane.f32.xlu0 %v7403_v21  ;;  %v8797_v21 = vpop.f32.mrf.mxu0 }
 0xbe4   : > { %1002 = vadd.xlane.f32.xlu0 %v7401_v41 }
 0xbe6   : > { %996 = vadd.xlane.f32.xlu1 %v7399_v56  ;;  %v8801_v56 = vpop.f32.mrf.mxu0 }
 0xbe8   : > { %4143 = vmax.xlane.f32.xlu0 %v8775_v17  ;;  %v8805_v41 = vpop.f32.mrf.mxu0 }
 0xbea   : > { %1000 = vadd.xlane.f32.xlu1 %v7405_v62  ;;  %v8809_v62 = vpop.f32.mrf.mxu0 }
 0xbec   : > { %4141 = vmax.xlane.f32.xlu0 %v8782_v3 }
 0xbee   : > { %1004 = vadd.xlane.f32.xlu1 %v7430_v1  ;;  %v10131_v1 = vld [vmem:[#allocation43_spill] sm:$0xff] }
 0xbf0   : > { %1006 = vadd.xlane.f32.xlu0 %v7435_v48  ;;  %v10133_v48 = vld [vmem:[#allocation46_spill] sm:$0xff] }
 0xbf2   : > { %4139 = vmax.xlane.f32.xlu1 %v8777_v63 }
 0xbf4   : > { %1010 = vadd.xlane.f32.xlu0 %v7432_v46  ;;  %v10132_v46 = vld [vmem:[#allocation41_spill] sm:$0xff] }
 0xbf6   : > { %4145 = vmax.xlane.f32.xlu1 %v8779_v9 }
 0xbf8   : > { %4159 = vmax.xlane.f32.xlu0 %v8801_v56 }
 0xbfa   : > { %1008 = vadd.xlane.f32.xlu1 %v7437_v53  ;;  %v8821_v53 = vpop.f32.mrf.mxu0 }
 0xbfc   : > { %4155 = vmax.xlane.f32.xlu0 %v8805_v41 }
 0xbfe   : > { %4151 = vmax.xlane.f32.xlu1 %v8785_v0 }
 0xc00   : > { %4161 = vmax.xlane.f32.xlu0 %v8809_v62 }
 0xc02   : > { %4147 = vmax.xlane.f32.xlu1 %v8789_v25 }
 0xc04   : > { %1014 = vadd.xlane.f32.xlu0 %v7456_v14  ;;  %v10136_v14 = vld [vmem:[#allocation64_spill] sm:$0xff] }
 0xc06   : > { %4153 = vmax.xlane.f32.xlu1 %v8793_v37 }
 0xc08   : > { %1018 = vadd.xlane.f32.xlu0 %v7449_v22  ;;  %v10138_v22 = vld [vmem:[#allocation68_spill] sm:$0xff] }
 0xc0a   : > { %4149 = vmax.xlane.f32.xlu1 %v8797_v21 }
 0xc0c   : > { %1022 = vadd.xlane.f32.xlu0 %v10131_v1  ;;  %v10140_v1 = vld [vmem:[#allocation70_spill] sm:$0xff] }
 0xc0e   : > { %1012 = vadd.xlane.f32.xlu1 %v10132_v46  ;;  %v10141_v46 = vld [vmem:[#allocation63_spill] sm:$0xff] }
 0xc10   : > { %1026 = vadd.xlane.f32.xlu0 %v10133_v48  ;;  %v10142_v48 = vld [vmem:[#allocation73_spill] sm:$0xff] }
 0xc12   : > { %4157 = vmax.xlane.f32.xlu1 %v8821_v53 }
 0xc14   : > { %1641 = vadd.xlane.f32.xlu0 %v10134_v59  ;;  %v10145_v59 = vld [vmem:[#allocation67_spill] sm:$0xff] }
 0xc16   : > { %1016 = vadd.xlane.f32.xlu1 %v10135_v29  ;;  %v10146_v29 = vld [vmem:[#allocation77_spill] sm:$0xff] }
 0xc18   : > { %1645 = vadd.xlane.f32.xlu0 %v10136_v14  ;;  %v10147_v14 = vld [vmem:[#allocation69_spill] sm:$0xff] }
 0xc1a   : > { %1020 = vadd.xlane.f32.xlu1 %v10137_v43  ;;  %v10148_v43 = vld [vmem:[#allocation76_spill] sm:$0xff] }
 0xc1c   : > { %1649 = vadd.xlane.f32.xlu0 %v10138_v22  ;;  %v10149_v22 = vld [vmem:[#allocation71_spill] sm:$0xff] }
 0xc1e   : > { %1024 = vadd.xlane.f32.xlu1 %v10139_v11 }
 0xc20   : > { %1653 = vadd.xlane.f32.xlu0 %v10140_v1 }
 0xc22   : > { %1639 = vadd.xlane.f32.xlu1 %v10141_v46 }
 0xc24   : > { %1657 = vadd.xlane.f32.xlu0 %v10142_v48  ;;  %v10151_v48 = vld [vmem:[#allocation74_spill] sm:$0xff] }
 0xc26   : > { %1643 = vadd.xlane.f32.xlu1 %v10143_v13 }
 0xc28   : > { %1661 = vadd.xlane.f32.xlu0 %v10144_v50 }
 0xc2a   : > { %1647 = vadd.xlane.f32.xlu1 %v10145_v59 }
 0xc2c   : > { %1665 = vadd.xlane.f32.xlu0 %v10146_v29  ;;  %v10152_v29 = vld [vmem:[#allocation96_spill] sm:$0xff] }
 0xc2e   : > { %1651 = vadd.xlane.f32.xlu1 %v10147_v14 }
 0xc30   : > { %1669 = vadd.xlane.f32.xlu0 %v10148_v43  ;;  %v10153_v43 = vld [vmem:[#allocation75_spill] sm:$0xff] }
 0xc32   : > { %1655 = vadd.xlane.f32.xlu1 %v10149_v22  ;;  %v4136_v11 = vpop.xlane.xlu1 %4135 }
 0xc33   : > { %v4165_v59 = vsub.f32 %v8759_v6, %v4136_v11  ;;  %v10156_v6 = vld [vmem:[#allocation102_spill] sm:$0xff]  ;;  %v10157_v11 = vld [vmem:[#allocation95_spill] sm:$0xff] }
 0xc34   : > { %v4132_v1 = vpop.xlane.xlu0 %4131  ;;  %2284 = vadd.xlane.f32.xlu0 %v10150_v38  ;;  %v10154_v38 = vld [vmem:[#allocation100_spill] sm:$0xff] }
 0xc35   : > { %v4163_v46 = vsub.f32 %v8762_v57, %v4132_v1  ;;  %v4183_v51 = vmul.f32 1.442695, %v4165_v59  ;;  %v10155_v1 = vld [vmem:[#allocation78_spill] sm:$0xff]  ;;  %v10162_v59 = vld [vmem:[#allocation109_spill] sm:$0xff] }
 0xc36   : > { %1659 = vadd.xlane.f32.xlu1 %v10151_v48  ;;  %v4138_v13 = vpop.xlane.xlu1 %4137 }
 0xc37   : > { %v4166_v50 = vsub.f32 %v8765_v35, %v4138_v13  ;;  %v4179_v14 = vmul.f32 1.442695, %v4163_v46  ;;  %v10159_v46 = vld [vmem:[#allocation98_spill] sm:$0xff]  ;;  %v10161_v13 = vld [vmem:[#allocation99_spill] sm:$0xff] }
 0xc38   : > { %2288 = vadd.xlane.f32.xlu0 %v10152_v29  ;;  %v4903_v48 = vpop.permute.xlu0 %4902 }
 0xc39   : > { %v4185_v39 = vmul.f32 1.442695, %v4166_v50  ;;  %6415 = vpow2.f32 %v4179_v14 }
 0xc3a   : > { %1663 = vadd.xlane.f32.xlu1 %v10153_v43  ;;  %v4134_v22 = vpop.xlane.xlu1 %4133  ;;  %v10163_v43 = vld [vmem:[#allocation101_spill] sm:$0xff] }
 0xc3b   : > { %v4164_v42 = vsub.f32 %v8768_v28, %v4134_v22  ;;  %6417 = vpow2.f32 %v4185_v39  ;;  %v10158_v28 = vld [vmem:[#allocation105_spill] sm:$0xff] }
 0xc3c   : > { %2292 = vadd.xlane.f32.xlu0 %v10154_v38  ;;  %v10164_v38 = vld [vmem:[#allocation108_spill] sm:$0xff] }
 0xc3d   : > { %v4181_v57 = vmul.f32 1.442695, %v4164_v42  ;;  %v10160_v42 = vld [vmem:[#allocation104_spill] sm:$0xff] }
 0xc3e   : > { %1667 = vadd.xlane.f32.xlu1 %v10155_v1  ;;  %v4905_v35 = vpop.permute.xlu1 %4904  ;;  %v10165_v1 = vld [vmem:[#allocation103_spill] sm:$0xff] }
 0xc3f   : > { %6419 = vpow2.f32 %v4181_v57  ;;  %6079 = vmatprep.subr.bf16.mxu0 %v4905_v35  ;;  %v4675_v57 = vsel %vm224_vm0, %v8693_v60, 0  ;;  %v10167_v60 = vld [vmem:[#allocation107_spill] sm:$0xff] }
 0xc40   : > { %6421 = vpow2.f32 %v4183_v51  ;;  %2296 = vadd.xlane.f32.xlu0 %v10156_v6  ;;  %6080 = vmatpush3.bf16.msra.mxu0 %v4905_v35  ;;  %v10166_v35 = vld [vmem:[#allocation106_spill] sm:$0xff] }
 0xc41   : > { %6081 = vmatprep.subr.bf16.mxu0 %v4903_v48  ;;  %v10168_v6 = vld [vmem:[#allocation110_spill] sm:$0xff] }
 0xc42   : > { %2282 = vadd.xlane.f32.xlu1 %v10157_v11 }
 0xc44   : > { %2300 = vadd.xlane.f32.xlu0 %v10158_v28  ;;  %6082 = vmatpush3.bf16.msra.mxu0 %v4903_v48  ;;  %v4672_v48 = vsel %vm224_vm0, %v8695_v4, 0  ;;  %v10169_v28 = vld [vmem:[#allocation148_spill] sm:$0xff] }
 0xc46   : > { %2286 = vadd.xlane.f32.xlu1 %v10159_v46  ;;  %v8855_v39 = vpop.eup %6415 }
 0xc48   : > { %2304 = vadd.xlane.f32.xlu0 %v10160_v42  ;;  %v8858_v50 = vpop.eup %6417  ;;  %v10170_v42 = vld [vmem:[#allocation143_spill] sm:$0xff] }
 0xc4a   : > { %2290 = vadd.xlane.f32.xlu1 %v10161_v13 }
 0xc4c   : > { %v8860_v51 = vpop.eup %6419  ;;  %2308 = vadd.xlane.f32.xlu0 %v10162_v59  ;;  %v10171_v59 = vld [vmem:[#allocation147_spill] sm:$0xff] }
 0xc4d   : > { %v8863_v29 = vpop.eup %6421  ;;  %v4243_v14 = vpack.c.bf16 %v8860_v51, %v8855_v39 }
 0xc4e   : > { %2294 = vadd.xlane.f32.xlu1 %v10163_v43  ;;  %v4244_v22 = vpack.c.bf16 %v8858_v50, %v8863_v29 }
 0xc4f   : > { %6019 = vmatprep.mubr.bf16.mxu1 %v4243_v14 }
 0xc50   : > { %2312 = vadd.xlane.f32.xlu0 %v10164_v38  ;;  %6020 = vmatmul.mubr.bf16.vlgmr.msra.gmra.mxu1 %v4244_v22  ;;  %v10172_v38 = vld [vmem:[#allocation144_spill] sm:$0xff] }
 0xc51   : > { %6036 = vmatpush3.bf16.xpose.msra.mxu1 %v4675_v57 }
 0xc52   : > { %6156 = vmatprep.subr.msk.bf16.mxu1 %vm224_vm0, %v8695_v4  ;;  %2298 = vadd.xlane.f32.xlu1 %v10165_v1 }
 0xc54   : > { %2927 = vadd.xlane.f32.xlu0 %v8289_v26  ;;  %v4669_v26 = vsel %vm224_vm0, %v8697_v49, 0 }
 0xc56   : > { %2302 = vadd.xlane.f32.xlu1 %v10166_v35 }
 0xc58   : > { %2931 = vadd.xlane.f32.xlu0 %v8287_v5  ;;  %v4666_v5 = vsel %vm224_vm0, %v8699_v30, 0 }
 0xc59   : > { %6038 = vmatpush3.bf16.xpose.msra.mxu1 %v4672_v48 }
 0xc5a   : > { %6157 = vmatprep.subr.msk.bf16.mxu1 %vm224_vm0, %v8697_v49  ;;  %2306 = vadd.xlane.f32.xlu1 %v10167_v60 }
 0xc5c   : > { %2935 = vadd.xlane.f32.xlu0 %v8304_v23 }
 0xc5e   : > { %2310 = vadd.xlane.f32.xlu1 %v10168_v6 }
 0xc60   : > { %2939 = vadd.xlane.f32.xlu0 %v8313_v15  ;;  %v4663_v15 = vsel %vm224_vm0, %v8703_v55, 0 }
 0xc61   : > { %6040 = vmatpush3.bf16.xpose.msra.mxu1 %v4669_v26 }
 0xc62   : > { %6158 = vmatprep.subr.msk.bf16.mxu1 %vm224_vm0, %v8699_v30  ;;  %2925 = vadd.xlane.f32.xlu1 %v8285_v2 }
 0xc64   : > { %2943 = vadd.xlane.f32.xlu0 %v8329_v40 }
 0xc66   : > { %2929 = vadd.xlane.f32.xlu1 %v8292_v10 }
 0xc68   : > { %2947 = vadd.xlane.f32.xlu0 %v8325_v7 }
 0xc69   : > { %6042 = vmatpush3.bf16.xpose.msra.mxu1 %v4666_v5  ;;  %v8897_v23 = vpop.xlane.xlu0 %998  ;;  %v10174_v5 = vld [vmem:[#allocation145_spill] sm:$0xff] }
 0xc6a   : > { %6159 = vmatprep.subr.msk.bf16.mxu1 %vm224_vm0, %v8703_v55  ;;  %2933 = vadd.xlane.f32.xlu1 %v8300_v24 }
 0xc6c   : > { %2951 = vadd.xlane.f32.xlu0 %v8355_v52  ;;  %v4660_v52 = vsel %vm224_vm0, %v8705_v27, 0 }
 0xc6d   : > { %v8903_v2 = vpop.xlane.xlu0 %1002 }
 0xc6e   : > { %2937 = vadd.xlane.f32.xlu1 %v8306_v31 }
 0xc6f   : > { %v8906_v10 = vpop.xlane.xlu1 %996 }
 0xc70   : > { %2955 = vadd.xlane.f32.xlu0 %v8353_v20 }
 0xc71   : > { %6044 = vmatpush3.bf16.xpose.msra.mxu1 %v4663_v15  ;;  %v4144_v7 = vpop.xlane.xlu0 %4143 }
 0xc72   : > { %6160 = vmatprep.subr.msk.bf16.mxu1 %vm224_vm0, %v8705_v27  ;;  %2941 = vadd.xlane.f32.xlu1 %v8323_v45  ;;  %v4169_v45 = vsub.f32 %v8775_v17, %v4144_v7 }
 0xc73   : > { %v8914_v24 = vpop.xlane.xlu1 %1000 }
 0xc74   : > { %3570 = vadd.xlane.f32.xlu0 %v8545_v58  ;;  %v4191_v55 = vmul.f32 1.442695, %v4169_v45  ;;  %v10176_v45 = vld [vmem:[#allocation146_spill] sm:$0xff] }
 0xc75   : > { %v4142_v40 = vpop.xlane.xlu0 %4141 }
 0xc76   : > { %2945 = vadd.xlane.f32.xlu1 %v8331_v16  ;;  %v4168_v31 = vsub.f32 %v8782_v3, %v4142_v40  ;;  %v10175_v40 = vld [vmem:[#allocation10_spill] sm:$0xff] }
 0xc77   : > { %v8919_v20 = vpop.xlane.xlu1 %1004 }
 0xc78   : > { %3574 = vadd.xlane.f32.xlu0 %v8539_v33  ;;  %v4189_v16 = vmul.f32 1.442695, %v4168_v31 }
 0xc79   : > { %6046 = vmatpush3.bf16.xpose.msra.mxu1 %v4660_v52  ;;  %v8924_v4 = vpop.xlane.xlu0 %1006 }
 0xc7a   : > { %6161 = vmatprep.subr.msk.bf16.mxu1 %vm224_vm0, %v8709_v61  ;;  %2949 = vadd.xlane.f32.xlu1 %v8351_v32  ;;  %6423 = vpow2.f32 %v4189_v16  ;;  %v4657_v32 = vsel %vm224_vm0, %v8709_v61, 0  ;;  %v4654_v61 = vsel %vm224_vm0, %v8707_v36, 0 }
 0xc7b   : > { %v4140_v58 = vpop.xlane.xlu1 %4139 }
 0xc7c   : > { %v4167_v49 = vsub.f32 %v8777_v63, %v4140_v58  ;;  %3578 = vadd.xlane.f32.xlu0 %v8562_v19 }
 0xc7d   : > { %v8932_v33 = vpop.xlane.xlu0 %1010 }
 0xc7e   : > { %v4187_v30 = vmul.f32 1.442695, %v4167_v49  ;;  %2953 = vadd.xlane.f32.xlu1 %v8357_v54  ;;  %v10177_v49 = vld [vmem:[#allocation15_spill] sm:$0xff] }
 0xc7f   : > { %v4146_v27 = vpop.xlane.xlu1 %4145 }
 0xc80   : > { %6425 = vpow2.f32 %v4187_v30  ;;  %v4170_v3 = vsub.f32 %v8779_v9, %v4146_v27  ;;  %3582 = vadd.xlane.f32.xlu0 %v8571_v44  ;;  %v10178_v27 = vld [vmem:[#allocation149_spill] sm:$0xff] }
 0xc81   : > { %6048 = vmatpush3.bf16.xpose.msra.mxu1 %v4657_v32  ;;  %v4160_v17 = vpop.xlane.xlu0 %4159  ;;  %6427 = vpow2.f32 %v4191_v55 }
 0xc82   : > { %v4193_v63 = vmul.f32 1.442695, %v4170_v3  ;;  %6162 = vmatprep.subr.msk.bf16.mxu1 %vm224_vm0, %v8707_v36  ;;  %3568 = vadd.xlane.f32.xlu1 %v8537_v34  ;;  %v10179_v3 = vld [vmem:[#allocation14_spill] sm:$0xff] }
 0xc83   : > { %v8942_v54 = vpop.xlane.xlu1 %1008 }
 0xc84   : > { %6429 = vpow2.f32 %v4193_v63  ;;  %3586 = vadd.xlane.f32.xlu0 %v8587_v18 }
 0xc85   : > { %v4156_v19 = vpop.xlane.xlu0 %4155 }
 0xc86   : > { %3572 = vadd.xlane.f32.xlu1 %v8548_v8 }
 0xc87   : > { %v4152_v44 = vpop.xlane.xlu1 %4151  ;;  %v8950_v11 = vpop.eup %6423 }
 0xc88   : > { %3590 = vadd.xlane.f32.xlu0 %v8583_v12  ;;  %v4173_v43 = vsub.f32 %v8785_v0, %v4152_v44  ;;  %v4175_v0 = vsub.f32 %v8805_v41, %v4156_v19  ;;  %v10181_v44 = vld [vmem:[#allocation17_spill] sm:$0xff] }
 0xc89   : > { %6050 = vmatpush3.bf16.xpose.msra.mxu1 %v4654_v61  ;;  %v4162_v9 = vpop.xlane.xlu0 %4161 }
 0xc8a   : > { %3576 = vadd.xlane.f32.xlu1 %v8558_v47  ;;  %v4199_v60 = vmul.f32 1.442695, %v4173_v43  ;;  %v4178_v15 = vsub.f32 %v8809_v62, %v4162_v9  ;;  %v4203_v52 = vmul.f32 1.442695, %v4175_v0 }
 0xc8b   : > { %v4148_v34 = vpop.xlane.xlu1 %4147 }
 0xc8c   : > { %3594 = vadd.xlane.f32.xlu0 %v10169_v28  ;;  %v4171_v8 = vsub.f32 %v8789_v25, %v4148_v34  ;;  %v4209_v41 = vmul.f32 1.442695, %v4178_v15  ;;  %v10182_v28 = vld [vmem:[#allocation12_spill] sm:$0xff] }
 0xc8d   : > { %v8953_v46 = vpop.eup %6425  ;;  %v8955_v18 = vpop.xlane.xlu0 %1014 }
 0xc8e   : > { %3580 = vadd.xlane.f32.xlu1 %v10170_v42  ;;  %v4245_v12 = vpack.c.bf16 %v8950_v11, %v8953_v46  ;;  %v8961_v13 = vpop.eup %6427  ;;  %v4195_v25 = vmul.f32 1.442695, %v4171_v8 }
 0xc8f   : > { %v4154_v36 = vpop.xlane.xlu1 %4153 }
 0xc90   : > { %v4174_v47 = vsub.f32 %v8793_v37, %v4154_v36  ;;  %3598 = vadd.xlane.f32.xlu0 %v10171_v59  ;;  %6023 = vmatprep.mubr.bf16.mxu1 %v4245_v12  ;;  %v10173_v37 = vld [vmem:[#allocation11_spill] sm:$0xff]  ;;  %6431 = vpow2.f32 %v4195_v25  ;;  %v10183_v36 = vld [vmem:[#allocation21_spill] sm:$0xff] }
 0xc91   : > { %v8965_v14 = vpop.eup %6429  ;;  %v8968_v22 = vpop.xlane.xlu0 %1018  ;;  %v10184_v59 = vld [vmem:[#allocation13_spill] sm:$0xff] }
 0xc92   : > { %3584 = vadd.xlane.f32.xlu1 %v10172_v38  ;;  %v4246_v57 = vpack.c.bf16 %v8965_v14, %v8961_v13  ;;  %v4201_v1 = vmul.f32 1.442695, %v4174_v47 }
 0xc93   : > { %v4150_v35 = vpop.xlane.xlu1 %4149 }
 0xc94   : > { %v4172_v48 = vsub.f32 %v8797_v21, %v4150_v35  ;;  %452 = vadd.xlane.f32.xlu0 %v10173_v37  ;;  %6024 = vmatmul.mubr.bf16.gmra.mxu1 %v4246_v57  ;;  %6433 = vpow2.f32 %v4201_v1  ;;  %v4177_v21 = vsub.f32 %v8801_v56, %v4160_v17  ;;  %v10180_v17 = vld [vmem:[#allocation9_spill] sm:$0xff]  ;;  %v10185_v57 = vld [vmem:[#allocation19_spill] sm:$0xff]  ;;  %v10186_v37 = vld [vmem:[#allocation16_spill] sm:$0xff] }
 0xc95   : > { %v8975_v6 = vpop.xlane.xlu0 %1022 }
 0xc96   : > { %v4197_v26 = vmul.f32 1.442695, %v4172_v48  ;;  %3588 = vadd.xlane.f32.xlu1 %v10174_v5  ;;  %v4207_v62 = vmul.f32 1.442695, %v4177_v21  ;;  %v10187_v5 = vld [vmem:[#allocation23_spill] sm:$0xff] }
 0xc97   : > { %v8980_v7 = vpop.xlane.xlu1 %1012  ;;  %v10189_v21 = vld [vmem:[#allocation151_spill] sm:$0xff] }
 0xc98   : > { %6435 = vpow2.f32 %v4197_v26  ;;  %456 = vadd.xlane.f32.xlu0 %v10175_v40  ;;  %v10188_v40 = vld [vmem:[#allocation18_spill] sm:$0xff] }
 0xc99   : > { %6437 = vpow2.f32 %v4199_v60  ;;  %v8984_v31 = vpop.xlane.xlu0 %1026 }
 0xc9a   : > { %3592 = vadd.xlane.f32.xlu1 %v10176_v45  ;;  %6439 = vpow2.f32 %v4203_v52 }
 0xc9b   : > { %v4158_v16 = vpop.xlane.xlu1 %4157  ;;  %6441 = vpow2.f32 %v4209_v41  ;;  %v10190_v41 = vld [vmem:[#allocation20_spill] sm:$0xff] }
 0xc9c   : > { %v4176_v58 = vsub.f32 %v8821_v53, %v4158_v16  ;;  %460 = vadd.xlane.f32.xlu0 %v10177_v49  ;;  %v10191_v49 = vld [vmem:[#allocation150_spill] sm:$0xff] }
 0xc9d   : > { %v8989_v30 = vpop.xlane.xlu0 %1641  ;;  %v8996_v53 = vpop.eup %6431 }
 0xc9e   : > { %v4205_v55 = vmul.f32 1.442695, %v4176_v58  ;;  %3596 = vadd.xlane.f32.xlu1 %v10178_v27 }
 0xc9f   : > { %v1017_v56 = vpop.xlane.xlu1 %1016 }
 0xca0   : > { %6443 = vpow2.f32 %v4205_v55  ;;  %464 = vadd.xlane.f32.xlu0 %v10179_v3  ;;  %v10193_v55 = vld [vmem:[#allocation153_spill] sm:$0xff]  ;;  %v10194_v3 = vld [vmem:[#allocation24_spill] sm:$0xff] }
 0xca1   : > { %6445 = vpow2.f32 %v4207_v62  ;;  %v8993_v32 = vpop.xlane.xlu0 %1645  ;;  %v8998_v19 = vpop.eup %6433  ;;  %v10192_v62 = vld [vmem:[#allocation22_spill] sm:$0xff] }
 0xca2   : > { %450 = vadd.xlane.f32.xlu1 %v10180_v17  ;;  %6447 = vrcp.f32 %v8897_v23 }
 0xca3   : > { %v1021_v63 = vpop.xlane.xlu1 %1020  ;;  %6449 = vrcp.f32 %v8919_v20 }
 0xca4   : > { %468 = vadd.xlane.f32.xlu0 %v10181_v44  ;;  %6451 = vrcp.f32 %v8942_v54  ;;  %v10197_v54 = vld [vmem:[#allocation50_spill] sm:$0xff] }
 0xca5   : > { %v9001_v61 = vpop.eup %6435  ;;  %v9003_v9 = vpop.xlane.xlu0 %1649  ;;  %6453 = vrcp.f32 %v8906_v10 }
 0xca6   : > { %v9005_v34 = vpop.eup %6437  ;;  %454 = vadd.xlane.f32.xlu1 %v10182_v28  ;;  %v4247_v8 = vpack.c.bf16 %v9001_v61, %v8996_v53  ;;  %6455 = vrcp.f32 %v8980_v7  ;;  %v10195_v28 = vld [vmem:[#allocation152_spill] sm:$0xff] }
 0xca7   : > { %v9010_v42 = vpop.xlane.xlu1 %1024  ;;  %v4248_v12 = vpack.c.bf16 %v8998_v19, %v9005_v34  ;;  %v9018_v43 = vpop.eup %6439  ;;  %6457 = vrcp.f32 %v8914_v24 }
 0xca8   : > { %472 = vadd.xlane.f32.xlu0 %v10183_v36  ;;  %6027 = vmatprep.mubr.bf16.mxu1 %v4247_v8  ;;  %v9022_v38 = vpop.eup %6441  ;;  %v10196_v8 = vld [vmem:[#allocation155_spill] sm:$0xff]  ;;  %6459 = vrcp.f32 %v1017_v56  ;;  %v10199_v56 = vld [vmem:[#allocation154_spill] sm:$0xff] }
 0xca9   : > { %v9015_v47 = vpop.xlane.xlu0 %1653  ;;  %6028 = vmatmul.mubr.bf16.gmra.mxu1 %v4248_v12  ;;  %6461 = vrcp.f32 %v8903_v2  ;;  %v10200_v2 = vld [vmem:[#allocation157_spill] sm:$0xff] }
 0xcaa   : > { %458 = vadd.xlane.f32.xlu1 %v10184_v59  ;;  %6463 = vrcp.f32 %v1021_v63  ;;  %v10198_v59 = vld [vmem:[#allocation52_spill] sm:$0xff]  ;;  %v10201_v63 = vld [vmem:[#allocation51_spill] sm:$0xff] }
 0xcab   : > { %v9020_v25 = vpop.xlane.xlu1 %1639  ;;  %6465 = vrcp.f32 %v8924_v4 }
 0xcac   : > { %476 = vadd.xlane.f32.xlu0 %v10185_v57  ;;  %6467 = vrcp.f32 %v9010_v42 }
 0xcad   : > { %v9025_v1 = vpop.eup %6443  ;;  %v9027_v35 = vpop.xlane.xlu0 %1657  ;;  %6469 = vrcp.f32 %v8932_v33  ;;  %v10204_v33 = vld [vmem:[#allocation156_spill] sm:$0xff] }
 0xcae   : > { %v9029_v48 = vpop.eup %6445  ;;  %462 = vadd.xlane.f32.xlu1 %v10186_v37  ;;  %v4249_v60 = vpack.c.bf16 %v9025_v1, %v9018_v43  ;;  %6471 = vrcp.f32 %v9020_v25  ;;  %v10206_v25 = vld [vmem:[#allocation55_spill] sm:$0xff] }
 0xcaf   : > { %v9034_v0 = vpop.xlane.xlu1 %1643  ;;  %v4250_v26 = vpack.c.bf16 %v9022_v38, %v9029_v48  ;;  %v6448_v17 = vpop.eup %6447  ;;  %6473 = vrcp.f32 %v8955_v18 }
 0xcb0   : > { %480 = vadd.xlane.f32.xlu0 %v10187_v5  ;;  %6031 = vmatprep.mubr.bf16.mxu1 %v4249_v60  ;;  %v1182_v12 = vmul.f32 %v6448_v17, %v10197_v54  ;;  %v6450_v36 = vpop.eup %6449  ;;  %6475 = vrcp.f32 %v8968_v22 }
 0xcb1   : > { %v9039_v15 = vpop.xlane.xlu0 %1661  ;;  %6032 = vmatmul.mubr.bf16.gmra.mxu1 %v4250_v26  ;;  %v1185_v57 = vmul.f32 %v6450_v36, %v10198_v59  ;;  %v6452_v37 = vpop.eup %6451  ;;  %6477 = vrcp.f32 %v8975_v6 }
 0xcb2   : > { %466 = vadd.xlane.f32.xlu1 %v10188_v40  ;;  %6051 = vmatprep.mubr.msk.bf16.mxu1 %vm224_vm0, %v10189_v21  ;;  %v6454_v26 = vpop.eup %6453  ;;  %v1187_v40 = vmul.f32 %v6452_v37, %v10201_v63  ;;  %v10207_v37 = vld [vmem:[#allocation49_spill] sm:$0xff]  ;;  %v10208_v63 = vld [vmem:[#allocation60_spill] sm:$0xff]  ;;  %6479 = vrcp.f32 %v8984_v31 }
 0xcb3   : > { %v9044_v52 = vpop.xlane.xlu1 %1647  ;;  %v6456_v21 = vpop.eup %6455  ;;  %6481 = vrcp.f32 %v8989_v30 }
 0xcb5   : > { %v9047_v45 = vpop.xlane.xlu0 %1665 }
 0xcb6   : > { %470 = vadd.xlane.f32.xlu1 %v10190_v41  ;;  %v10202_v41 = vld [vmem:[#allocation48_spill] sm:$0xff] }
 0xcb7   : > { %v9050_v16 = vpop.xlane.xlu1 %1651 }
 0xcb9   : > { %v9053_v58 = vpop.xlane.xlu0 %1669  ;;  %6052 = vmatmul.mubr.msk.bf16.vlgmr.msra.gmra.mxu1 %vm224_vm0, %v10191_v49  ;;  %v1181_v49 = vmul.f32 %v6454_v26, %v10202_v41 }
 0xcba   : > { %474 = vadd.xlane.f32.xlu1 %v10192_v62  ;;  %6055 = vmatprep.mubr.msk.bf16.mxu1 %vm224_vm0, %v10193_v55  ;;  %v6458_v62 = vpop.eup %6457 }
 0xcbb   : > { %v9060_v27 = vpop.xlane.xlu1 %1655  ;;  %v6460_v17 = vpop.eup %6459 }
 0xcbc   : > { %v1191_v59 = vmul.f32 %v6460_v17, %v10206_v25 }
 0xcbd   : > { %v9064_v23 = vpop.xlane.xlu0 %2284 }
 0xcbe   : > { %478 = vadd.xlane.f32.xlu1 %v10194_v3  ;;  %v10203_v3 = vld [vmem:[#allocation56_spill] sm:$0xff] }
 0xcbf   : > { %v9067_v20 = vpop.xlane.xlu1 %1659  ;;  %v1189_v42 = vmul.f32 %v6456_v21, %v10203_v3 }
 0xcc1   : > { %v9071_v44 = vpop.xlane.xlu0 %2288  ;;  %6056 = vmatmul.mubr.msk.bf16.gmra.mxu1 %vm224_vm0, %v10195_v28 }
 0xcc2   : > { %6059 = vmatprep.mubr.msk.bf16.mxu1 %vm224_vm0, %v10196_v8  ;;  %v10205_v8 = vld [vmem:[#allocation47_spill] sm:$0xff] }
 0xcc3   : > { %v9077_v10 = vpop.xlane.xlu1 %1663  ;;  %v1183_v54 = vmul.f32 %v6458_v62, %v10205_v8 }
 0xcc5   : > { %v9081_v7 = vpop.xlane.xlu0 %2292 }
 0xcc6   : > { %1215 = vrot.lane.b32.xlu0 %v1182_v12, %s6838_s2  ;;  %v6462_v12 = vpop.eup %6461 }
 0xcc7   : > { %v9084_v24 = vpop.xlane.xlu1 %1667 }
 0xcc9   : > { %v9088_v60 = vpop.xlane.xlu0 %2296  ;;  %6060 = vmatmul.mubr.msk.bf16.gmra.mxu1 %vm224_vm0, %v10199_v56  ;;  %v1184_v56 = vmul.f32 %v6462_v12, %v10207_v37 }
 0xcca   : > { %1221 = vrot.lane.b32.xlu0 %v1185_v57, %s6838_s2  ;;  %6063 = vmatprep.mubr.msk.bf16.mxu1 %vm224_vm0, %v10200_v2  ;;  %v6464_v57 = vpop.eup %6463 }
 0xccb   : > { %v9095_v5 = vpop.xlane.xlu1 %2282  ;;  %v6466_v26 = vpop.eup %6465 }
 0xccc   : > { %v6468_v21 = vpop.eup %6467 }
 0xccd   : > { %v9100_v4 = vpop.xlane.xlu0 %2300  ;;  %v6470_v62 = vpop.eup %6469 }
 0xcce   : > { %1225 = vrot.lane.b32.xlu0 %v1187_v40, %s6838_s2  ;;  %v1193_v40 = vmul.f32 %v6464_v57, %v10208_v63 }
 0xccf   : > { %1213 = vrot.lane.b32.xlu1 %v1181_v49, %s6838_s2  ;;  %v9105_v55 = vpop.xlane.xlu1 %2286  ;;  %v10209_v49 = vld [vmem:[#allocation54_spill] sm:$0xff] }
 0xcd0   : > { %v1186_v22 = vmul.f32 %v6466_v26, %v10209_v49 }
 0xcd1   : > { %v9110_v28 = vpop.xlane.xlu0 %2304  ;;  %6064 = vmatmul.mubr.msk.bf16.gmra.mxu1 %vm224_vm0, %v10204_v33  ;;  %v6472_v33 = vpop.eup %6471 }
 0xcd2   : > { %1229 = vrot.lane.b32.xlu0 %v1189_v42, %s6838_s2  ;;  %v10210_v42 = vld [vmem:[#allocation59_spill] sm:$0xff]  ;;  %v6474_v12 = vpop.eup %6473 }
 0xcd3   : > { %1217 = vrot.lane.b32.xlu1 %v1183_v54, %s6838_s2  ;;  %v9117_v36 = vpop.xlane.xlu1 %2290  ;;  %v1195_v17 = vmul.f32 %v6468_v21, %v10210_v42  ;;  %v10211_v54 = vld [vmem:[#allocation53_spill] sm:$0xff]  ;;  %v6476_v31 = vpop.eup %6475  ;;  %v10215_v42 = vld [vmem:[#allocation62_spill] sm:$0xff] }
 0xcd4   : > { %v1188_v6 = vmul.f32 %v6470_v62, %v10211_v54  ;;  %v10214_v21 = vld [vmem:[#allocation57_spill] sm:$0xff] }
 0xcd5   : > { %v9121_v18 = vpop.xlane.xlu0 %2308  ;;  %v1192_v49 = vmul.f32 %v6476_v31, %v10214_v21  ;;  %v10218_v31 = vld [vmem:[#allocation82_spill] sm:$0xff] }
 0xcd6   : > { %1233 = vrot.lane.b32.xlu0 %v1191_v59, %s6838_s2  ;;  %v10212_v59 = vld [vmem:[#allocation80_spill] sm:$0xff] }
 0xcd7   : > { %1219 = vrot.lane.b32.xlu1 %v1184_v56, %s6838_s2  ;;  %v9126_v2 = vpop.xlane.xlu1 %2294  ;;  %v1824_v57 = vmul.f32 %v6472_v33, %v10212_v59  ;;  %v10213_v56 = vld [vmem:[#allocation58_spill] sm:$0xff] }
 0xcd8   : > { %v1190_v26 = vmul.f32 %v6474_v12, %v10213_v56  ;;  %v10217_v12 = vld [vmem:[#allocation61_spill] sm:$0xff] }
 0xcd9   : > { %v9130_v41 = vpop.xlane.xlu0 %2312 }
 0xcda   : > { %1237 = vrot.lane.b32.xlu0 %v1193_v40, %s6838_s2 }
 0xcdb   : > { %1223 = vrot.lane.b32.xlu1 %v1186_v22, %s6838_s2  ;;  %v9135_v3 = vpop.xlane.xlu1 %2298  ;;  %v6478_v22 = vpop.eup %6477 }
 0xcdc   : > { %v6480_v33 = vpop.eup %6479 }
 0xcdd   : > { %v9139_v8 = vpop.xlane.xlu0 %2927  ;;  %v1196_v59 = vmul.f32 %v6480_v33, %v10217_v12 }
 0xcde   : > { %1241 = vrot.lane.b32.xlu0 %v1195_v17, %s6838_s2  ;;  %v1194_v17 = vmul.f32 %v6478_v22, %v10215_v42 }
 0xcdf   : > { %1227 = vrot.lane.b32.xlu1 %v1188_v6, %s6838_s2  ;;  %v9144_v25 = vpop.xlane.xlu1 %2302 }
 0xce1   : > { %v9148_v37 = vpop.xlane.xlu0 %2931 }
 0xce2   : > { %1856 = vrot.lane.b32.xlu0 %v1824_v57, %s6837_s30  ;;  %v6482_v57 = vpop.eup %6481 }
 0xce3   : > { %1231 = vrot.lane.b32.xlu1 %v1190_v26, %s6838_s2  ;;  %v9153_v63 = vpop.xlane.xlu1 %2306  ;;  %v1825_v21 = vmul.f32 %v6482_v57, %v10218_v31 }
 0xce5   : > { %v9155_v40 = vpop.xlane.xlu0 %2935 }
 0xce7   : > { %1235 = vrot.lane.b32.xlu1 %v1192_v49, %s6838_s2  ;;  %v9159_v62 = vpop.xlane.xlu1 %2310 }
 0xce9   : > { %v9161_v30 = vpop.xlane.xlu0 %2939 }
 0xceb   : > { %1239 = vrot.lane.b32.xlu1 %v1194_v17, %s6838_s2  ;;  %v9165_v54 = vpop.xlane.xlu1 %2925 }
 0xced   : > { %v9167_v6 = vpop.xlane.xlu0 %2943 }
 0xcee   : > { %10216 = vst [vmem:[#allocation43_spill] sm:$0xff] %v9167_v6 }
 0xcef   : > { %1243 = vrot.lane.b32.xlu1 %v1196_v59, %s6838_s2  ;;  %v9171_v56 = vpop.xlane.xlu1 %2929 }
 0xcf1   : > { %v9173_v26 = vpop.xlane.xlu0 %2947 }
 0xcf3   : > { %1858 = vrot.lane.b32.xlu1 %v1825_v21, %s6837_s30  ;;  %v9177_v49 = vpop.xlane.xlu1 %2933 }
 0xcf5   : > { %v9179_v22 = vpop.xlane.xlu0 %2951 }
 0xcf6   : > { %10219 = vst [vmem:[#allocation41_spill] sm:$0xff] %v9179_v22 }
 0xcf7   : > { %v9181_v42 = vpop.xlane.xlu1 %2937 }
 0xcf9   : > { %v9183_v17 = vpop.xlane.xlu0 %2955 }
 0xcfa   : > { %10220 = vst [vmem:[#allocation46_spill] sm:$0xff] %v9183_v17 }
 0xcfb   : > { %v9185_v33 = vpop.xlane.xlu1 %2941 }
 0xcfd   : > { %v9187_v12 = vpop.xlane.xlu0 %3570 }
 0xcfe   : > { %10221 = vst [vmem:[#allocation65_spill] sm:$0xff] %v9187_v12 }
 0xcff   : > { %v9189_v59 = vpop.xlane.xlu1 %2945 }
 0xd01   : > { %v9191_v6 = vpop.xlane.xlu0 %3574  ;;  %4217 = vadd.xlane.f32.xlu0 %v8858_v50 }
 0xd02   : > { %10222 = vst [vmem:[#allocation42_spill] sm:$0xff] %v9191_v6 }
 0xd03   : > { %v9194_v57 = vpop.xlane.xlu1 %2949 }
 0xd05   : > { %v9196_v31 = vpop.xlane.xlu0 %3578  ;;  %4213 = vadd.xlane.f32.xlu0 %v8860_v51 }
 0xd06   : > { %10223 = vst [vmem:[#allocation64_spill] sm:$0xff] %v9196_v31 }
 0xd07   : > { %v9199_v21 = vpop.xlane.xlu1 %2953 }
 0xd09   : > { %v9201_v22 = vpop.xlane.xlu0 %3582  ;;  %4225 = vadd.xlane.f32.xlu0 %v8965_v14 }
 0xd0a   : > { %10224 = vst [vmem:[#allocation44_spill] sm:$0xff] %v9201_v22 }
 0xd0b   : > { %v9204_v17 = vpop.xlane.xlu1 %3568 }
 0xd0d   : > { %v9206_v12 = vpop.xlane.xlu0 %3586  ;;  %4221 = vadd.xlane.f32.xlu0 %v8950_v11 }
 0xd0f   : > { %v9209_v6 = vpop.xlane.xlu1 %3572 }
 0xd11   : > { %v9211_v50 = vpop.xlane.xlu0 %3590  ;;  %4233 = vadd.xlane.f32.xlu0 %v8998_v19 }
 0xd12   : > { %10225 = vst [vmem:[#allocation68_spill] sm:$0xff] %v9211_v50 }
 0xd13   : > { %v9214_v31 = vpop.xlane.xlu1 %3576 }
 0xd15   : > { %v9216_v51 = vpop.xlane.xlu0 %3594  ;;  %4229 = vadd.xlane.f32.xlu0 %v9001_v61 }
 0xd17   : > { %4215 = vadd.xlane.f32.xlu1 %v8863_v29  ;;  %v9220_v14 = vpop.xlane.xlu1 %3580 }
 0xd19   : > { %v9222_v22 = vpop.xlane.xlu0 %3598  ;;  %4241 = vadd.xlane.f32.xlu0 %v9022_v38 }
 0xd1a   : > { %10226 = vst [vmem:[#allocation45_spill] sm:$0xff] %v9222_v22 }
 0xd1b   : > { %4211 = vadd.xlane.f32.xlu1 %v8855_v39  ;;  %v9226_v11 = vpop.xlane.xlu1 %3584 }
 0xd1c   : > { %10227 = vst [vmem:[#allocation70_spill] sm:$0xff] %v9226_v11 }
 0xd1d   : > { %v453_v50 = vpop.xlane.xlu0 %452  ;;  %4237 = vadd.xlane.f32.xlu0 %v9025_v1 }
 0xd1e   : > { %6483 = vrcp.f32 %v453_v50  ;;  %v10231_v50 = vld [vmem:[#allocation28_spill] sm:$0xff] }
 0xd1f   : > { %4223 = vadd.xlane.f32.xlu1 %v8961_v13  ;;  %v9230_v19 = vpop.xlane.xlu1 %3588 }
 0xd20   : > { %10228 = vst [vmem:[#allocation63_spill] sm:$0xff] %v9230_v19 }
 0xd21   : > { %v457_v61 = vpop.xlane.xlu0 %456 }
 0xd22   : > { %6485 = vrcp.f32 %v457_v61 }
 0xd23   : > { %4219 = vadd.xlane.f32.xlu1 %v8953_v46  ;;  %v9233_v29 = vpop.xlane.xlu1 %3592 }
 0xd24   : > { %10229 = vst [vmem:[#allocation73_spill] sm:$0xff] %v9233_v29 }
 0xd25   : > { %v461_v22 = vpop.xlane.xlu0 %460 }
 0xd26   : > { %6487 = vrcp.f32 %v461_v22 }
 0xd27   : > { %4231 = vadd.xlane.f32.xlu1 %v9005_v34  ;;  %v9236_v39 = vpop.xlane.xlu1 %3596  ;;  %v10232_v34 = vld [vmem:[#allocation27_spill] sm:$0xff] }
 0xd28   : > { %10230 = vst [vmem:[#allocation66_spill] sm:$0xff] %v9236_v39 }
 0xd29   : > { %v465_v38 = vpop.xlane.xlu0 %464 }
 0xd2a   : > { %6489 = vrcp.f32 %v465_v38 }
 0xd2b   : > { %v6484_v1 = vpop.eup %6483  ;;  %4227 = vadd.xlane.f32.xlu1 %v8996_v53  ;;  %v451_v13 = vpop.xlane.xlu1 %450 }
 0xd2c   : > { %6491 = vrcp.f32 %v451_v13  ;;  %v604_v19 = vmul.f32 %v6484_v1, %v10231_v50  ;;  %v10233_v1 = vld [vmem:[#allocation32_spill] sm:$0xff] }
 0xd2d   : > { %v469_v61 = vpop.xlane.xlu0 %468 }
 0xd2e   : > { %6493 = vrcp.f32 %v469_v61  ;;  %620 = vst.msk [vmem:[#allocation2 + $0x8] sm:$0xff] %vm224_vm0, %v604_v19  ;;  %v10234_v61 = vld [vmem:[#allocation31_spill] sm:$0xff] }
 0xd2f   : > { %v6486_v46 = vpop.eup %6485  ;;  %4239 = vadd.xlane.f32.xlu1 %v9029_v48  ;;  %v455_v22 = vpop.xlane.xlu1 %454 }
 0xd30   : > { %6495 = vrcp.f32 %v455_v22  ;;  %v606_v39 = vmul.f32 %v6486_v46, %v10232_v34 }
 0xd31   : > { %v473_v29 = vpop.xlane.xlu0 %472 }
 0xd32   : > { %6497 = vrcp.f32 %v473_v29  ;;  %622 = vst.msk [vmem:[#allocation2 + $0x18] sm:$0xff] %vm224_vm0, %v606_v39  ;;  %v10235_v39 = vld [vmem:[#allocation26_spill] sm:$0xff] }
 0xd33   : > { %v6488_v53 = vpop.eup %6487  ;;  %4235 = vadd.xlane.f32.xlu1 %v9018_v43  ;;  %v459_v38 = vpop.xlane.xlu1 %458 }
 0xd34   : > { %6499 = vrcp.f32 %v459_v38  ;;  %v608_v13 = vmul.f32 %v6488_v53, %v10233_v1  ;;  %v10236_v53 = vld [vmem:[#allocation36_spill] sm:$0xff] }
 0xd35   : > { %v477_v50 = vpop.xlane.xlu0 %476 }
 0xd36   : > { %6501 = vrcp.f32 %v477_v50  ;;  %624 = vst.msk [vmem:[#allocation2 + $0x28] sm:$0xff] %vm224_vm0, %v608_v13 }
 0xd37   : > { %v6490_v48 = vpop.eup %6489  ;;  %v463_v19 = vpop.xlane.xlu1 %462 }
 0xd38   : > { %6503 = vrcp.f32 %v463_v19  ;;  %v610_v46 = vmul.f32 %v6490_v48, %v10234_v61  ;;  %v10237_v48 = vld [vmem:[#allocation25_spill] sm:$0xff] }
 0xd39   : > { %v6492_v22 = vpop.eup %6491  ;;  %v481_v29 = vpop.xlane.xlu0 %480 }
 0xd3a   : > { %6505 = vrcp.f32 %v481_v29  ;;  %v603_v34 = vmul.f32 %v6492_v22, %v10235_v39  ;;  %626 = vst.msk [vmem:[#allocation2 + $0x38] sm:$0xff] %vm224_vm0, %v610_v46  ;;  %v10238_v46 = vld [vmem:[#allocation35_spill] sm:$0xff] }
 0xd3b   : > { %v6494_v43 = vpop.eup %6493  ;;  %v467_v38 = vpop.xlane.xlu1 %466 }
 0xd3c   : > { %6507 = vrcp.f32 %v467_v38  ;;  %619 = vst.msk [vmem:[#allocation2] sm:$0xff] %vm224_vm0, %v603_v34  ;;  %v612_v1 = vmul.f32 %v6494_v43, %v10236_v53  ;;  %v10239_v34 = vld [vmem:[#allocation30_spill] sm:$0xff] }
 0xd3d   : > { %v6496_v13 = vpop.eup %6495  ;;  %v1216_v50 = vpop.permute.xlu0 %1215 }
 0xd3e   : > { %1263 = vst.msk [vmem:[#allocation2 + $0x8] sm:$0xff] %vm1261_vm1, %v1216_v50  ;;  %v605_v19 = vmul.f32 %v6496_v13, %v10237_v48  ;;  %v10240_v13 = vld [vmem:[#allocation40_spill] sm:$0xff] }
 0xd3f   : > { %628 = vst.msk [vmem:[#allocation2 + $0x48] sm:$0xff] %vm224_vm0, %v612_v1  ;;  %v6498_v61 = vpop.eup %6497  ;;  %v471_v22 = vpop.xlane.xlu1 %470 }
 0xd40   : > { %6509 = vrcp.f32 %v471_v22  ;;  %621 = vst.msk [vmem:[#allocation2 + $0x10] sm:$0xff] %vm224_vm0, %v605_v19  ;;  %v614_v29 = vmul.f32 %v6498_v61, %v10238_v46  ;;  %v10241_v19 = vld [vmem:[#allocation29_spill] sm:$0xff] }
 0xd41   : > { %v6500_v39 = vpop.eup %6499  ;;  %v1222_v38 = vpop.permute.xlu0 %1221 }
 0xd42   : > { %v607_v11 = vmul.f32 %v6500_v39, %v10239_v34  ;;  %630 = vst.msk [vmem:[#allocation2 + $0x58] sm:$0xff] %vm224_vm0, %v614_v29  ;;  %v10242_v29 = vld [vmem:[#allocation39_spill] sm:$0xff] }
 0xd43   : > { %v6502_v43 = vpop.eup %6501  ;;  %v475_v53 = vpop.xlane.xlu1 %474 }
 0xd44   : > { %623 = vst.msk [vmem:[#allocation2 + $0x20] sm:$0xff] %vm224_vm0, %v607_v11  ;;  %6511 = vrcp.f32 %v475_v53  ;;  %v616_v1 = vmul.f32 %v6502_v43, %v10240_v13  ;;  %v10243_v43 = vld [vmem:[#allocation34_spill] sm:$0xff] }
 0xd45   : > { %v6504_v50 = vpop.eup %6503  ;;  %1266 = vst.msk [vmem:[#allocation2 + $0x20] sm:$0xff] %vm1261_vm1, %v1222_v38  ;;  %v1226_v48 = vpop.permute.xlu0 %1225 }
 0xd46   : > { %v609_v22 = vmul.f32 %v6504_v50, %v10241_v19  ;;  %632 = vst.msk [vmem:[#allocation2 + $0x68] sm:$0xff] %vm224_vm0, %v616_v1  ;;  %v9271_v1 = vpop.f32.mrf.mxu1  ;;  %v10245_v19 = vld [vmem:[#allocation33_spill] sm:$0xff] }
 0xd47   : > { %v6506_v61 = vpop.eup %6505  ;;  %v479_v46 = vpop.xlane.xlu1 %478  ;;  %10244 = vst [vmem:[#allocation72_spill] sm:$0xff] %v9271_v1 }
 0xd48   : > { %625 = vst.msk [vmem:[#allocation2 + $0x30] sm:$0xff] %vm224_vm0, %v609_v22  ;;  %6513 = vrcp.f32 %v479_v46  ;;  %v618_v39 = vmul.f32 %v6506_v61, %v10242_v29  ;;  %v9277_v46 = vpop.f32.mrf.mxu1 }
 0xd49   : > { %v6508_v34 = vpop.eup %6507  ;;  %1268 = vst.msk [vmem:[#allocation2 + $0x30] sm:$0xff] %vm1261_vm1, %v1226_v48  ;;  %v1230_v11 = vpop.permute.xlu0 %1229  ;;  %10246 = vst [vmem:[#allocation67_spill] sm:$0xff] %v9277_v46  ;;  %6515 = vrcp.f32 %v8993_v32  ;;  %v10267_v32 = vld [vmem:[#allocation81_spill] sm:$0xff] }
 0xd4a   : > { %v611_v53 = vmul.f32 %v6508_v34, %v10243_v43  ;;  %634 = vst.msk [vmem:[#allocation2 + $0x78] sm:$0xff] %vm224_vm0, %v618_v39  ;;  %v10247_v39 = vld [vmem:[#allocation38_spill] sm:$0xff]  ;;  %6517 = vrcp.f32 %v9003_v9 }
 0xd4b   : > { %v1214_v38 = vpop.permute.xlu1 %1213  ;;  %6519 = vrcp.f32 %v9034_v0 }
 0xd4c   : > { %627 = vst.msk [vmem:[#allocation2 + $0x40] sm:$0xff] %vm224_vm0, %v611_v53  ;;  %v9283_v53 = vpop.f32.mrf.mxu1  ;;  %6521 = vrcp.f32 %v9015_v47  ;;  %v10268_v47 = vld [vmem:[#allocation86_spill] sm:$0xff] }
 0xd4d   : > { %1262 = vst.msk [vmem:[#allocation2] sm:$0xff] %vm1261_vm1, %v1214_v38  ;;  %v6510_v13 = vpop.eup %6509  ;;  %1270 = vst.msk [vmem:[#allocation2 + $0x40] sm:$0xff] %vm1261_vm1, %v1230_v11  ;;  %v1234_v50 = vpop.permute.xlu0 %1233  ;;  %6523 = vrcp.f32 %v9044_v52 }
 0xd4e   : > { %v613_v22 = vmul.f32 %v6510_v13, %v10245_v19  ;;  %10248 = vst [vmem:[#allocation77_spill] sm:$0xff] %v9283_v53  ;;  %v10249_v13 = vld [vmem:[#allocation37_spill] sm:$0xff]  ;;  %6525 = vrcp.f32 %v9027_v35  ;;  %v10269_v35 = vld [vmem:[#allocation79_spill] sm:$0xff] }
 0xd4f   : > { %v1218_v61 = vpop.permute.xlu1 %1217  ;;  %6527 = vrcp.f32 %v9050_v16 }
 0xd50   : > { %629 = vst.msk [vmem:[#allocation2 + $0x50] sm:$0xff] %vm224_vm0, %v613_v22  ;;  %6529 = vrcp.f32 %v9039_v15 }
 0xd51   : > { %1264 = vst.msk [vmem:[#allocation2 + $0x10] sm:$0xff] %vm1261_vm1, %v1218_v61  ;;  %v6512_v48 = vpop.eup %6511  ;;  %1272 = vst.msk [vmem:[#allocation2 + $0x50] sm:$0xff] %vm1261_vm1, %v1234_v50  ;;  %v1238_v29 = vpop.permute.xlu0 %1237  ;;  %6531 = vrcp.f32 %v9060_v27 }
 0xd52   : > { %v615_v34 = vmul.f32 %v6512_v48, %v10247_v39  ;;  %v9289_v50 = vpop.f32.mrf.mxu1  ;;  %6533 = vrcp.f32 %v9047_v45  ;;  %v10271_v45 = vld [vmem:[#allocation84_spill] sm:$0xff] }
 0xd53   : > { %v1220_v43 = vpop.permute.xlu1 %1219  ;;  %10250 = vst [vmem:[#allocation69_spill] sm:$0xff] %v9289_v50  ;;  %6535 = vrcp.f32 %v9067_v20  ;;  %v10272_v20 = vld [vmem:[#allocation90_spill] sm:$0xff] }
 0xd54   : > { %631 = vst.msk [vmem:[#allocation2 + $0x60] sm:$0xff] %vm224_vm0, %v615_v34  ;;  %v9293_v48 = vpop.f32.mrf.mxu1  ;;  %6537 = vrcp.f32 %v9053_v58  ;;  %v10273_v58 = vld [vmem:[#allocation83_spill] sm:$0xff] }
 0xd55   : > { %1265 = vst.msk [vmem:[#allocation2 + $0x18] sm:$0xff] %vm1261_vm1, %v1220_v43  ;;  %v6514_v11 = vpop.eup %6513  ;;  %1274 = vst.msk [vmem:[#allocation2 + $0x60] sm:$0xff] %vm1261_vm1, %v1238_v29  ;;  %v1242_v38 = vpop.permute.xlu0 %1241  ;;  %6539 = vrcp.f32 %v9077_v10  ;;  %v10274_v10 = vld [vmem:[#allocation89_spill] sm:$0xff] }
 0xd56   : > { %v617_v19 = vmul.f32 %v6514_v11, %v10249_v13  ;;  %10251 = vst [vmem:[#allocation76_spill] sm:$0xff] %v9293_v48  ;;  %v9296_v29 = vpop.f32.mrf.mxu1  ;;  %6541 = vrcp.f32 %v9064_v23  ;;  %v10275_v23 = vld [vmem:[#allocation88_spill] sm:$0xff] }
 0xd57   : > { %v1224_v22 = vpop.permute.xlu1 %1223  ;;  %10252 = vst [vmem:[#allocation71_spill] sm:$0xff] %v9296_v29  ;;  %6543 = vrcp.f32 %v9084_v24  ;;  %v10276_v24 = vld [vmem:[#allocation94_spill] sm:$0xff] }
 0xd58   : > { %633 = vst.msk [vmem:[#allocation2 + $0x70] sm:$0xff] %vm224_vm0, %v617_v19  ;;  %v9299_v43 = vpop.f32.mrf.mxu1  ;;  %6545 = vrcp.f32 %v9071_v44  ;;  %v10277_v44 = vld [vmem:[#allocation87_spill] sm:$0xff] }
 0xd59   : > { %1267 = vst.msk [vmem:[#allocation2 + $0x28] sm:$0xff] %vm1261_vm1, %v1224_v22  ;;  %1276 = vst.msk [vmem:[#allocation2 + $0x70] sm:$0xff] %vm1261_vm1, %v1242_v38  ;;  %v1857_v61 = vpop.permute.xlu0 %1856 }
 0xd5a   : > { %1905 = vst.msk [vmem:[#allocation2] sm:$0xff] %vm1904_vm2, %v1857_v61  ;;  %10253 = vst [vmem:[#allocation97_spill] sm:$0xff] %v9299_v43  ;;  %v9302_v13 = vpop.f32.mrf.mxu1 }
 0xd5b   : > { %v1228_v39 = vpop.permute.xlu1 %1227  ;;  %10254 = vst [vmem:[#allocation74_spill] sm:$0xff] %v9302_v13 }
 0xd5c   : > { %1269 = vst.msk [vmem:[#allocation2 + $0x38] sm:$0xff] %vm1261_vm1, %v1228_v39 }
 0xd5f   : > { %v1232_v34 = vpop.permute.xlu1 %1231 }
 0xd60   : > { %1271 = vst.msk [vmem:[#allocation2 + $0x48] sm:$0xff] %vm1261_vm1, %v1232_v34 }
 0xd63   : > { %v1236_v11 = vpop.permute.xlu1 %1235 }
 0xd64   : > { %1273 = vst.msk [vmem:[#allocation2 + $0x58] sm:$0xff] %vm1261_vm1, %v1236_v11 }
 0xd67   : > { %v1240_v38 = vpop.permute.xlu1 %1239 }
 0xd68   : > { %1275 = vst.msk [vmem:[#allocation2 + $0x68] sm:$0xff] %vm1261_vm1, %v1240_v38 }
 0xd69   : > { %v9305_v19 = vpop.f32.mrf.mxu1 }
 0xd6a   : > { %10255 = vst [vmem:[#allocation96_spill] sm:$0xff] %v9305_v19 }
 0xd6b   : > { %v9307_v22 = vpop.f32.mrf.mxu1  ;;  %v1244_v61 = vpop.permute.xlu1 %1243 }
 0xd6c   : > { %10256 = vst [vmem:[#allocation75_spill] sm:$0xff] %v9307_v22  ;;  %1277 = vst.msk [vmem:[#allocation2 + $0x78] sm:$0xff] %vm1261_vm1, %v1244_v61 }
 0xd6d   : > { %v9310_v39 = vpop.f32.mrf.mxu1 }
 0xd6e   : > { %10257 = vst [vmem:[#allocation100_spill] sm:$0xff] %v9310_v39 }
 0xd6f   : > { %v9312_v34 = vpop.f32.mrf.mxu1  ;;  %v1859_v48 = vpop.permute.xlu1 %1858 }
 0xd70   : > { %10258 = vst [vmem:[#allocation78_spill] sm:$0xff] %v9312_v34  ;;  %1906 = vst.msk [vmem:[#allocation2 + $0x8] sm:$0xff] %vm1904_vm2, %v1859_v48 }
 0xd71   : > { %v9315_v11 = vpop.f32.mrf.mxu1 }
 0xd72   : > { %10259 = vst [vmem:[#allocation102_spill] sm:$0xff] %v9315_v11 }
 0xd73   : > { %v9317_v29 = vpop.f32.mrf.mxu1 }
 0xd74   : > { %10260 = vst [vmem:[#allocation95_spill] sm:$0xff] %v9317_v29 }
 0xd75   : > { %v9319_v43 = vpop.f32.mrf.mxu1 }
 0xd76   : > { %10261 = vst [vmem:[#allocation105_spill] sm:$0xff] %v9319_v43 }
 0xd77   : > { %v9321_v38 = vpop.f32.mrf.mxu1 }
 0xd78   : > { %10262 = vst [vmem:[#allocation98_spill] sm:$0xff] %v9321_v38 }
 0xd79   : > { %v9323_v19 = vpop.f32.mrf.mxu1 }
 0xd7a   : > { %4778 = vmax.xlane.f32.xlu0 %v9323_v19 }
 0xd7b   : > { %v9326_v61 = vpop.f32.mrf.mxu1 }
 0xd7d   : > { %v9328_v22 = vpop.f32.mrf.mxu1 }
 0xd7e   : > { %4774 = vmax.xlane.f32.xlu0 %v9326_v61 }
 0xd7f   : > { %v9331_v39 = vpop.f32.mrf.mxu1 }
 0xd80   : > { %4776 = vmax.xlane.f32.xlu1 %v9331_v39 }
 0xd81   : > { %v9334_v48 = vpop.f32.mrf.mxu1 }
 0xd82   : > { %4780 = vmax.xlane.f32.xlu0 %v9328_v22 }
 0xd83   : > { %v9337_v11 = vpop.f32.mrf.mxu1 }
 0xd84   : > { %4786 = vmax.xlane.f32.xlu1 %v9334_v48 }
 0xd85   : > { %v9340_v29 = vpop.f32.mrf.mxu1 }
 0xd86   : > { %4788 = vmax.xlane.f32.xlu0 %v9340_v29 }
 0xd87   : > { %v9343_v43 = vpop.f32.mrf.mxu1 }
 0xd88   : > { %4782 = vmax.xlane.f32.xlu1 %v9337_v11 }
 0xd89   : > { %v9346_v38 = vpop.f32.mrf.mxu1 }
 0xd8a   : > { %10263 = vst [vmem:[#allocation104_spill] sm:$0xff] %v9346_v38  ;;  %4784 = vmax.xlane.f32.xlu0 %v9343_v43 }
 0xd8b   : > { %v9349_v34 = vpop.f32.mrf.mxu1 }
 0xd8c   : > { %4794 = vmax.xlane.f32.xlu1 %v9346_v38 }
 0xd8d   : > { %v9352_v1 = vpop.f32.mrf.mxu1 }
 0xd8e   : > { %4796 = vmax.xlane.f32.xlu0 %v9352_v1 }
 0xd8f   : > { %v9355_v13 = vpop.f32.mrf.mxu1 }
 0xd90   : > { %4790 = vmax.xlane.f32.xlu1 %v9349_v34 }
 0xd91   : > { %v9358_v53 = vpop.f32.mrf.mxu1 }
 0xd92   : > { %10264 = vst [vmem:[#allocation99_spill] sm:$0xff] %v9358_v53  ;;  %4792 = vmax.xlane.f32.xlu0 %v9355_v13 }
 0xd93   : > { %v9361_v46 = vpop.f32.mrf.mxu1 }
 0xd94   : > { %10265 = vst [vmem:[#allocation109_spill] sm:$0xff] %v9361_v46  ;;  %4802 = vmax.xlane.f32.xlu1 %v9358_v53  ;;  %v6516_v53 = vpop.eup %6515  ;;  %6547 = vrcp.f32 %v9095_v5  ;;  %v10278_v5 = vld [vmem:[#allocation93_spill] sm:$0xff] }
 0xd95   : > { %v9364_v50 = vpop.f32.mrf.mxu1 }
 0xd96   : > { %10266 = vst [vmem:[#allocation101_spill] sm:$0xff] %v9364_v50  ;;  %4804 = vmax.xlane.f32.xlu0 %v9364_v50  ;;  %v6518_v50 = vpop.eup %6517  ;;  %6549 = vrcp.f32 %v9081_v7  ;;  %v10279_v7 = vld [vmem:[#allocation92_spill] sm:$0xff] }
 0xd97   : > { %v9369_v38 = vpop.f32.mrf.mxu1  ;;  %v6520_v9 = vpop.eup %6519  ;;  %v1829_v0 = vmul.f32 %v6518_v50, %v10268_v47  ;;  %6551 = vrcp.f32 %v9105_v55  ;;  %v10280_v55 = vld [vmem:[#allocation114_spill] sm:$0xff] }
 0xd98   : > { %4798 = vmax.xlane.f32.xlu1 %v9361_v46  ;;  %v1827_v46 = vmul.f32 %v6516_v53, %v10267_v32  ;;  %v6522_v52 = vpop.eup %6521  ;;  %v1826_v16 = vmul.f32 %v6520_v9, %v10269_v35  ;;  %v10270_v53 = vld [vmem:[#allocation85_spill] sm:$0xff]  ;;  %6553 = vrcp.f32 %v9088_v60  ;;  %v10281_v60 = vld [vmem:[#allocation91_spill] sm:$0xff] }
 0xd99   : > { %v6524_v15 = vpop.eup %6523  ;;  %v1831_v32 = vmul.f32 %v6522_v52, %v10270_v53  ;;  %6555 = vrcp.f32 %v9117_v36  ;;  %v10282_v36 = vld [vmem:[#allocation113_spill] sm:$0xff] }
 0xd9a   : > { %4800 = vmax.xlane.f32.xlu0 %v9369_v38  ;;  %v1828_v27 = vmul.f32 %v6524_v15, %v10271_v45 }
 0xda9   : > { %1862 = vrot.lane.b32.xlu1 %v1827_v46, %s6837_s30  ;;  %v6526_v46 = vpop.eup %6525  ;;  %6557 = vrcp.f32 %v9100_v4  ;;  %v10283_v4 = vld [vmem:[#allocation112_spill] sm:$0xff] }
 0xdaa   : > { %v6528_v50 = vpop.eup %6527  ;;  %v1833_v47 = vmul.f32 %v6526_v46, %v10272_v20  ;;  %6559 = vrcp.f32 %v9126_v2  ;;  %v10284_v2 = vld [vmem:[#allocation118_spill] sm:$0xff] }
 0xdab   : > { %v6530_v9 = vpop.eup %6529  ;;  %6561 = vrcp.f32 %v9110_v28  ;;  %v10285_v28 = vld [vmem:[#allocation111_spill] sm:$0xff] }
 0xdac   : > { %v6532_v52 = vpop.eup %6531  ;;  %v1835_v35 = vmul.f32 %v6530_v9, %v10274_v10  ;;  %6563 = vrcp.f32 %v9135_v3  ;;  %v10286_v3 = vld [vmem:[#allocation117_spill] sm:$0xff] }
 0xdad   : > { %1866 = vrot.lane.b32.xlu1 %v1829_v0, %s6837_s30  ;;  %v1830_v0 = vmul.f32 %v6528_v50, %v10273_v58  ;;  %v1832_v15 = vmul.f32 %v6532_v52, %v10275_v23 }
 0xdb0   : > { %1860 = vrot.lane.b32.xlu0 %v1826_v16, %s6837_s30  ;;  %v6534_v16 = vpop.eup %6533  ;;  %6565 = vrcp.f32 %v9121_v18  ;;  %v10287_v18 = vld [vmem:[#allocation116_spill] sm:$0xff] }
 0xdb1   : > { %1870 = vrot.lane.b32.xlu1 %v1831_v32, %s6837_s30  ;;  %v6536_v53 = vpop.eup %6535  ;;  %v1837_v32 = vmul.f32 %v6534_v16, %v10276_v24  ;;  %6567 = vrcp.f32 %v9144_v25  ;;  %v10288_v25 = vld [vmem:[#allocation122_spill] sm:$0xff] }
 0xdb2   : > { %v6538_v46 = vpop.eup %6537  ;;  %v1834_v45 = vmul.f32 %v6536_v53, %v10277_v44  ;;  %6569 = vrcp.f32 %v9130_v41  ;;  %v9444_v41 = vpop.xlane.xlu0 %4217 }
 0xdb3   : > { %v1839_v50 = vmul.f32 %v6538_v46, %v10278_v5 }
 0xdb4   : > { %1864 = vrot.lane.b32.xlu0 %v1828_v27, %s6837_s30  ;;  %v6540_v27 = vpop.eup %6539  ;;  %6571 = vrcp.f32 %v9153_v63  ;;  %v10290_v63 = vld [vmem:[#allocation121_spill] sm:$0xff] }
 0xdb5   : > { %1874 = vrot.lane.b32.xlu1 %v1833_v47, %s6837_s30  ;;  %v6542_v20 = vpop.eup %6541  ;;  %v1836_v47 = vmul.f32 %v6540_v27, %v10279_v7  ;;  %6573 = vrcp.f32 %v9139_v8  ;;  %v10289_v7 = vld [vmem:[#allocation115_spill] sm:$0xff]  ;;  %v10291_v8 = vld [vmem:[#allocation120_spill] sm:$0xff] }
 0xdb6   : > { %v6544_v9 = vpop.eup %6543  ;;  %v2468_v58 = vmul.f32 %v6542_v20, %v10280_v55  ;;  %6575 = vrcp.f32 %v9159_v62  ;;  %v9456_v62 = vpop.xlane.xlu0 %4213 }
 0xdb7   : > { %v1838_v52 = vmul.f32 %v6544_v9, %v10281_v60 }
 0xdb8   : > { %1868 = vrot.lane.b32.xlu0 %v1830_v0, %s6837_s30  ;;  %v6546_v0 = vpop.eup %6545  ;;  %6577 = vrcp.f32 %v9148_v37 }
 0xdb9   : > { %1878 = vrot.lane.b32.xlu1 %v1835_v35, %s6837_s30  ;;  %v6548_v10 = vpop.eup %6547  ;;  %v2470_v35 = vmul.f32 %v6546_v0, %v10282_v36  ;;  %6579 = vrcp.f32 %v9165_v54 }
 0xdba   : > { %v6550_v16 = vpop.eup %6549  ;;  %v2467_v23 = vmul.f32 %v6548_v10, %v10283_v4  ;;  %6581 = vrcp.f32 %v9155_v40  ;;  %v10292_v10 = vld [vmem:[#allocation126_spill] sm:$0xff]  ;;  %v10294_v4 = vld [vmem:[#allocation125_spill] sm:$0xff] }
 0xdbb   : > { %v2472_v53 = vmul.f32 %v6550_v16, %v10284_v2 }
 0xdbc   : > { %1872 = vrot.lane.b32.xlu0 %v1832_v15, %s6837_s30  ;;  %v6552_v15 = vpop.eup %6551  ;;  %6583 = vrcp.f32 %v9171_v56 }
 0xdbd   : > { %1882 = vrot.lane.b32.xlu1 %v1837_v32, %s6837_s30  ;;  %v6554_v24 = vpop.eup %6553  ;;  %v2469_v32 = vmul.f32 %v6552_v15, %v10285_v28  ;;  %6585 = vrcp.f32 %v9161_v30  ;;  %v9468_v15 = vpop.xlane.xlu0 %4225  ;;  %v10296_v28 = vld [vmem:[#allocation43_spill] sm:$0xff] }
 0xdbe   : > { %v6556_v46 = vpop.eup %6555  ;;  %v2474_v44 = vmul.f32 %v6554_v24, %v10286_v3  ;;  %6587 = vrcp.f32 %v9177_v49  ;;  %v10298_v3 = vld [vmem:[#allocation123_spill] sm:$0xff] }
 0xdbf   : > { %v2471_v27 = vmul.f32 %v6556_v46, %v10287_v18 }
 0xdc0   : > { %1876 = vrot.lane.b32.xlu0 %v1834_v45, %s6837_s30  ;;  %v6558_v45 = vpop.eup %6557  ;;  %6589 = vrcp.f32 %v10296_v28  ;;  %v10310_v28 = vld [vmem:[#allocation42_spill] sm:$0xff] }
 0xdc1   : > { %1886 = vrot.lane.b32.xlu1 %v1839_v50, %s6837_s30  ;;  %v6560_v5 = vpop.eup %6559  ;;  %v2476_v50 = vmul.f32 %v6558_v45, %v10288_v25  ;;  %6591 = vrcp.f32 %v9181_v42  ;;  %v9482_v49 = vpop.xlane.xlu0 %4221 }
 0xdc2   : > { %v6562_v20 = vpop.eup %6561  ;;  %6593 = vrcp.f32 %v9173_v26 }
 0xdc3   : > { %v6564_v9 = vpop.eup %6563  ;;  %v2478_v55 = vmul.f32 %v6562_v20, %v10290_v63  ;;  %6595 = vrcp.f32 %v9185_v33 }
 0xdc4   : > { %1880 = vrot.lane.b32.xlu0 %v1836_v47, %s6837_s30  ;;  %v2473_v47 = vmul.f32 %v6560_v5, %v10289_v7  ;;  %v2475_v0 = vmul.f32 %v6564_v9, %v10291_v8  ;;  %v10301_v7 = vld [vmem:[#allocation41_spill] sm:$0xff] }
 0xdc5   : > { %2501 = vrot.lane.b32.xlu1 %v2468_v58, %s6836_s28  ;;  %v6566_v58 = vpop.eup %6565  ;;  %6597 = vrcp.f32 %v10301_v7  ;;  %v9494_v63 = vpop.xlane.xlu0 %4233 }
 0xdc6   : > { %v6568_v60 = vpop.eup %6567  ;;  %v2480_v37 = vmul.f32 %v6566_v58, %v10292_v10  ;;  %6599 = vrcp.f32 %v9189_v59  ;;  %v10303_v58 = vld [vmem:[#allocation127_spill] sm:$0xff] }
 0xdc7   : > { %v6570_v36 = vpop.eup %6569 }
 0xdc8   : > { %1884 = vrot.lane.b32.xlu0 %v1838_v52, %s6837_s30  ;;  %v9458_v52 = vpop.xlane.xlu1 %4215  ;;  %v6572_v16 = vpop.eup %6571  ;;  %v2482_v40 = vmul.f32 %v6570_v36, %v10294_v4  ;;  %v10306_v36 = vld [vmem:[#allocation132_spill] sm:$0xff] }
 0xdc9   : > { %2505 = vrot.lane.b32.xlu1 %v2470_v35, %s6836_s28  ;;  %v10293_v35 = vld [vmem:[#allocation119_spill] sm:$0xff]  ;;  %v9508_v59 = vpop.xlane.xlu0 %4229 }
 0xdca   : > { %v2477_v54 = vmul.f32 %v6568_v60, %v10293_v35  ;;  %v10305_v60 = vld [vmem:[#allocation133_spill] sm:$0xff] }
 0xdcc   : > { %2499 = vrot.lane.b32.xlu0 %v2467_v23, %s6836_s28  ;;  %v6574_v23 = vpop.eup %6573  ;;  %v9470_v2 = vpop.xlane.xlu1 %4211 }
 0xdcd   : > { %2509 = vrot.lane.b32.xlu1 %v2472_v53, %s6836_s28  ;;  %v10295_v53 = vld [vmem:[#allocation124_spill] sm:$0xff]  ;;  %v6576_v24 = vpop.eup %6575 }
 0xdce   : > { %v2479_v56 = vmul.f32 %v6572_v16, %v10295_v53  ;;  %v6578_v46 = vpop.eup %6577  ;;  %v10307_v16 = vld [vmem:[#allocation65_spill] sm:$0xff] }
 0xdcf   : > { %v6580_v45 = vpop.eup %6579 }
 0xdd0   : > { %2503 = vrot.lane.b32.xlu0 %v2469_v32, %s6836_s28  ;;  %v10297_v32 = vld [vmem:[#allocation130_spill] sm:$0xff]  ;;  %v9484_v18 = vpop.xlane.xlu1 %4223  ;;  %v6582_v25 = vpop.eup %6581 }
 0xdd1   : > { %2513 = vrot.lane.b32.xlu1 %v2474_v44, %s6836_s28  ;;  %v3111_v30 = vmul.f32 %v6574_v23, %v10297_v32  ;;  %v2481_v44 = vmul.f32 %v6576_v24, %v10298_v3  ;;  %v6584_v20 = vpop.eup %6583  ;;  %v10311_v32 = vld [vmem:[#allocation137_spill] sm:$0xff]  ;;  %v9520_v3 = vpop.xlane.xlu0 %4241 }
 0xdd2   : > { %v6586_v9 = vpop.eup %6585  ;;  %v3112_v33 = vmul.f32 %v6584_v20, %v10303_v58  ;;  %v10315_v20 = vld [vmem:[#allocation135_spill] sm:$0xff]  ;;  %v10317_v58 = vld [vmem:[#allocation141_spill] sm:$0xff] }
 0xdd3   : > { %v6588_v8 = vpop.eup %6587  ;;  %v3117_v10 = vmul.f32 %v6586_v9, %v10305_v60 }
 0xdd4   : > { %2507 = vrot.lane.b32.xlu0 %v2471_v27, %s6836_s28  ;;  %v10299_v27 = vld [vmem:[#allocation129_spill] sm:$0xff]  ;;  %v3114_v35 = vmul.f32 %v6588_v8, %v10306_v36 }
 0xdd5   : > { %2517 = vrot.lane.b32.xlu1 %v2476_v50, %s6836_s28  ;;  %v3113_v5 = vmul.f32 %v6578_v46, %v10299_v27  ;;  %v10300_v50 = vld [vmem:[#allocation128_spill] sm:$0xff] }
 0xdd6   : > { %v3110_v42 = vmul.f32 %v6580_v45, %v10300_v50  ;;  %v10312_v45 = vld [vmem:[#allocation136_spill] sm:$0xff] }
 0xdd8   : > { %2511 = vrot.lane.b32.xlu0 %v2473_v47, %s6836_s28  ;;  %v10302_v47 = vld [vmem:[#allocation134_spill] sm:$0xff] }
 0xdd9   : > { %2521 = vrot.lane.b32.xlu1 %v2478_v55, %s6836_s28  ;;  %v3115_v26 = vmul.f32 %v6582_v25, %v10302_v47  ;;  %v9496_v55 = vpop.xlane.xlu1 %4219  ;;  %v10314_v25 = vld [vmem:[#allocation142_spill] sm:$0xff] }
 0xddc   : > { %2515 = vrot.lane.b32.xlu0 %v2475_v0, %s6836_s28  ;;  %v10304_v0 = vld [vmem:[#allocation46_spill] sm:$0xff] }
 0xddd   : > { %2525 = vrot.lane.b32.xlu1 %v2480_v37, %s6836_s28  ;;  %6601 = vrcp.f32 %v10304_v0  ;;  %v6590_v37 = vpop.eup %6589  ;;  %v9510_v4 = vpop.xlane.xlu1 %4231  ;;  %v10318_v0 = vld [vmem:[#allocation140_spill] sm:$0xff] }
 0xdde   : > { %6603 = vrcp.f32 %v9194_v57 }
 0xddf   : > { %6605 = vrcp.f32 %v10307_v16  ;;  %v10320_v16 = vld [vmem:[#allocation139_spill] sm:$0xff] }
 0xde0   : > { %2519 = vrot.lane.b32.xlu0 %v2477_v54, %s6836_s28  ;;  %v6592_v54 = vpop.eup %6591  ;;  %6607 = vrcp.f32 %v9199_v21 }
 0xde1   : > { %2529 = vrot.lane.b32.xlu1 %v2482_v40, %s6836_s28  ;;  %v10308_v40 = vld [vmem:[#allocation138_spill] sm:$0xff]  ;;  %v6594_v53 = vpop.eup %6593  ;;  %6609 = vrcp.f32 %v10310_v28 }
 0xde2   : > { %v3119_v23 = vmul.f32 %v6590_v37, %v10308_v40  ;;  %v6596_v24 = vpop.eup %6595  ;;  %6611 = vrcp.f32 %v9204_v17  ;;  %v9534_v17 = vpop.xlane.xlu0 %4237  ;;  %v10319_v37 = vld [vmem:[#allocation161_spill] sm:$0xff] }
 0xde3   : > { %v6598_v46 = vpop.eup %6597  ;;  %v3118_v21 = vmul.f32 %v6596_v24, %v10312_v45  ;;  %v10324_v45 = vld [vmem:[#allocation159_spill] sm:$0xff] }
 0xde4   : > { %2523 = vrot.lane.b32.xlu0 %v2479_v56, %s6836_s28  ;;  %v10309_v56 = vld [vmem:[#allocation131_spill] sm:$0xff]  ;;  %v6600_v27 = vpop.eup %6599  ;;  %v3123_v50 = vmul.f32 %v6598_v46, %v10314_v25 }
 0xde5   : > { %3144 = vrot.lane.b32.xlu1 %v3111_v30, %s6835_s27  ;;  %v3116_v57 = vmul.f32 %v6592_v54, %v10309_v56  ;;  %v3121_v30 = vmul.f32 %v6594_v53, %v10311_v32  ;;  %v3120_v7 = vmul.f32 %v6600_v27, %v10315_v20  ;;  %v10322_v56 = vld [vmem:[#allocation160_spill] sm:$0xff]  ;;  %v10323_v32 = vld [vmem:[#allocation70_spill] sm:$0xff]  ;;  %v10325_v27 = vld [vmem:[#allocation45_spill] sm:$0xff] }
 0xde6   : > { %v10327_v20 = vld [vmem:[#allocation63_spill] sm:$0xff] }
 0xde8   : > { %2527 = vrot.lane.b32.xlu0 %v2481_v44, %s6836_s28  ;;  %v9522_v44 = vpop.xlane.xlu1 %4227 }
 0xde9   : > { %3148 = vrot.lane.b32.xlu1 %v3113_v5, %s6835_s27  ;;  %v10313_v5 = vld [vmem:[#allocation64_spill] sm:$0xff] }
 0xdea   : > { %6613 = vrcp.f32 %v10313_v5 }
 0xdeb   : > { %6615 = vrcp.f32 %v9209_v6 }
 0xdec   : > { %3142 = vrot.lane.b32.xlu0 %v3110_v42, %s6835_s27  ;;  %v6602_v42 = vpop.eup %6601  ;;  %v9536_v9 = vpop.xlane.xlu1 %4239 }
 0xded   : > { %3152 = vrot.lane.b32.xlu1 %v3115_v26, %s6835_s27  ;;  %v6604_v47 = vpop.eup %6603  ;;  %v10316_v26 = vld [vmem:[#allocation44_spill] sm:$0xff] }
 0xdee   : > { %6617 = vrcp.f32 %v10316_v26  ;;  %v6606_v8 = vpop.eup %6605  ;;  %v3122_v6 = vmul.f32 %v6604_v47, %v10318_v0  ;;  %v10328_v26 = vld [vmem:[#allocation158_spill] sm:$0xff]  ;;  %v10329_v0 = vld [vmem:[#allocation164_spill] sm:$0xff] }
 0xdef   : > { %6619 = vrcp.f32 %v9214_v31  ;;  %v6608_v60 = vpop.eup %6607  ;;  %v3754_v36 = vmul.f32 %v6606_v8, %v10319_v37 }
 0xdf0   : > { %3146 = vrot.lane.b32.xlu0 %v3112_v33, %s6835_s27  ;;  %v3125_v33 = vmul.f32 %v6602_v42, %v10317_v58  ;;  %6621 = vrcp.f32 %v9206_v12  ;;  %v9546_v54 = vpop.xlane.xlu1 %4235  ;;  %v3124_v40 = vmul.f32 %v6608_v60, %v10320_v16 }
 0xdf1   : > { %3156 = vrot.lane.b32.xlu1 %v3117_v10, %s6835_s27  ;;  %6623 = vrcp.f32 %v9220_v14 }
 0xdf4   : > { %3150 = vrot.lane.b32.xlu0 %v3114_v35, %s6835_s27  ;;  %v6610_v35 = vpop.eup %6609 }
 0xdf5   : > { %3160 = vrot.lane.b32.xlu1 %v3119_v23, %s6835_s27  ;;  %v6612_v31 = vpop.eup %6611  ;;  %v10321_v23 = vld [vmem:[#allocation68_spill] sm:$0xff] }
 0xdf6   : > { %6625 = vrcp.f32 %v10321_v23 }
 0xdf7   : > { %v6614_v24 = vpop.eup %6613  ;;  %6627 = vrcp.f32 %v9216_v51 }
 0xdf8   : > { %3154 = vrot.lane.b32.xlu0 %v3116_v57, %s6835_s27  ;;  %v3756_v57 = vmul.f32 %v6610_v35, %v10322_v56  ;;  %6629 = vrcp.f32 %v10323_v32 }
 0xdf9   : > { %3164 = vrot.lane.b32.xlu1 %v3121_v30, %s6835_s27  ;;  %6631 = vrcp.f32 %v10325_v27 }
 0xdfa   : > { %6633 = vrcp.f32 %v10327_v20 }
 0xdfc   : > { %3158 = vrot.lane.b32.xlu0 %v3118_v21, %s6835_s27  ;;  %v6616_v21 = vpop.eup %6615 }
 0xdfd   : > { %3168 = vrot.lane.b32.xlu1 %v3123_v50, %s6835_s27  ;;  %v6618_v42 = vpop.eup %6617  ;;  %v3755_v58 = vmul.f32 %v6616_v21, %v10328_v26  ;;  %v10338_v26 = vld [vmem:[#allocation173_spill] sm:$0xff] }
 0xe00   : > { %3162 = vrot.lane.b32.xlu0 %v3120_v7, %s6835_s27 }
 0xe01   : > { %3172 = vrot.lane.b32.xlu1 %v3125_v33, %s6835_s27  ;;  %v6620_v33 = vpop.eup %6619 }
 0xe02   : > { %v6622_v60 = vpop.eup %6621 }
 0xe03   : > { %v4779_v10 = vpop.xlane.xlu0 %4778  ;;  %v6624_v23 = vpop.eup %6623 }
 0xe04   : > { %3166 = vrot.lane.b32.xlu0 %v3122_v6, %s6835_s27  ;;  %v4808_v53 = vsub.f32 %v9323_v19, %v4779_v10  ;;  %v3753_v19 = vmul.f32 %v6612_v31, %v10324_v45  ;;  %v3760_v6 = vmul.f32 %v6618_v42, %v10329_v0  ;;  %v6626_v56 = vpop.eup %6625 }
 0xe05   : > { %3787 = vrot.lane.b32.xlu1 %v3754_v36, %s6834_s25  ;;  %v10330_v36 = vld [vmem:[#allocation73_spill] sm:$0xff] }
 0xe06   : > { %v4826_v5 = vmul.f32 1.442695, %v4808_v53 }
 0xe07   : > { %v4775_v12 = vpop.xlane.xlu0 %4774 }
 0xe08   : > { %v4806_v28 = vsub.f32 %v9326_v61, %v4775_v12  ;;  %3170 = vrot.lane.b32.xlu0 %v3124_v40, %s6835_s27  ;;  %v10326_v61 = vld [vmem:[#allocation165_spill] sm:$0xff]  ;;  %v10331_v40 = vld [vmem:[#allocation163_spill] sm:$0xff] }
 0xe09   : > { %3791 = vrot.lane.b32.xlu1 %v3756_v57, %s6834_s25  ;;  %v4777_v14 = vpop.xlane.xlu1 %4776  ;;  %v3758_v50 = vmul.f32 %v6614_v24, %v10326_v61  ;;  %v3757_v31 = vmul.f32 %v6620_v33, %v10331_v40  ;;  %v10332_v12 = vld [vmem:[#allocation169_spill] sm:$0xff]  ;;  %v10333_v24 = vld [vmem:[#allocation66_spill] sm:$0xff] }
 0xe0a   : > { %v4822_v30 = vmul.f32 1.442695, %v4806_v28  ;;  %v4807_v46 = vsub.f32 %v9331_v39, %v4777_v14  ;;  %v6628_v14 = vpop.eup %6627 }
 0xe0b   : > { %v4781_v25 = vpop.xlane.xlu0 %4780 }
 0xe0c   : > { %v4824_v51 = vmul.f32 1.442695, %v4807_v46  ;;  %v4809_v7 = vsub.f32 %v9328_v22, %v4781_v25  ;;  %3785 = vrot.lane.b32.xlu0 %v3753_v19, %s6834_s25  ;;  %6635 = vpow2.f32 %v4822_v30  ;;  %v10334_v30 = vld [vmem:[#allocation162_spill] sm:$0xff]  ;;  %v6630_v46 = vpop.eup %6629  ;;  %v10335_v19 = vld [vmem:[#allocation168_spill] sm:$0xff] }
 0xe0d   : > { %3795 = vrot.lane.b32.xlu1 %v3758_v50, %s6834_s25  ;;  %v4787_v39 = vpop.xlane.xlu1 %4786  ;;  %v3764_v21 = vmul.f32 %v6626_v56, %v10335_v19  ;;  %v6632_v27 = vpop.eup %6631  ;;  %v10336_v25 = vld [vmem:[#allocation104_spill] sm:$0xff] }
 0xe0e   : > { %6637 = vpow2.f32 %v4824_v51  ;;  %v4828_v47 = vmul.f32 1.442695, %v4809_v7  ;;  %v4812_v22 = vsub.f32 %v9334_v48, %v4787_v39  ;;  %v10337_v7 = vld [vmem:[#allocation167_spill] sm:$0xff] }
 0xe0f   : > { %6639 = vpow2.f32 %v4826_v5  ;;  %v4789_v8 = vpop.xlane.xlu0 %4788  ;;  %v6634_v5 = vpop.eup %6633  ;;  %v3761_v39 = vmul.f32 %v6630_v46, %v10337_v7 }
 0xe10   : > { %6641 = vpow2.f32 %v4828_v47  ;;  %v4813_v10 = vsub.f32 %v9340_v29, %v4789_v8  ;;  %3789 = vrot.lane.b32.xlu0 %v3755_v58, %s6834_s25  ;;  %v3762_v29 = vmul.f32 %v6622_v60, %v10332_v12  ;;  %v4834_v28 = vmul.f32 1.442695, %v4812_v22  ;;  %v10342_v12 = vld [vmem:[#allocation99_spill] sm:$0xff] }
 0xe11   : > { %3799 = vrot.lane.b32.xlu1 %v3760_v6, %s6834_s25  ;;  %v4783_v37 = vpop.xlane.xlu1 %4782  ;;  %6643 = vrcp.f32 %v10330_v36  ;;  %v3766_v58 = vmul.f32 %v6628_v14, %v10338_v26  ;;  %v10347_v26 = vld [vmem:[#allocation67_spill] sm:$0xff] }
 0xe12   : > { %v4836_v35 = vmul.f32 1.442695, %v4813_v10  ;;  %v4810_v16 = vsub.f32 %v9337_v11, %v4783_v37  ;;  %6645 = vrcp.f32 %v9456_v62  ;;  %v3759_v62 = vmul.f32 %v6624_v23, %v10334_v30  ;;  %v10339_v37 = vld [vmem:[#allocation166_spill] sm:$0xff]  ;;  %v10341_v23 = vld [vmem:[#allocation101_spill] sm:$0xff] }
 0xe13   : > { %v4785_v53 = vpop.xlane.xlu0 %4784  ;;  %6647 = vrcp.f32 %v10333_v24  ;;  %v3763_v36 = vmul.f32 %v6634_v5, %v10339_v37  ;;  %v10343_v24 = vld [vmem:[#allocation109_spill] sm:$0xff] }
 0xe14   : > { %v4830_v57 = vmul.f32 1.442695, %v4810_v16  ;;  %v4811_v48 = vsub.f32 %v9343_v43, %v4785_v53  ;;  %3793 = vrot.lane.b32.xlu0 %v3757_v31, %s6834_s25  ;;  %6649 = vpow2.f32 %v4836_v35  ;;  %v10340_v16 = vld [vmem:[#allocation172_spill] sm:$0xff] }
 0xe15   : > { %3803 = vrot.lane.b32.xlu1 %v3762_v29, %s6834_s25  ;;  %v4795_v11 = vpop.xlane.xlu1 %4794  ;;  %v3768_v40 = vmul.f32 %v6632_v27, %v10340_v16 }
 0xe16   : > { %v4832_v32 = vmul.f32 1.442695, %v4811_v48  ;;  %6651 = vpow2.f32 %v4830_v57  ;;  %v4816_v61 = vsub.f32 %v10336_v25, %v4795_v11  ;;  %v10344_v11 = vld [vmem:[#allocation171_spill] sm:$0xff] }
 0xe17   : > { %v4797_v45 = vpop.xlane.xlu0 %4796 }
 0xe18   : > { %6653 = vpow2.f32 %v4832_v32  ;;  %v4817_v43 = vsub.f32 %v9352_v1, %v4797_v45  ;;  %3797 = vrot.lane.b32.xlu0 %v3759_v62, %s6834_s25  ;;  %v10345_v62 = vld [vmem:[#allocation69_spill] sm:$0xff] }
 0xe19   : > { %6655 = vpow2.f32 %v4834_v28  ;;  %3807 = vrot.lane.b32.xlu1 %v3764_v21, %s6834_s25  ;;  %v4791_v50 = vpop.xlane.xlu1 %4790  ;;  %v9588_v42 = vpop.eup %6635 }
 0xe1a   : > { %6657 = vrcp.f32 %v9470_v2  ;;  %v4844_v20 = vmul.f32 1.442695, %v4817_v43  ;;  %v4814_v51 = vsub.f32 %v9349_v34, %v4791_v50  ;;  %v4842_v34 = vmul.f32 1.442695, %v4816_v61  ;;  %v10346_v50 = vld [vmem:[#allocation170_spill] sm:$0xff] }
 0xe1b   : > { %v9593_v47 = vpop.eup %6637  ;;  %v4793_v1 = vpop.xlane.xlu0 %4792 }
 0xe1c   : > { %v9596_v33 = vpop.eup %6639  ;;  %v4838_v8 = vmul.f32 1.442695, %v4814_v51  ;;  %v4815_v0 = vsub.f32 %v9355_v13, %v4793_v1  ;;  %3801 = vrot.lane.b32.xlu0 %v3761_v39, %s6834_s25  ;;  %v4886_v2 = vpack.c.bf16 %v9593_v47, %v9588_v42  ;;  %6659 = vpow2.f32 %v4844_v20 }
 0xe1d   : > { %v9602_v6 = vpop.eup %6641  ;;  %3811 = vrot.lane.b32.xlu1 %v3766_v58, %s6834_s25  ;;  %v4803_v60 = vpop.xlane.xlu1 %4802 }
 0xe1e   : > { %v4887_v10 = vpack.c.bf16 %v9602_v6, %v9596_v33  ;;  %v4840_v22 = vmul.f32 1.442695, %v4815_v0  ;;  %6083 = vmatprep.mubr.bf16.mxu0 %v4886_v2  ;;  %v6644_v13 = vpop.eup %6643  ;;  %6661 = vpow2.f32 %v4838_v8  ;;  %v4820_v29 = vsub.f32 %v10342_v12, %v4803_v60 }
 0xe1f   : > { %v4805_v35 = vpop.xlane.xlu0 %4804  ;;  %v6646_v31 = vpop.eup %6645  ;;  %v3765_v14 = vmul.f32 %v6644_v13, %v10344_v11 }
 0xe20   : > { %6663 = vpow2.f32 %v4840_v22  ;;  %v4821_v53 = vsub.f32 %v10341_v23, %v4805_v35  ;;  %3805 = vrot.lane.b32.xlu0 %v3763_v36, %s6834_s25  ;;  %6084 = vmatmul.mubr.bf16.vlgmr.msra.gmra.mxu0 %v4887_v10  ;;  %v6648_v57 = vpop.eup %6647  ;;  %v4397_v46 = vmul.f32 %v6646_v31, %v10345_v62  ;;  %v4850_v43 = vmul.f32 1.442695, %v4820_v29 }
 0xe21   : > { %6665 = vpow2.f32 %v4842_v34  ;;  %3815 = vrot.lane.b32.xlu1 %v3768_v40, %s6834_s25  ;;  %v4799_v56 = vpop.xlane.xlu1 %4798  ;;  %v9615_v32 = vpop.eup %6649  ;;  %v3767_v20 = vmul.f32 %v6648_v57, %v10346_v50 }
 0xe22   : > { %v4852_v48 = vmul.f32 1.442695, %v4821_v53  ;;  %v4818_v28 = vsub.f32 %v10343_v24, %v4799_v56 }
 0xe23   : > { %v4801_v30 = vpop.xlane.xlu0 %4800  ;;  %v9618_v45 = vpop.eup %6651 }
 0xe24   : > { %v4846_v19 = vmul.f32 1.442695, %v4818_v28  ;;  %v4819_v21 = vsub.f32 %v9369_v38, %v4801_v30  ;;  %3809 = vrot.lane.b32.xlu0 %v3765_v14, %s6834_s25  ;;  %6667 = vpow2.f32 %v4852_v48 }
 0xe25   : > { %v9622_v27 = vpop.eup %6653  ;;  %4430 = vrot.lane.b32.xlu1 %v4397_v46, %s6833_s24  ;;  %v1863_v5 = vpop.permute.xlu1 %1862 }
 0xe26   : > { %v9625_v25 = vpop.eup %6655  ;;  %v4848_v61 = vmul.f32 1.442695, %v4819_v21  ;;  %1908 = vst.msk [vmem:[#allocation2 + $0x18] sm:$0xff] %vm1904_vm2, %v1863_v5  ;;  %v4888_v51 = vpack.c.bf16 %v9622_v27, %v9618_v45  ;;  %6669 = vpow2.f32 %v4846_v19 }
 0xe27   : > { %v6658_v38 = vpop.eup %6657  ;;  %v1861_v7 = vpop.permute.xlu0 %1860  ;;  %v4889_v39 = vpack.c.bf16 %v9615_v32, %v9625_v25 }
 0xe28   : > { %6671 = vpow2.f32 %v4848_v61  ;;  %1907 = vst.msk [vmem:[#allocation2 + $0x10] sm:$0xff] %vm1904_vm2, %v1861_v7  ;;  %3813 = vrot.lane.b32.xlu0 %v3767_v20, %s6834_s25  ;;  %6087 = vmatprep.mubr.bf16.mxu0 %v4888_v51  ;;  %v4396_v58 = vmul.f32 %v6658_v38, %v10347_v26 }
 0xe29   : > { %6673 = vpow2.f32 %v4850_v43  ;;  %6088 = vmatmul.mubr.bf16.gmra.mxu0 %v4889_v39  ;;  %v1867_v1 = vpop.permute.xlu1 %1866  ;;  %v9637_v8 = vpop.eup %6659 }
 0xe2a   : > { %1910 = vst.msk [vmem:[#allocation2 + $0x28] sm:$0xff] %vm1904_vm2, %v1867_v1  ;;  %6675 = vrcp.f32 %v9444_v41 }
 0xe2b   : > { %v1865_v0 = vpop.permute.xlu0 %1864  ;;  %v9639_v2 = vpop.eup %6661  ;;  %6677 = vrcp.f32 %v9482_v49 }
 0xe2c   : > { %1909 = vst.msk [vmem:[#allocation2 + $0x20] sm:$0xff] %vm1904_vm2, %v1865_v0  ;;  %4428 = vrot.lane.b32.xlu0 %v4396_v58, %s6833_s24  ;;  %6679 = vrcp.f32 %v9458_v52 }
 0xe2d   : > { %v9643_v34 = vpop.eup %6663  ;;  %v1871_v60 = vpop.permute.xlu1 %1870  ;;  %6681 = vrcp.f32 %v9468_v15  ;;  %v10348_v15 = vld [vmem:[#allocation77_spill] sm:$0xff] }
 0xe2e   : > { %v9645_v10 = vpop.eup %6665  ;;  %1912 = vst.msk [vmem:[#allocation2 + $0x38] sm:$0xff] %vm1904_vm2, %v1871_v60  ;;  %v4890_v22 = vpack.c.bf16 %v9643_v34, %v9639_v2  ;;  %6683 = vrcp.f32 %v9496_v55 }
 0xe2f   : > { %v1869_v37 = vpop.permute.xlu0 %1868  ;;  %v4891_v36 = vpack.c.bf16 %v9637_v8, %v9645_v10  ;;  %6685 = vrcp.f32 %v9508_v59 }
 0xe30   : > { %1911 = vst.msk [vmem:[#allocation2 + $0x30] sm:$0xff] %vm1904_vm2, %v1869_v37  ;;  %6091 = vmatprep.mubr.bf16.mxu0 %v4890_v22  ;;  %6687 = vrcp.f32 %v9484_v18  ;;  %v10349_v18 = vld [vmem:[#allocation74_spill] sm:$0xff] }
 0xe31   : > { %6092 = vmatmul.mubr.bf16.gmra.mxu0 %v4891_v36  ;;  %v1875_v13 = vpop.permute.xlu1 %1874  ;;  %v9654_v35 = vpop.eup %6667  ;;  %6689 = vrcp.f32 %v9494_v63  ;;  %v10352_v36 = vld [vmem:[#allocation71_spill] sm:$0xff] }
 0xe32   : > { %1914 = vst.msk [vmem:[#allocation2 + $0x48] sm:$0xff] %vm1904_vm2, %v1875_v13  ;;  %6691 = vrcp.f32 %v9522_v44 }
 0xe33   : > { %v1873_v16 = vpop.permute.xlu0 %1872  ;;  %v9656_v40 = vpop.eup %6669  ;;  %6693 = vrcp.f32 %v9534_v17  ;;  %v10351_v17 = vld [vmem:[#allocation97_spill] sm:$0xff] }
 0xe34   : > { %1913 = vst.msk [vmem:[#allocation2 + $0x40] sm:$0xff] %vm1904_vm2, %v1873_v16  ;;  %6695 = vrcp.f32 %v9510_v4 }
 0xe35   : > { %v9659_v31 = vpop.eup %6671  ;;  %v1879_v23 = vpop.permute.xlu1 %1878  ;;  %6697 = vrcp.f32 %v9520_v3  ;;  %v10353_v3 = vld [vmem:[#allocation78_spill] sm:$0xff] }
 0xe36   : > { %v6674_v53 = vpop.eup %6673  ;;  %1916 = vst.msk [vmem:[#allocation2 + $0x58] sm:$0xff] %vm1904_vm2, %v1879_v23  ;;  %v4892_v12 = vpack.c.bf16 %v9659_v31, %v9656_v40  ;;  %6699 = vrcp.f32 %v9546_v54  ;;  %v10354_v23 = vld [vmem:[#allocation76_spill] sm:$0xff] }
 0xe37   : > { %v1877_v29 = vpop.permute.xlu0 %1876  ;;  %v4893_v56 = vpack.c.bf16 %v9654_v35, %v6674_v53  ;;  %v6676_v49 = vpop.eup %6675  ;;  %6701 = vrcp.f32 %v9536_v9 }
 0xe38   : > { %1915 = vst.msk [vmem:[#allocation2 + $0x50] sm:$0xff] %vm1904_vm2, %v1877_v29  ;;  %6095 = vmatprep.mubr.bf16.mxu0 %v4892_v12  ;;  %v4399_v1 = vmul.f32 %v6676_v49, %v10348_v15  ;;  %v6678_v26 = vpop.eup %6677  ;;  %v10355_v29 = vld [vmem:[#allocation100_spill] sm:$0xff] }
 0xe39   : > { %6096 = vmatmul.mubr.bf16.gmra.mxu0 %v4893_v56  ;;  %v1883_v57 = vpop.permute.xlu1 %1882  ;;  %v6680_v58 = vpop.eup %6679  ;;  %v4401_v63 = vmul.f32 %v6678_v26, %v10349_v18 }
 0xe3a   : > { %1918 = vst.msk [vmem:[#allocation2 + $0x68] sm:$0xff] %vm1904_vm2, %v1883_v57 }
 0xe3b   : > { %v1881_v48 = vpop.permute.xlu0 %1880 }
 0xe3c   : > { %1917 = vst.msk [vmem:[#allocation2 + $0x60] sm:$0xff] %vm1904_vm2, %v1881_v48 }
 0xe3d   : > { %v1887_v24 = vpop.permute.xlu1 %1886 }
 0xe3e   : > { %1920 = vst.msk [vmem:[#allocation2 + $0x78] sm:$0xff] %vm1904_vm2, %v1887_v24 }
 0xe3f   : > { %v1885_v28 = vpop.permute.xlu0 %1884 }
 0xe40   : > { %1919 = vst.msk [vmem:[#allocation2 + $0x70] sm:$0xff] %vm1904_vm2, %v1885_v28  ;;  %v10356_v28 = vld [vmem:[#allocation75_spill] sm:$0xff] }
 0xe41   : > { %v2502_v11 = vpop.permute.xlu1 %2501 }
 0xe42   : > { %2549 = vst.msk [vmem:[#allocation2 + $0x8] sm:$0xff] %vm2547_vm3, %v2502_v11 }
 0xe43   : > { %v2500_v14 = vpop.permute.xlu0 %2499 }
 0xe44   : > { %2548 = vst.msk [vmem:[#allocation2] sm:$0xff] %vm2547_vm3, %v2500_v14  ;;  %v10357_v14 = vld [vmem:[#allocation98_spill] sm:$0xff] }
 0xe45   : > { %v2506_v30 = vpop.permute.xlu1 %2505 }
 0xe46   : > { %2551 = vst.msk [vmem:[#allocation2 + $0x18] sm:$0xff] %vm2547_vm3, %v2506_v30 }
 0xe47   : > { %v2504_v62 = vpop.permute.xlu0 %2503 }
 0xe48   : > { %2550 = vst.msk [vmem:[#allocation2 + $0x10] sm:$0xff] %vm2547_vm3, %v2504_v62 }
 0xe49   : > { %4858 = vadd.xlane.f32.xlu1 %v9596_v33  ;;  %v2510_v46 = vpop.permute.xlu1 %2509 }
 0xe4a   : > { %2553 = vst.msk [vmem:[#allocation2 + $0x28] sm:$0xff] %vm2547_vm3, %v2510_v46 }
 0xe4b   : > { %v2508_v19 = vpop.permute.xlu0 %2507  ;;  %4860 = vadd.xlane.f32.xlu0 %v9602_v6 }
 0xe4c   : > { %2552 = vst.msk [vmem:[#allocation2 + $0x20] sm:$0xff] %vm2547_vm3, %v2508_v19 }
 0xe4d   : > { %4854 = vadd.xlane.f32.xlu1 %v9588_v42  ;;  %v2514_v21 = vpop.permute.xlu1 %2513 }
 0xe4e   : > { %2555 = vst.msk [vmem:[#allocation2 + $0x38] sm:$0xff] %vm2547_vm3, %v2514_v21  ;;  %v10358_v21 = vld [vmem:[#allocation96_spill] sm:$0xff] }
 0xe4f   : > { %v2512_v43 = vpop.permute.xlu0 %2511  ;;  %4856 = vadd.xlane.f32.xlu0 %v9593_v47 }
 0xe50   : > { %2554 = vst.msk [vmem:[#allocation2 + $0x30] sm:$0xff] %vm2547_vm3, %v2512_v43 }
 0xe51   : > { %4866 = vadd.xlane.f32.xlu1 %v9625_v25  ;;  %v2518_v33 = vpop.permute.xlu1 %2517 }
 0xe52   : > { %2557 = vst.msk [vmem:[#allocation2 + $0x48] sm:$0xff] %vm2547_vm3, %v2518_v33 }
 0xe53   : > { %v2516_v5 = vpop.permute.xlu0 %2515  ;;  %4868 = vadd.xlane.f32.xlu0 %v9615_v32 }
 0xe54   : > { %2556 = vst.msk [vmem:[#allocation2 + $0x40] sm:$0xff] %vm2547_vm3, %v2516_v5  ;;  %v10359_v5 = vld [vmem:[#allocation105_spill] sm:$0xff] }
 0xe55   : > { %4862 = vadd.xlane.f32.xlu1 %v9618_v45  ;;  %v2522_v42 = vpop.permute.xlu1 %2521 }
 0xe56   : > { %2559 = vst.msk [vmem:[#allocation2 + $0x58] sm:$0xff] %vm2547_vm3, %v2522_v42 }
 0xe57   : > { %v2520_v6 = vpop.permute.xlu0 %2519  ;;  %4864 = vadd.xlane.f32.xlu0 %v9622_v27 }
 0xe58   : > { %2558 = vst.msk [vmem:[#allocation2 + $0x50] sm:$0xff] %vm2547_vm3, %v2520_v6 }
 0xe59   : > { %4874 = vadd.xlane.f32.xlu1 %v9645_v10  ;;  %v2526_v47 = vpop.permute.xlu1 %2525 }
 0xe5a   : > { %2561 = vst.msk [vmem:[#allocation2 + $0x68] sm:$0xff] %vm2547_vm3, %v2526_v47 }
 0xe5b   : > { %v2524_v25 = vpop.permute.xlu0 %2523  ;;  %4876 = vadd.xlane.f32.xlu0 %v9637_v8  ;;  %v6682_v8 = vpop.eup %6681 }
 0xe5c   : > { %2560 = vst.msk [vmem:[#allocation2 + $0x60] sm:$0xff] %vm2547_vm3, %v2524_v25  ;;  %v6684_v44 = vpop.eup %6683  ;;  %v4403_v10 = vmul.f32 %v6682_v8, %v10351_v17  ;;  %v10360_v25 = vld [vmem:[#allocation95_spill] sm:$0xff] }
 0xe5d   : > { %4870 = vadd.xlane.f32.xlu1 %v9639_v2  ;;  %v2530_v32 = vpop.permute.xlu1 %2529  ;;  %v6686_v22 = vpop.eup %6685  ;;  %v4400_v13 = vmul.f32 %v6684_v44, %v10352_v36 }
 0xe5e   : > { %2563 = vst.msk [vmem:[#allocation2 + $0x78] sm:$0xff] %vm2547_vm3, %v2530_v32  ;;  %v4405_v16 = vmul.f32 %v6686_v22, %v10353_v3 }
 0xe5f   : > { %v2528_v45 = vpop.permute.xlu0 %2527  ;;  %4872 = vadd.xlane.f32.xlu0 %v9643_v34  ;;  %v10350_v34 = vld [vmem:[#allocation72_spill] sm:$0xff] }
 0xe60   : > { %2562 = vst.msk [vmem:[#allocation2 + $0x70] sm:$0xff] %vm2547_vm3, %v2528_v45  ;;  %v4398_v60 = vmul.f32 %v6680_v58, %v10350_v34 }
 0xe61   : > { %4882 = vadd.xlane.f32.xlu1 %v6674_v53  ;;  %v3145_v27 = vpop.permute.xlu1 %3144 }
 0xe62   : > { %3192 = vst.msk [vmem:[#allocation2 + $0x8] sm:$0xff] %vm3190_vm4, %v3145_v27 }
 0xe63   : > { %v3143_v61 = vpop.permute.xlu0 %3142  ;;  %4884 = vadd.xlane.f32.xlu0 %v9654_v35  ;;  %v6688_v35 = vpop.eup %6687 }
 0xe64   : > { %3191 = vst.msk [vmem:[#allocation2] sm:$0xff] %vm3190_vm4, %v3143_v61  ;;  %v4402_v53 = vmul.f32 %v6688_v35, %v10354_v23 }
 0xe65   : > { %4878 = vadd.xlane.f32.xlu1 %v9656_v40  ;;  %v3149_v50 = vpop.permute.xlu1 %3148  ;;  %v6690_v40 = vpop.eup %6689 }
 0xe66   : > { %3194 = vst.msk [vmem:[#allocation2 + $0x18] sm:$0xff] %vm3190_vm4, %v3149_v50  ;;  %v6692_v12 = vpop.eup %6691  ;;  %v4407_v56 = vmul.f32 %v6690_v40, %v10355_v29  ;;  %v10361_v50 = vld [vmem:[#allocation102_spill] sm:$0xff] }
 0xe67   : > { %v3147_v20 = vpop.permute.xlu0 %3146  ;;  %4880 = vadd.xlane.f32.xlu0 %v9659_v31  ;;  %v6694_v57 = vpop.eup %6693  ;;  %v4404_v11 = vmul.f32 %v6692_v12, %v10356_v28 }
 0xe68   : > { %3193 = vst.msk [vmem:[#allocation2 + $0x10] sm:$0xff] %vm3190_vm4, %v3147_v20  ;;  %v6696_v9 = vpop.eup %6695  ;;  %v4409_v30 = vmul.f32 %v6694_v57, %v10357_v14 }
 0xe69   : > { %v3153_v51 = vpop.permute.xlu1 %3152  ;;  %v6698_v62 = vpop.eup %6697  ;;  %v4406_v43 = vmul.f32 %v6696_v9, %v10358_v21 }
 0xe6a   : > { %3196 = vst.msk [vmem:[#allocation2 + $0x28] sm:$0xff] %vm3190_vm4, %v3153_v51  ;;  %v6700_v33 = vpop.eup %6699  ;;  %v4411_v42 = vmul.f32 %v6698_v62, %v10359_v5 }
 0xe6b   : > { %v3151_v41 = vpop.permute.xlu0 %3150  ;;  %v4408_v32 = vmul.f32 %v6700_v33, %v10360_v25  ;;  %v6702_v45 = vpop.eup %6701 }
 0xe6c   : > { %3195 = vst.msk [vmem:[#allocation2 + $0x20] sm:$0xff] %vm3190_vm4, %v3151_v41  ;;  %v4410_v20 = vmul.f32 %v6702_v45, %v10361_v50 }
 0xe6d   : > { %v3157_v38 = vpop.permute.xlu1 %3156 }
 0xe6e   : > { %3198 = vst.msk [vmem:[#allocation2 + $0x38] sm:$0xff] %vm3190_vm4, %v3157_v38 }
 0xe6f   : > { %v3155_v7 = vpop.permute.xlu0 %3154 }
 0xe70   : > { %3197 = vst.msk [vmem:[#allocation2 + $0x30] sm:$0xff] %vm3190_vm4, %v3155_v7 }
 0xe71   : > { %v3161_v39 = vpop.permute.xlu1 %3160 }
 0xe72   : > { %3200 = vst.msk [vmem:[#allocation2 + $0x48] sm:$0xff] %vm3190_vm4, %v3161_v39 }
 0xe73   : > { %v3159_v52 = vpop.permute.xlu0 %3158 }
 0xe74   : > { %3199 = vst.msk [vmem:[#allocation2 + $0x40] sm:$0xff] %vm3190_vm4, %v3159_v52 }
 0xe75   : > { %v3165_v55 = vpop.permute.xlu1 %3164 }
 0xe76   : > { %3202 = vst.msk [vmem:[#allocation2 + $0x58] sm:$0xff] %vm3190_vm4, %v3165_v55  ;;  %4434 = vrot.lane.b32.xlu1 %v4399_v1, %s6833_s24 }
 0xe77   : > { %v3163_v59 = vpop.permute.xlu0 %3162 }
 0xe78   : > { %3201 = vst.msk [vmem:[#allocation2 + $0x50] sm:$0xff] %vm3190_vm4, %v3163_v59 }
 0xe79   : > { %v3169_v0 = vpop.permute.xlu1 %3168 }
 0xe7a   : > { %3204 = vst.msk [vmem:[#allocation2 + $0x68] sm:$0xff] %vm3190_vm4, %v3169_v0  ;;  %4438 = vrot.lane.b32.xlu1 %v4401_v63, %s6833_s24 }
 0xe7b   : > { %v3167_v2 = vpop.permute.xlu0 %3166 }
 0xe7c   : > { %3203 = vst.msk [vmem:[#allocation2 + $0x60] sm:$0xff] %vm3190_vm4, %v3167_v2 }
 0xe7d   : > { %4432 = vrot.lane.b32.xlu0 %v4398_v60, %s6833_s24  ;;  %v3173_v37 = vpop.permute.xlu1 %3172 }
 0xe7e   : > { %3206 = vst.msk [vmem:[#allocation2 + $0x78] sm:$0xff] %vm3190_vm4, %v3173_v37  ;;  %4442 = vrot.lane.b32.xlu1 %v4403_v10, %s6833_s24 }
 0xe7f   : > { %v3171_v4 = vpop.permute.xlu0 %3170 }
 0xe80   : > { %3205 = vst.msk [vmem:[#allocation2 + $0x70] sm:$0xff] %vm3190_vm4, %v3171_v4 }
 0xe81   : > { %4436 = vrot.lane.b32.xlu0 %v4400_v13, %s6833_s24  ;;  %v3788_v31 = vpop.permute.xlu1 %3787 }
 0xe82   : > { %3835 = vst.msk [vmem:[#allocation2 + $0x8] sm:$0xff] %vm3833_vm5, %v3788_v31  ;;  %4446 = vrot.lane.b32.xlu1 %v4405_v16, %s6833_s24 }
 0xe83   : > { %v3786_v54 = vpop.permute.xlu0 %3785 }
 0xe84   : > { %3834 = vst.msk [vmem:[#allocation2] sm:$0xff] %vm3833_vm5, %v3786_v54 }
 0xe85   : > { %4440 = vrot.lane.b32.xlu0 %v4402_v53, %s6833_s24  ;;  %v3792_v48 = vpop.permute.xlu1 %3791 }
 0xe86   : > { %3837 = vst.msk [vmem:[#allocation2 + $0x18] sm:$0xff] %vm3833_vm5, %v3792_v48  ;;  %4450 = vrot.lane.b32.xlu1 %v4407_v56, %s6833_s24 }
 0xe87   : > { %v3790_v24 = vpop.permute.xlu0 %3789 }
 0xe88   : > { %3836 = vst.msk [vmem:[#allocation2 + $0x10] sm:$0xff] %vm3833_vm5, %v3790_v24 }
 0xe89   : > { %4444 = vrot.lane.b32.xlu0 %v4404_v11, %s6833_s24  ;;  %v3796_v46 = vpop.permute.xlu1 %3795 }
 0xe8a   : > { %3839 = vst.msk [vmem:[#allocation2 + $0x28] sm:$0xff] %vm3833_vm5, %v3796_v46  ;;  %4454 = vrot.lane.b32.xlu1 %v4409_v30, %s6833_s24 }
 0xe8b   : > { %v3794_v19 = vpop.permute.xlu0 %3793 }
 0xe8c   : > { %3838 = vst.msk [vmem:[#allocation2 + $0x20] sm:$0xff] %vm3833_vm5, %v3794_v19 }
 0xe8d   : > { %4448 = vrot.lane.b32.xlu0 %v4406_v43, %s6833_s24  ;;  %v3800_v6 = vpop.permute.xlu1 %3799 }
 0xe8e   : > { %3841 = vst.msk [vmem:[#allocation2 + $0x38] sm:$0xff] %vm3833_vm5, %v3800_v6  ;;  %4458 = vrot.lane.b32.xlu1 %v4411_v42, %s6833_s24 }
 0xe8f   : > { %v3798_v47 = vpop.permute.xlu0 %3797 }
 0xe90   : > { %3840 = vst.msk [vmem:[#allocation2 + $0x30] sm:$0xff] %vm3833_vm5, %v3798_v47 }
 0xe91   : > { %4452 = vrot.lane.b32.xlu0 %v4408_v32, %s6833_s24  ;;  %v3804_v27 = vpop.permute.xlu1 %3803 }
 0xe92   : > { %3843 = vst.msk [vmem:[#allocation2 + $0x48] sm:$0xff] %vm3833_vm5, %v3804_v27 }
 0xe93   : > { %v3802_v61 = vpop.permute.xlu0 %3801 }
 0xe94   : > { %3842 = vst.msk [vmem:[#allocation2 + $0x40] sm:$0xff] %vm3833_vm5, %v3802_v61 }
 0xe95   : > { %4456 = vrot.lane.b32.xlu0 %v4410_v20, %s6833_s24  ;;  %v3808_v51 = vpop.permute.xlu1 %3807 }
 0xe96   : > { %3845 = vst.msk [vmem:[#allocation2 + $0x58] sm:$0xff] %vm3833_vm5, %v3808_v51 }
 0xe97   : > { %v3806_v41 = vpop.permute.xlu0 %3805 }
 0xe98   : > { %3844 = vst.msk [vmem:[#allocation2 + $0x50] sm:$0xff] %vm3833_vm5, %v3806_v41 }
 0xe99   : > { %v3812_v38 = vpop.permute.xlu1 %3811 }
 0xe9a   : > { %3847 = vst.msk [vmem:[#allocation2 + $0x68] sm:$0xff] %vm3833_vm5, %v3812_v38 }
 0xe9b   : > { %v3810_v7 = vpop.permute.xlu0 %3809 }
 0xe9c   : > { %3846 = vst.msk [vmem:[#allocation2 + $0x60] sm:$0xff] %vm3833_vm5, %v3810_v7 }
 0xe9d   : > { %v3816_v49 = vpop.permute.xlu1 %3815 }
 0xe9e   : > { %3849 = vst.msk [vmem:[#allocation2 + $0x78] sm:$0xff] %vm3833_vm5, %v3816_v49 }
 0xe9f   : > { %v3814_v39 = vpop.permute.xlu0 %3813 }
 0xea0   : > { %3848 = vst.msk [vmem:[#allocation2 + $0x70] sm:$0xff] %vm3833_vm5, %v3814_v39 }
 0xea1   : > { %v4431_v52 = vpop.permute.xlu1 %4430 }
 0xea2   : > { %4478 = vst.msk [vmem:[#allocation2 + $0x8] sm:$0xff] %vm4476_vm6, %v4431_v52 }
 0xea3   : > { %v4429_v15 = vpop.permute.xlu0 %4428 }
 0xea4   : > { %4477 = vst.msk [vmem:[#allocation2] sm:$0xff] %vm4476_vm6, %v4429_v15 }
 0xed2   : > { %v4859_v1 = vpop.xlane.xlu1 %4858 }
 0xed3   : > { %6703 = vrcp.f32 %v4859_v1 }
 0xed4   : > { %v4861_v26 = vpop.xlane.xlu0 %4860 }
 0xed5   : > { %6705 = vrcp.f32 %v4861_v26 }
 0xed6   : > { %v4855_v55 = vpop.xlane.xlu1 %4854 }
 0xed7   : > { %6707 = vrcp.f32 %v4855_v55 }
 0xed8   : > { %v4857_v59 = vpop.xlane.xlu0 %4856 }
 0xed9   : > { %6709 = vrcp.f32 %v4857_v59 }
 0xeda   : > { %v4867_v58 = vpop.xlane.xlu1 %4866 }
 0xedb   : > { %6711 = vrcp.f32 %v4867_v58 }
 0xedc   : > { %v4869_v18 = vpop.xlane.xlu0 %4868 }
 0xede   : > { %v4863_v63 = vpop.xlane.xlu1 %4862 }
 0xedf   : > { %6713 = vrcp.f32 %v4863_v63 }
 0xee0   : > { %v6704_v8 = vpop.eup %6703  ;;  %6715 = vrcp.f32 %v4869_v18  ;;  %v4865_v0 = vpop.xlane.xlu0 %4864 }
 0xee1   : > { %v6085_v2 = vpop.f32.mrf.mxu0  ;;  %6717 = vrcp.f32 %v4865_v0 }
 0xee2   : > { %v5041_v34 = vmul.f32 %v6704_v8, %v6085_v2  ;;  %v4875_v44 = vpop.xlane.xlu1 %4874  ;;  %v6706_v17 = vpop.eup %6705 }
 0xee3   : > { %v4960_v60 = vpop.f32.mrf.mxu0  ;;  %6719 = vrcp.f32 %v4875_v44 }
 0xee4   : > { %5075 = vrot.lane.b32.xlu0 %v5041_v34, %s6832_s16  ;;  %v6708_v10 = vpop.eup %6707  ;;  %v4877_v22 = vpop.xlane.xlu0 %4876 }
 0xee5   : > { %v6086_v37 = vpop.f32.mrf.mxu0  ;;  %v5039_v4 = vmul.f32 %v6708_v10, %v4960_v60 }
 0xee6   : > { %v5042_v36 = vmul.f32 %v6706_v17, %v6086_v37  ;;  %v6710_v13 = vpop.eup %6709  ;;  %v4871_v3 = vpop.xlane.xlu1 %4870 }
 0xee7   : > { %v4963_v35 = vpop.f32.mrf.mxu0  ;;  %6721 = vrcp.f32 %v4871_v3 }
 0xee8   : > { %5077 = vrot.lane.b32.xlu1 %v5042_v36, %s6832_s16  ;;  %5071 = vrot.lane.b32.xlu0 %v5039_v4, %s6832_s16  ;;  %v6712_v16 = vpop.eup %6711  ;;  %6723 = vrcp.f32 %v4877_v22  ;;  %v4873_v40 = vpop.xlane.xlu0 %4872  ;;  %v5040_v31 = vmul.f32 %v6710_v13, %v4963_v35 }
 0xee9   : > { %v6089_v54 = vpop.f32.mrf.mxu0  ;;  %6725 = vrcp.f32 %v4873_v40 }
 0xeea   : > { %v5045_v23 = vmul.f32 %v6712_v16, %v6089_v54  ;;  %v4883_v53 = vpop.xlane.xlu1 %4882 }
 0xeeb   : > { %v4976_v12 = vpop.f32.mrf.mxu0 }
 0xeec   : > { %5073 = vrot.lane.b32.xlu1 %v5040_v31, %s6832_s16  ;;  %v6714_v29 = vpop.eup %6713  ;;  %v4885_v56 = vpop.xlane.xlu0 %4884  ;;  %5083 = vrot.lane.b32.xlu0 %v5045_v23, %s6832_s16 }
 0xeed   : > { %v6716_v57 = vpop.eup %6715  ;;  %v5043_v48 = vmul.f32 %v6714_v29, %v4976_v12  ;;  %v6090_v24 = vpop.f32.mrf.mxu0 }
 0xeee   : > { %v5046_v28 = vmul.f32 %v6716_v57, %v6090_v24  ;;  %v4879_v11 = vpop.xlane.xlu1 %4878  ;;  %v6718_v9 = vpop.eup %6717 }
 0xeef   : > { %6727 = vrcp.f32 %v4879_v11  ;;  %v4979_v14 = vpop.f32.mrf.mxu0 }
 0xef0   : > { %v6720_v30 = vpop.eup %6719  ;;  %6729 = vrcp.f32 %v4883_v53  ;;  %v4881_v62 = vpop.xlane.xlu0 %4880  ;;  %5085 = vrot.lane.b32.xlu1 %v5046_v28, %s6832_s16  ;;  %5079 = vrot.lane.b32.xlu0 %v5043_v48, %s6832_s16  ;;  %v5044_v19 = vmul.f32 %v6718_v9, %v4979_v14 }
 0xef1   : > { %6731 = vrcp.f32 %v4881_v62  ;;  %v6093_v46 = vpop.f32.mrf.mxu0 }
 0xef2   : > { %v5049_v21 = vmul.f32 %v6720_v30, %v6093_v46  ;;  %v4435_v43 = vpop.permute.xlu1 %4434  ;;  %6733 = vrcp.f32 %v4885_v56 }
 0xef3   : > { %4480 = vst.msk [vmem:[#allocation2 + $0x18] sm:$0xff] %vm4476_vm6, %v4435_v43  ;;  %v4992_v33 = vpop.f32.mrf.mxu0 }
 0xef4   : > { %v6722_v5 = vpop.eup %6721  ;;  %v4433_v42 = vpop.permute.xlu0 %4432  ;;  %5081 = vrot.lane.b32.xlu1 %v5044_v19, %s6832_s16  ;;  %5091 = vrot.lane.b32.xlu0 %v5049_v21, %s6832_s16 }
 0xef5   : > { %v6724_v6 = vpop.eup %6723  ;;  %v5047_v47 = vmul.f32 %v6722_v5, %v4992_v33  ;;  %4479 = vst.msk [vmem:[#allocation2 + $0x10] sm:$0xff] %vm4476_vm6, %v4433_v42  ;;  %v6094_v25 = vpop.f32.mrf.mxu0 }
 0xef6   : > { %v5050_v32 = vmul.f32 %v6724_v6, %v6094_v25  ;;  %v4439_v45 = vpop.permute.xlu1 %4438  ;;  %v6726_v27 = vpop.eup %6725 }
 0xef7   : > { %4482 = vst.msk [vmem:[#allocation2 + $0x28] sm:$0xff] %vm4476_vm6, %v4439_v45  ;;  %v4995_v61 = vpop.f32.mrf.mxu0 }
 0xef8   : > { %v4437_v50 = vpop.permute.xlu0 %4436  ;;  %5093 = vrot.lane.b32.xlu1 %v5050_v32, %s6832_s16  ;;  %5087 = vrot.lane.b32.xlu0 %v5047_v47, %s6832_s16  ;;  %v5048_v51 = vmul.f32 %v6726_v27, %v4995_v61 }
 0xef9   : > { %4481 = vst.msk [vmem:[#allocation2 + $0x20] sm:$0xff] %vm4476_vm6, %v4437_v50  ;;  %v6097_v20 = vpop.f32.mrf.mxu0 }
 0xefa   : > { %v4443_v41 = vpop.permute.xlu1 %4442 }
 0xefb   : > { %4484 = vst.msk [vmem:[#allocation2 + $0x38] sm:$0xff] %vm4476_vm6, %v4443_v41  ;;  %v5008_v38 = vpop.f32.mrf.mxu0 }
 0xefc   : > { %v6728_v7 = vpop.eup %6727  ;;  %v4441_v49 = vpop.permute.xlu0 %4440  ;;  %5089 = vrot.lane.b32.xlu1 %v5048_v51, %s6832_s16 }
 0xefd   : > { %v6730_v39 = vpop.eup %6729  ;;  %v5051_v52 = vmul.f32 %v6728_v7, %v5008_v38  ;;  %4483 = vst.msk [vmem:[#allocation2 + $0x30] sm:$0xff] %vm4476_vm6, %v4441_v49  ;;  %v6098_v15 = vpop.f32.mrf.mxu0 }
 0xefe   : > { %v6732_v1 = vpop.eup %6731  ;;  %v4447_v26 = vpop.permute.xlu1 %4446  ;;  %v5053_v18 = vmul.f32 %v6730_v39, %v6097_v20 }
 0xeff   : > { %4486 = vst.msk [vmem:[#allocation2 + $0x48] sm:$0xff] %vm4476_vm6, %v4447_v26  ;;  %v5011_v55 = vpop.f32.mrf.mxu0  ;;  %5095 = vrot.lane.b32.xlu0 %v5051_v52, %s6832_s16  ;;  %v6734_v8 = vpop.eup %6733 }
 0xf00   : > { %v5052_v59 = vmul.f32 %v6732_v1, %v5011_v55  ;;  %v4445_v58 = vpop.permute.xlu0 %4444  ;;  %v5054_v0 = vmul.f32 %v6734_v8, %v6098_v15 }
 0xf01   : > { %4485 = vst.msk [vmem:[#allocation2 + $0x40] sm:$0xff] %vm4476_vm6, %v4445_v58 }
 0xf02   : > { %5097 = vrot.lane.b32.xlu1 %v5052_v59, %s6832_s16  ;;  %v4451_v63 = vpop.permute.xlu1 %4450 }
 0xf03   : > { %4488 = vst.msk [vmem:[#allocation2 + $0x58] sm:$0xff] %vm4476_vm6, %v4451_v63  ;;  %5099 = vrot.lane.b32.xlu0 %v5053_v18, %s6832_s16 }
 0xf04   : > { %v4449_v2 = vpop.permute.xlu0 %4448 }
 0xf05   : > { %4487 = vst.msk [vmem:[#allocation2 + $0x50] sm:$0xff] %vm4476_vm6, %v4449_v2 }
 0xf06   : > { %5101 = vrot.lane.b32.xlu1 %v5054_v0, %s6832_s16  ;;  %v4455_v34 = vpop.permute.xlu1 %4454 }
 0xf07   : > { %4490 = vst.msk [vmem:[#allocation2 + $0x68] sm:$0xff] %vm4476_vm6, %v4455_v34 }
 0xf08   : > { %v4453_v60 = vpop.permute.xlu0 %4452 }
 0xf09   : > { %4489 = vst.msk [vmem:[#allocation2 + $0x60] sm:$0xff] %vm4476_vm6, %v4453_v60 }
 0xf0a   : > { %v4459_v44 = vpop.permute.xlu1 %4458 }
 0xf0b   : > { %4492 = vst.msk [vmem:[#allocation2 + $0x78] sm:$0xff] %vm4476_vm6, %v4459_v44 }
 0xf0c   : > { %v4457_v17 = vpop.permute.xlu0 %4456 }
 0xf0d   : > { %4491 = vst.msk [vmem:[#allocation2 + $0x70] sm:$0xff] %vm4476_vm6, %v4457_v17 }
 0xf56   : > { %v5076_v10 = vpop.permute.xlu0 %5075 }
 0xf57   : > { %5122 = vst.msk [vmem:[#allocation2 + $0x10] sm:$0xff] %vm5119_vm7, %v5076_v10 }
 0xf5a   : > { %v5072_v22 = vpop.permute.xlu0 %5071  ;;  %v5078_v37 = vpop.permute.xlu1 %5077 }
 0xf5b   : > { %5120 = vst.msk [vmem:[#allocation2] sm:$0xff] %vm5119_vm7, %v5072_v22  ;;  %5123 = vst.msk [vmem:[#allocation2 + $0x18] sm:$0xff] %vm5119_vm7, %v5078_v37 }
 0xf5e   : > { %v5138_v4 = vld [vmem:[#allocation2 + $0x10] sm:$0xff]  ;;  %v5074_v36 = vpop.permute.xlu1 %5073  ;;  %v5084_v13 = vpop.permute.xlu0 %5083 }
 0xf5f   : > { %5154 = vst [vmem:[%s9811_s4 + $0x10] sm:$0xff] %v5138_v4  ;;  %5121 = vst.msk [vmem:[#allocation2 + $0x8] sm:$0xff] %vm5119_vm7, %v5074_v36 }
 0xf60   : > { %5126 = vst.msk [vmem:[#allocation2 + $0x30] sm:$0xff] %vm5119_vm7, %v5084_v13 }
 0xf62   : > { %v5136_v35 = vld [vmem:[#allocation2] sm:$0xff]  ;;  %v5139_v3 = vld [vmem:[#allocation2 + $0x18] sm:$0xff]  ;;  %v5080_v16 = vpop.permute.xlu0 %5079  ;;  %v5086_v40 = vpop.permute.xlu1 %5085 }
 0xf63   : > { %5152 = vst [vmem:[%s9811_s4] sm:$0xff] %v5136_v35  ;;  %5155 = vst [vmem:[%s9811_s4 + $0x18] sm:$0xff] %v5139_v3 }
 0xf64   : > { %5124 = vst.msk [vmem:[#allocation2 + $0x20] sm:$0xff] %vm5119_vm7, %v5080_v16  ;;  %5127 = vst.msk [vmem:[#allocation2 + $0x38] sm:$0xff] %vm5119_vm7, %v5086_v40 }
 0xf66   : > { %v5137_v31 = vld [vmem:[#allocation2 + $0x8] sm:$0xff]  ;;  %v5092_v23 = vpop.permute.xlu0 %5091  ;;  %v5082_v53 = vpop.permute.xlu1 %5081 }
 0xf67   : > { %5153 = vst [vmem:[%s9811_s4 + $0x8] sm:$0xff] %v5137_v31  ;;  %v5142_v54 = vld [vmem:[#allocation2 + $0x30] sm:$0xff]  ;;  %5130 = vst.msk [vmem:[#allocation2 + $0x50] sm:$0xff] %vm5119_vm7, %v5092_v23 }
 0xf68   : > { %5158 = vst [vmem:[%s9811_s4 + $0x30] sm:$0xff] %v5142_v54  ;;  %5125 = vst.msk [vmem:[#allocation2 + $0x28] sm:$0xff] %vm5119_vm7, %v5082_v53 }
 0xf6a   : > { %v5088_v56 = vpop.permute.xlu0 %5087  ;;  %v5094_v57 = vpop.permute.xlu1 %5093 }
 0xf6b   : > { %v5140_v12 = vld [vmem:[#allocation2 + $0x20] sm:$0xff]  ;;  %v5143_v29 = vld [vmem:[#allocation2 + $0x38] sm:$0xff]  ;;  %5128 = vst.msk [vmem:[#allocation2 + $0x40] sm:$0xff] %vm5119_vm7, %v5088_v56  ;;  %5131 = vst.msk [vmem:[#allocation2 + $0x58] sm:$0xff] %vm5119_vm7, %v5094_v57 }
 0xf6c   : > { %5156 = vst [vmem:[%s9811_s4 + $0x20] sm:$0xff] %v5140_v12  ;;  %5159 = vst [vmem:[%s9811_s4 + $0x38] sm:$0xff] %v5143_v29 }
 0xf6e   : > { %v5146_v48 = vld [vmem:[#allocation2 + $0x50] sm:$0xff]  ;;  %v5090_v28 = vpop.permute.xlu1 %5089 }
 0xf6f   : > { %v5141_v24 = vld [vmem:[#allocation2 + $0x28] sm:$0xff]  ;;  %5162 = vst [vmem:[%s9811_s4 + $0x50] sm:$0xff] %v5146_v48  ;;  %5129 = vst.msk [vmem:[#allocation2 + $0x48] sm:$0xff] %vm5119_vm7, %v5090_v28 }
 0xf70   : > { %5157 = vst [vmem:[%s9811_s4 + $0x28] sm:$0xff] %v5141_v24 }
 0xf71   : > { %v5096_v11 = vpop.permute.xlu0 %5095 }
 0xf72   : > { %v5144_v9 = vld [vmem:[#allocation2 + $0x40] sm:$0xff]  ;;  %v5147_v14 = vld [vmem:[#allocation2 + $0x58] sm:$0xff]  ;;  %5132 = vst.msk [vmem:[#allocation2 + $0x60] sm:$0xff] %vm5119_vm7, %v5096_v11 }
 0xf73   : > { %5160 = vst [vmem:[%s9811_s4 + $0x40] sm:$0xff] %v5144_v9  ;;  %5163 = vst [vmem:[%s9811_s4 + $0x58] sm:$0xff] %v5147_v14 }
 0xf74   : > { %v5098_v30 = vpop.permute.xlu1 %5097 }
 0xf75   : > { %5133 = vst.msk [vmem:[#allocation2 + $0x68] sm:$0xff] %vm5119_vm7, %v5098_v30  ;;  %v5100_v62 = vpop.permute.xlu0 %5099 }
 0xf76   : > { %v5145_v46 = vld [vmem:[#allocation2 + $0x48] sm:$0xff]  ;;  %5134 = vst.msk [vmem:[#allocation2 + $0x70] sm:$0xff] %vm5119_vm7, %v5100_v62 }
 0xf77   : > { %5161 = vst [vmem:[%s9811_s4 + $0x48] sm:$0xff] %v5145_v46 }
 0xf78   : > { %v5102_v19 = vpop.permute.xlu1 %5101 }
 0xf79   : > { %v5148_v21 = vld [vmem:[#allocation2 + $0x60] sm:$0xff]  ;;  %5135 = vst.msk [vmem:[#allocation2 + $0x78] sm:$0xff] %vm5119_vm7, %v5102_v19 }
 0xf7a   : > { %5164 = vst [vmem:[%s9811_s4 + $0x60] sm:$0xff] %v5148_v21 }
 0xf7c   : > { %v5149_v43 = vld [vmem:[#allocation2 + $0x68] sm:$0xff] }
 0xf7d   : > { %5165 = vst [vmem:[%s9811_s4 + $0x68] sm:$0xff] %v5149_v43  ;;  %v5150_v33 = vld [vmem:[#allocation2 + $0x70] sm:$0xff] }
 0xf7e   : > { %5166 = vst [vmem:[%s9811_s4 + $0x70] sm:$0xff] %v5150_v33 }
 0xf80   : > { %v5151_v5 = vld [vmem:[#allocation2 + $0x78] sm:$0xff] }
 0xf81   : > { %5167 = vst [vmem:[%s9811_s4 + $0x78] sm:$0xff] %v5151_v5 }
 0xf82   : > { %6776 = shalt.err (!%p6773_p10)
}
 0xf83   : > { %s6777_s29 = scalar_lea.hbm %s9846_s19, 2048  ;;  %s6781_s25 = scalar_lea.hbm %s9893_s1, 4096 }
 0xf84   : > { %p6778_p0 = scmp.ne.s32.totalorder %s9846_s19, %s6777_s29  ;;  %p6782_p1 = scmp.lt.s32.totalorder %s9846_s19, %s9893_s1 }
 0xf85   : > { %p6783_p3 = scmp.lt.s32.totalorder %s6781_s25, %s6777_s29 }
 0xf86   : > { %p6779_p2 = pnand %p6778_p0, %p10362_p12 }
 0xf87   : > { %p6784_p6 = por %p6783_p3, %p6782_p1 }
 0xf88   : > { %p6780_p9 = pneg %p6779_p2 }
 0xf8a   : > { %p6785_p11 = pnand %p6784_p6, %p6780_p9 }
 0xf8c   : > { %6788 = shalt.err (!%p6785_p11)
}
 0xf8d   : > { %s6840_s30 = smov 128   ;;  %s6841_s2 = smov 8  }
 0xf8e   : > { %6168 = dma.vmem_to_hbm [thread:$0]  (%p10362_p12), %s9848_s11, 2048, %s9846_s19, %s5169_s20, %s6840_s30, %s6840_s30, %s6841_s2  }
 0xf8f PF: > { %s5197_s3 = sand.u32 1, %s6815_s6   ;;  %p10363_p13 = scmp.ne.s32.totalorder %s9963_s18, 0 }
 0xf90   : > { %p10364_p4 = scmp.ge.s32.totalorder %s6827_s9, 2  ;;  %s5198_s4 = scalar_lea.sflag [#allocation5], %s5197_s3 }
 0xf92   : > { %p6175_p5 = pnand %p10364_p4, %p10363_p13 }
 0xf94   : > { %p6176_p7 = pneg %p6175_p5 }
 0xf96   : > { %6810 = dma.done.wait (%p6176_p7), %s5198_s4, 2048  }
 0xf97   : > { %6812 = vsyncadd (%p6176_p7), %s5198_s4, 4294965248  ;;  %p14_p8 = scmp.ge.s32.totalorder %s6877_s12, 4   ;;  %s10365_s6 = smov %s6819_s7 }
 0xf98   : > { %s10366_s7 = smov %s6823_s8  ;;  %s10367_s8 = smov %s6889_s15 }
 0xf99   : > { %s10368_s9 = smov %s6877_s12  ;;  %16 = sbr.rel (!%p14_p8) target bundleno = 5 (0x5), region = 69 }
 0xf9e   :  { %5203 = vsyncpa [#allocation4], 1 }
 0xf9f   :  { %5205 = vsyncpa [#allocation4 + $0x1], 1 }
 0xfa0   :  { %5206 = vsyncpa [#allocation5], 1 }
 0xfa1   :  { %5208 = vsyncpa [#allocation5 + $0x1], 1 }

</bundles_post_ra>
